<compile_context>
chip_gen: v6e
topology: v6e:2x2x1
jax: 0.10.0
libtpu: 0.0.40
codegen_flags: <defaults>
</compile_context>

<pallas_src>
import math
import numpy as np

import jax
import jax.numpy as jnp
from jax.experimental import pallas as pl
from jax.experimental.pallas import tpu as pltpu

# ---------------- small, config-consistent dimensions ----------------
B = 2            # batch
S = 16           # query sequence (4x4 spatial grid, no CLS token)
S_ENC = 8        # encoder (EVA) sequence length
H = 64           # hidden_size
N_HEADS = 4      # num_attention_heads
N_KV = 2         # num_key_value_heads
HD = H // N_HEADS            # head_dim = 16 (divisible by 4 for 3D RoPE)
GROUPS = N_HEADS // N_KV     # grouped-query groups (repeat_interleave)
KVW = N_KV * HD              # packed k/v width = 32
INTER = 128      # intermediate_size
E = 32           # eva_embedding_size
EPS = 1e-6
LS_INIT = 0.1
ROPE_BASE = 10000.0
GRID_SIZE = 16   # image_size // patch_size
QK_SCALE = 1.0 / math.sqrt(HD)
NUM_ADA = 6      # number of AdaLN modules in the block
BS = B * S

assert H == N_HEADS * HD
assert N_HEADS % N_KV == 0
assert HD % 4 == 0           # 3D RoPE requires head_dim % 4 == 0
assert H % HD == 0 and KVW % HD == 0   # rotate-half matrix tiling assumption


# ---------------- in-kernel helpers ----------------
def _rms(x, w):
    var = jnp.mean(x * x, axis=-1, keepdims=True)
    return x * jax.lax.rsqrt(var + EPS) * w


def _gqa_attention(q, k, v, wo_bf16, kv_rows):
    # q: (B*S, H) already scaled by 1/sqrt(HD); k/v: (B*kv_rows, KVW); wo: bf16 (H, H)
    # Loop over batch x kv-group; the GROUPS query heads of a group are stacked along
    # rows so each group costs one scores matmul, one softmax and one PV matmul.
    ctx_rows = []
    for b in range(B):
        qb = q[b * S:(b + 1) * S, :]
        kb = k[b * kv_rows:(b + 1) * kv_rows, :]
        vb = v[b * kv_rows:(b + 1) * kv_rows, :]
        head_ctx = [None] * N_HEADS
        for j in range(N_KV):
            qg = jnp.concatenate(
                [qb[:, (j * GROUPS + g) * HD:(j * GROUPS + g + 1) * HD]
                 for g in range(GROUPS)], axis=0)                       # (GROUPS*S, HD)
            kg = kb[:, j * HD:(j + 1) * HD]                             # (kv_rows, HD)
            vg = vb[:, j * HD:(j + 1) * HD]
            s = jnp.dot(qg, kg.T, preferred_element_type=jnp.float32)   # (GROUPS*S, kv_rows)
            s = s - jnp.max(s, axis=-1, keepdims=True)
            e = jnp.exp(s)
            p = e * pl.reciprocal(jnp.sum(e, axis=-1, keepdims=True), approx=True)
            og = jnp.dot(p, vg, preferred_element_type=jnp.float32)     # (GROUPS*S, HD)
            for g in range(GROUPS):
                head_ctx[j * GROUPS + g] = og[g * S:(g + 1) * S, :]
        ctx_rows.append(jnp.concatenate(head_ctx, axis=1))              # (S, H)
    ctx = jnp.concatenate(ctx_rows, axis=0)                             # (B*S, H)
    return jnp.dot(ctx.astype(jnp.bfloat16), wo_bf16,
                   preferred_element_type=jnp.float32)


# ---------------- fused DiT-block kernel (single invocation, no grid) ----------------
def dit_block_kernel(x_ref, enc_ref, mods_ref, rope_ref, rot_ref, vecw_ref,
                     saw_ref, caw_ref, evaw_ref, wgu_ref, wdn_ref, o_ref):
    x = x_ref[...]                              # (B*S, H) f32
    enc = enc_ref[...]                          # (B*S_ENC, E) f32
    mods = mods_ref[...]                        # (B*S, 12H) f32 (hoisted AdaLN matmul)

    cos_t = rope_ref[0]                         # (B*S, H)
    sin_t = rope_ref[1]
    rot = rot_ref[...]                          # (H, H) block-diag signed rotate_half

    # packed per-channel vectors:
    #   rows 0..5  : sandwich RMSNorm weights   (sa_pre, sa_post, ca_pre, ca_post, mlp_pre, mlp_post)
    #   rows 6..11 : AdaLN internal norm weights (same order as modulation stacking)
    #   rows 12..14: layer scales 1..3, row 15: pad
    vw = vecw_ref[...]
    sw = [vw[i:i + 1] for i in range(6)]
    aw = [vw[6 + i:7 + i] for i in range(6)]
    ls = [vw[12 + i:13 + i] for i in range(3)]

    def adaln(h, idx):
        m = mods[:, idx * 2 * H:(idx + 1) * 2 * H]
        return _rms(h, aw[idx]) * (1.0 + m[:, H:]) + m[:, :H]

    def rope(t):
        # full-width RoPE: rotate_half is one matmul with the block-diagonal
        # signed permutation matrix (valid for any width that is a multiple of HD).
        w = t.shape[-1]
        return (t * cos_t[:, :w]
                + jnp.dot(t, rot[:w, :w], preferred_element_type=jnp.float32)
                * sin_t[:, :w])

    saw = saw_ref[...]                          # bf16 (H, 2H + 2*KVW) = [Wq|Wk|Wv|Wo]
    caw = caw_ref[...]                          # bf16, same layout for cross-attn
    evaw = evaw_ref[...]                        # f32 (E+1, H): rows 0..E-1 weight, row E bias

    # ---- self-attention sub-block (sandwich pre/post norm + AdaLN) ----
    h = adaln(_rms(x, sw[0]), 0)
    qkv = jnp.dot(h.astype(jnp.bfloat16), saw[:, :H + 2 * KVW],
                  preferred_element_type=jnp.float32)                  # (B*S, H+2*KVW)
    q = rope(qkv[:, :H] * QK_SCALE)
    k = rope(qkv[:, H:H + KVW])
    v = qkv[:, H + KVW:]
    att = _gqa_attention(q, k, v, saw[:, H + 2 * KVW:], S)
    x = x + adaln(_rms(att * ls[0], sw[1]), 1)

    # ---- cross-attention sub-block (eva_proj -> attention, no RoPE) ----
    h = adaln(_rms(x, sw[2]), 2)
    eva = jnp.dot(enc, evaw[:E], preferred_element_type=jnp.float32) + evaw[E:E + 1]
    q = jnp.dot(h.astype(jnp.bfloat16), caw[:, :H],
                preferred_element_type=jnp.float32) * QK_SCALE
    kv = jnp.dot(eva.astype(jnp.bfloat16), caw[:, H:H + 2 * KVW],
                 preferred_element_type=jnp.float32)                   # (B*S_ENC, 2*KVW)
    att = _gqa_attention(q, kv[:, :KVW], kv[:, KVW:], caw[:, H + 2 * KVW:], S_ENC)
    x = x + adaln(_rms(att * ls[1], sw[3]), 3)

    # ---- SwiGLU MLP sub-block ----
    h = adaln(_rms(x, sw[4]), 4)
    gu = jnp.dot(h.astype(jnp.bfloat16), wgu_ref[...],
                 preferred_element_type=jnp.float32)                   # (B*S, 2*INTER)
    g = gu[:, :INTER]
    act = g * pl.reciprocal(1.0 + jnp.exp(-g), approx=True) * gu[:, INTER:]
    m = jnp.dot(act.astype(jnp.bfloat16), wdn_ref[...],
                preferred_element_type=jnp.float32)
    x = x + adaln(_rms(m * ls[2], sw[5]), 5)

    o_ref[...] = x


# ---------------- pallas_call wrapper ----------------
def dit_block_pallas(packed, hidden_states, encoder_hidden_states, timestep_emb):
    x2 = hidden_states.reshape(B * S, H)
    enc2 = encoder_hidden_states.reshape(B * S_ENC, E)

    # AdaLN modulations hoisted out of the kernel: the M=1 matmul wastes the MXU and
    # its (H, 12H) weight was ~half of all kernel weight DMA bytes.
    st = timestep_emb * jax.nn.sigmoid(timestep_emb)                   # SiLU(t), (B, H)
    mods = jnp.dot(st, packed['w_mod']) + packed['b_mod']              # (B, 12H)
    mods = jnp.repeat(mods, S, axis=0)                                 # (B*S, 12H)

    # Single grid-less invocation: both batch elements row-stacked (M = B*S = 32),
    # every operand whole in VMEM (~0.3 MB total), one DMA-in / compute / DMA-out.
    # TODO(synk): on v7x, shard the batch across the two TensorCores with
    # pl.core_map(pltpu.create_tensorcore_mesh(...)) if profiling shows it pays.
    out = pl.pallas_call(
        dit_block_kernel,
        out_shape=jax.ShapeDtypeStruct((B * S, H), jnp.float32),
    )(x2, enc2, mods, packed['rope_cs'], packed['rot'], packed['vec_w'],
      packed['sa_w'], packed['ca_w'], packed['eva_wb'],
      packed['mlp_w_gu'], packed['mlp_w_dn'])
    return out.reshape(B, S, H)


# ---------------- 3D RoPE table (host-side, like registered buffers) ----------------
def make_rope_3d(seq_len, head_dim, grid_size, base):
    dim_h = head_dim // 4
    dim_w = head_dim // 4
    dim_d = head_dim // 2
    has_cls = (seq_len == grid_size * grid_size + 1)
    spatial = seq_len - (1 if has_cls else 0)
    gh = int(math.sqrt(spatial))
    gw = gh
    inv_h = 1.0 / base ** (np.arange(0, dim_h, 2, dtype=np.float32) / dim_h)
    inv_w = 1.0 / base ** (np.arange(0, dim_w, 2, dtype=np.float32) / dim_w)
    inv_d = 1.0 / base ** (np.arange(0, dim_d, 2, dtype=np.float32) / dim_d)
    rows = []
    if has_cls:
        rows.append(np.zeros(head_dim, np.float32))
    for hh in range(gh):
        for ww in range(gw):
            fh = hh * inv_h
            fw = ww * inv_w
            fd = 0.0 * inv_d
            rows.append(np.concatenate([fh, fh, fw, fw, fd, fd]).astype(np.float32))
    emb = np.stack(rows, axis=0)  # (seq_len, head_dim)
    return jnp.asarray(np.cos(emb), jnp.float32), jnp.asarray(np.sin(emb), jnp.float32)


# ---------------- host-side weight packing (done once, outside jit) ----------------
def pack_params(p, cos_hd, sin_hd):
    order = ('sa_ada_pre', 'sa_ada_post', 'ca_ada_pre', 'ca_ada_post',
             'mlp_ada_pre', 'mlp_ada_post')
    # Kept on the host side (used by the wrapper, not the kernel):
    w_mod = jnp.concatenate([p[n + '_mw'] for n in order], axis=1)      # (H, 12H)
    b_mod = jnp.concatenate([p[n + '_mb'] for n in order], axis=1)      # (1, 12H)

    vec_rows = [p['sa_pre_w'], p['sa_post_w'], p['ca_pre_w'], p['ca_post_w'],
                p['mlp_pre_w'], p['mlp_post_w']]
    vec_rows += [p[n + '_nw'] for n in order]
    vec_rows += [p['ls1'], p['ls2'], p['ls3'], jnp.zeros((1, H), jnp.float32)]
    vec_w = jnp.concatenate(vec_rows, axis=0)                           # (16, H) f32

    # bf16 MXU operands (f32 accumulation in-kernel).
    sa_w = jnp.concatenate([p['sa_wq'], p['sa_wk'], p['sa_wv'], p['sa_wo']],
                           axis=1).astype(jnp.bfloat16)                 # (H, 2H+2*KVW)
    ca_w = jnp.concatenate([p['ca_wq'], p['ca_wk'], p['ca_wv'], p['ca_wo']],
                           axis=1).astype(jnp.bfloat16)
    eva_wb = jnp.concatenate([p['eva_w'], p['eva_b']], axis=0)          # (E+1, H) f32 (tiny)
    mlp_w_gu = jnp.concatenate([p['mlp_wg'], p['mlp_wu']],
                               axis=1).astype(jnp.bfloat16)             # (H, 2*INTER)
    mlp_w_dn = p['mlp_wd'].astype(jnp.bfloat16)                         # (INTER, H)

    # RoPE: per-head cos/sin tiled across heads (lanes) and batches (rows).
    cos_full = jnp.tile(cos_hd, (B, N_HEADS))                           # (B*S, H)
    sin_full = jnp.tile(sin_hd, (B, N_HEADS))
    rope_cs = jnp.stack([cos_full, sin_full], axis=0)                   # (2, B*S, H)

    # rotate_half as a block-diagonal signed permutation matrix (one per head):
    #   y[:HD/2] = -x[HD/2:],  y[HD/2:] = x[:HD/2]     (y = x @ R)
    R = np.zeros((H, H), np.float32)
    for h in range(N_HEADS):
        base = h * HD
        for j in range(HD // 2):
            R[base + j + HD // 2, base + j] = -1.0
            R[base + j, base + j + HD // 2] = 1.0
    rot = jnp.asarray(R)

    return {'w_mod': w_mod, 'b_mod': b_mod, 'vec_w': vec_w,
            'rope_cs': rope_cs, 'rot': rot,
            'sa_w': sa_w, 'ca_w': ca_w, 'eva_wb': eva_wb,
            'mlp_w_gu': mlp_w_gu, 'mlp_w_dn': mlp_w_dn}


# ---------------- pure-JAX reference (mirrors the PyTorch forward) ----------------
def ref_rms(x, w):
    var = jnp.mean(x * x, axis=-1, keepdims=True)
    return w * (x * jax.lax.rsqrt(var + EPS))


def ref_adaln(x, t, w_norm, wmod, bmod):
    st = t * (1.0 / (1.0 + jnp.exp(-t)))            # SiLU on (B, H)
    mod = st @ wmod + bmod[0]                        # (B, 2H)
    shift = mod[:, :H][:, None, :]
    scale = mod[:, H:][:, None, :]
    return ref_rms(x, w_norm) * (1.0 + scale) + shift


def ref_attn(hq, hkv, wq, wk, wv, wo, cos, sin):
    bq, sq, _ = hq.shape
    skv = hkv.shape[1]
    q = (hq @ wq).reshape(bq, sq, N_HEADS, HD).transpose(0, 2, 1, 3)
    k = (hkv @ wk).reshape(bq, skv, N_KV, HD).transpose(0, 2, 1, 3)
    v = (hkv @ wv).reshape(bq, skv, N_KV, HD).transpose(0, 2, 1, 3)
    if cos is not None:
        c = cos[None, None]
        s_ = sin[None, None]

        def rh(x):
            half = x.shape[-1] // 2
            return jnp.concatenate([-x[..., half:], x[..., :half]], axis=-1)

        q = q * c + rh(q) * s_
        k = k * c + rh(k) * s_
    k = jnp.repeat(k, GROUPS, axis=1)
    v = jnp.repeat(v, GROUPS, axis=1)
    scores = jnp.einsum('bhqd,bhkd->bhqk', q, k) / math.sqrt(HD)
    p = jax.nn.softmax(scores.astype(jnp.float32), axis=-1)
    o = jnp.einsum('bhqk,bhkd->bhqd', p, v)
    o = o.transpose(0, 2, 1, 3).reshape(bq, sq, H)
    return o @ wo


def ref_forward(p, x, enc, t, cos, sin):
    # self-attn
    res = x
    h = ref_rms(x, p['sa_pre_w'])
    h = ref_adaln(h, t, p['sa_ada_pre_nw'], p['sa_ada_pre_mw'], p['sa_ada_pre_mb'])
    a = ref_attn(h, h, p['sa_wq'], p['sa_wk'], p['sa_wv'], p['sa_wo'], cos, sin)
    a = a * p['ls1']
    h = ref_rms(a, p['sa_post_w'])
    h = ref_adaln(h, t, p['sa_ada_post_nw'], p['sa_ada_post_mw'], p['sa_ada_post_mb'])
    x = res + h
    # cross-attn
    res = x
    h = ref_rms(x, p['ca_pre_w'])
    h = ref_adaln(h, t, p['ca_ada_pre_nw'], p['ca_ada_pre_mw'], p['ca_ada_pre_mb'])
    eva = enc @ p['eva_w'] + p['eva_b']
    a = ref_attn(h, eva, p['ca_wq'], p['ca_wk'], p['ca_wv'], p['ca_wo'], None, None)
    a = a * p['ls2']
    h = ref_rms(a, p['ca_post_w'])
    h = ref_adaln(h, t, p['ca_ada_post_nw'], p['ca_ada_post_mw'], p['ca_ada_post_mb'])
    x = res + h
    # mlp
    res = x
    h = ref_rms(x, p['mlp_pre_w'])
    h = ref_adaln(h, t, p['mlp_ada_pre_nw'], p['mlp_ada_pre_mw'], p['mlp_ada_pre_mb'])
    g = h @ p['mlp_wg']
    g = g * (1.0 / (1.0 + jnp.exp(-g)))
    u = h @ p['mlp_wu']
    m = (g * u) @ p['mlp_wd']
    m = m * p['ls3']
    h = ref_rms(m, p['mlp_post_w'])
    h = ref_adaln(h, t, p['mlp_ada_post_nw'], p['mlp_ada_post_mw'], p['mlp_ada_post_mb'])
    x = res + h
    return x


# ---------------- deterministic parameter init ----------------
def make_params(key):
    ks = iter(jax.random.split(key, 48))

    def nrm(shape, std):
        return std * jax.random.normal(next(ks), shape, dtype=jnp.float32)

    def onesish(shape):
        return 1.0 + 0.1 * jax.random.normal(next(ks), shape, dtype=jnp.float32)

    p = {}
    for pre in ('sa', 'ca'):  # self-attn / cross-attn projections, stored [in, out]
        p[f'{pre}_wq'] = nrm((H, N_HEADS * HD), 0.05)
        p[f'{pre}_wk'] = nrm((H, N_KV * HD), 0.05)
        p[f'{pre}_wv'] = nrm((H, N_KV * HD), 0.05)
        p[f'{pre}_wo'] = nrm((N_HEADS * HD, H), 0.05)
    p['mlp_wg'] = nrm((H, INTER), 0.05)
    p['mlp_wu'] = nrm((H, INTER), 0.05)
    p['mlp_wd'] = nrm((INTER, H), 0.05)
    p['eva_w'] = nrm((E, H), 0.05)
    p['eva_b'] = nrm((1, H), 0.02)
    for i in (1, 2, 3):
        p[f'ls{i}'] = LS_INIT * jnp.ones((1, H), jnp.float32)
    for name in ('sa_pre', 'sa_post', 'ca_pre', 'ca_post', 'mlp_pre', 'mlp_post'):
        p[name + '_w'] = onesish((1, H))
    for name in ('sa_ada_pre', 'sa_ada_post', 'ca_ada_pre', 'ca_ada_post',
                 'mlp_ada_pre', 'mlp_ada_post'):
        p[name + '_nw'] = onesish((1, H))
        p[name + '_mw'] = nrm((H, 2 * H), 0.02)   # module zero-inits; random to exercise path
        p[name + '_mb'] = nrm((1, 2 * H), 0.02)
    return p


if __name__ == "__main__":
    key = jax.random.PRNGKey(0)
    k_x, k_enc, k_t, k_p = jax.random.split(key, 4)

    hidden_states = jax.random.normal(k_x, (B, S, H), jnp.float32)
    encoder_hidden_states = jax.random.normal(k_enc, (B, S_ENC, E), jnp.float32)
    timestep_emb = jax.random.normal(k_t, (B, H), jnp.float32)
    params = make_params(k_p)

    cos_hd, sin_hd = make_rope_3d(S, HD, GRID_SIZE, ROPE_BASE)
    packed = pack_params(params, cos_hd, sin_hd)

    fwd = jax.jit(dit_block_pallas)
    out = fwd(packed, hidden_states, encoder_hidden_states, timestep_emb)
    out = jax.block_until_ready(out)

    ref = ref_forward(params, hidden_states, encoder_hidden_states,
                      timestep_emb, cos_hd, sin_hd)
    ref = jax.block_until_ready(ref)

    assert out.shape == (B, S, H) and out.dtype == jnp.float32
    max_err = float(jnp.max(jnp.abs(out - ref)))
    if not np.allclose(np.asarray(out), np.asarray(ref), atol=5e-2, rtol=5e-2):
        raise AssertionError(f"Pallas output mismatch vs JAX reference (max abs err {max_err:.3e})")
    print("KERNEL_OK")
</pallas_src>

<mosaic_0001>
module attributes {stable_mosaic.version = 11 : i64} {
  func.func @dit_block_kernel(%arg0: memref<32x64xf32, #tpu.memory_space<vmem>>, %arg1: memref<16x32xf32, #tpu.memory_space<vmem>>, %arg2: memref<32x768xf32, #tpu.memory_space<vmem>>, %arg3: memref<2x32x64xf32, #tpu.memory_space<vmem>>, %arg4: memref<64x64xf32, #tpu.memory_space<vmem>>, %arg5: memref<16x64xf32, #tpu.memory_space<vmem>>, %arg6: memref<64x192xbf16, #tpu.memory_space<vmem>>, %arg7: memref<64x192xbf16, #tpu.memory_space<vmem>>, %arg8: memref<33x64xf32, #tpu.memory_space<vmem>>, %arg9: memref<64x256xbf16, #tpu.memory_space<vmem>>, %arg10: memref<128x64xbf16, #tpu.memory_space<vmem>>, %arg11: memref<32x64xf32, #tpu.memory_space<vmem>>) attributes {dimension_semantics = [], scalar_prefetch = 0 : i64, scratch_operands = 0 : i64, tpu.core_type = #tpu.core_type<tc>} {
    %c0 = arith.constant 0 : index
    %c0_0 = arith.constant 0 : index
    %0 = vector.load %arg0[%c0, %c0_0] : memref<32x64xf32, #tpu.memory_space<vmem>>, vector<32x64xf32>
    %c0_1 = arith.constant 0 : index
    %c0_2 = arith.constant 0 : index
    %1 = vector.load %arg1[%c0_1, %c0_2] : memref<16x32xf32, #tpu.memory_space<vmem>>, vector<16x32xf32>
    %c0_3 = arith.constant 0 : index
    %c0_4 = arith.constant 0 : index
    %2 = vector.load %arg2[%c0_3, %c0_4] : memref<32x768xf32, #tpu.memory_space<vmem>>, vector<32x768xf32>
    %c0_5 = arith.constant 0 : index
    %c0_6 = arith.constant 0 : index
    %c0_7 = arith.constant 0 : index
    %3 = vector.load %arg3[%c0_5, %c0_6, %c0_7] : memref<2x32x64xf32, #tpu.memory_space<vmem>>, vector<1x32x64xf32>
    %4 = vector.shape_cast %3 : vector<1x32x64xf32> to vector<32x64xf32>
    %c1 = arith.constant 1 : index
    %c0_8 = arith.constant 0 : index
    %c0_9 = arith.constant 0 : index
    %5 = vector.load %arg3[%c1, %c0_8, %c0_9] : memref<2x32x64xf32, #tpu.memory_space<vmem>>, vector<1x32x64xf32>
    %6 = vector.shape_cast %5 : vector<1x32x64xf32> to vector<32x64xf32>
    %c0_10 = arith.constant 0 : index
    %c0_11 = arith.constant 0 : index
    %7 = vector.load %arg4[%c0_10, %c0_11] : memref<64x64xf32, #tpu.memory_space<vmem>>, vector<64x64xf32>
    %c0_12 = arith.constant 0 : index
    %c0_13 = arith.constant 0 : index
    %8 = vector.load %arg5[%c0_12, %c0_13] : memref<16x64xf32, #tpu.memory_space<vmem>>, vector<16x64xf32>
    %9 = vector.extract_strided_slice %8 {offsets = [0, 0], sizes = [1, 64], strides = [1, 1]} : vector<16x64xf32> to vector<1x64xf32>
    %10 = vector.extract_strided_slice %8 {offsets = [1, 0], sizes = [1, 64], strides = [1, 1]} : vector<16x64xf32> to vector<1x64xf32>
    %11 = vector.extract_strided_slice %8 {offsets = [2, 0], sizes = [1, 64], strides = [1, 1]} : vector<16x64xf32> to vector<1x64xf32>
    %12 = vector.extract_strided_slice %8 {offsets = [3, 0], sizes = [1, 64], strides = [1, 1]} : vector<16x64xf32> to vector<1x64xf32>
    %13 = vector.extract_strided_slice %8 {offsets = [4, 0], sizes = [1, 64], strides = [1, 1]} : vector<16x64xf32> to vector<1x64xf32>
    %14 = vector.extract_strided_slice %8 {offsets = [5, 0], sizes = [1, 64], strides = [1, 1]} : vector<16x64xf32> to vector<1x64xf32>
    %15 = vector.extract_strided_slice %8 {offsets = [6, 0], sizes = [1, 64], strides = [1, 1]} : vector<16x64xf32> to vector<1x64xf32>
    %16 = vector.extract_strided_slice %8 {offsets = [7, 0], sizes = [1, 64], strides = [1, 1]} : vector<16x64xf32> to vector<1x64xf32>
    %17 = vector.extract_strided_slice %8 {offsets = [8, 0], sizes = [1, 64], strides = [1, 1]} : vector<16x64xf32> to vector<1x64xf32>
    %18 = vector.extract_strided_slice %8 {offsets = [9, 0], sizes = [1, 64], strides = [1, 1]} : vector<16x64xf32> to vector<1x64xf32>
    %19 = vector.extract_strided_slice %8 {offsets = [10, 0], sizes = [1, 64], strides = [1, 1]} : vector<16x64xf32> to vector<1x64xf32>
    %20 = vector.extract_strided_slice %8 {offsets = [11, 0], sizes = [1, 64], strides = [1, 1]} : vector<16x64xf32> to vector<1x64xf32>
    %21 = vector.extract_strided_slice %8 {offsets = [12, 0], sizes = [1, 64], strides = [1, 1]} : vector<16x64xf32> to vector<1x64xf32>
    %22 = vector.extract_strided_slice %8 {offsets = [13, 0], sizes = [1, 64], strides = [1, 1]} : vector<16x64xf32> to vector<1x64xf32>
    %23 = vector.extract_strided_slice %8 {offsets = [14, 0], sizes = [1, 64], strides = [1, 1]} : vector<16x64xf32> to vector<1x64xf32>
    %c0_14 = arith.constant 0 : index
    %c0_15 = arith.constant 0 : index
    %24 = vector.load %arg6[%c0_14, %c0_15] : memref<64x192xbf16, #tpu.memory_space<vmem>>, vector<64x192xbf16>
    %c0_16 = arith.constant 0 : index
    %c0_17 = arith.constant 0 : index
    %25 = vector.load %arg7[%c0_16, %c0_17] : memref<64x192xbf16, #tpu.memory_space<vmem>>, vector<64x192xbf16>
    %c0_18 = arith.constant 0 : index
    %c0_19 = arith.constant 0 : index
    %26 = vector.load %arg8[%c0_18, %c0_19] : memref<33x64xf32, #tpu.memory_space<vmem>>, vector<33x64xf32>
    %27 = arith.mulf %0, %0 : vector<32x64xf32>
    %cst = arith.constant dense<0.000000e+00> : vector<32xf32>
    %28 = vector.multi_reduction <add>, %27, %cst [1] : vector<32x64xf32> to vector<32xf32>
    %29 = vector.shape_cast %28 : vector<32xf32> to vector<32x1xf32>
    %cst_20 = arith.constant 6.400000e+01 : f32
    %30 = vector.broadcast %cst_20 : f32 to vector<32x1xf32>
    %31 = arith.divf %29, %30 : vector<32x1xf32>
    %cst_21 = arith.constant 9.99999997E-7 : f32
    %32 = vector.broadcast %cst_21 : f32 to vector<32x1xf32>
    %33 = arith.addf %31, %32 : vector<32x1xf32>
    %34 = math.rsqrt %33 : vector<32x1xf32>
    %35 = vector.broadcast %34 : vector<32x1xf32> to vector<32x64xf32>
    %36 = arith.mulf %0, %35 : vector<32x64xf32>
    %37 = vector.broadcast %9 : vector<1x64xf32> to vector<32x64xf32>
    %38 = arith.mulf %36, %37 : vector<32x64xf32>
    %39 = vector.extract_strided_slice %2 {offsets = [0, 0], sizes = [32, 128], strides = [1, 1]} : vector<32x768xf32> to vector<32x128xf32>
    %40 = arith.mulf %38, %38 : vector<32x64xf32>
    %cst_22 = arith.constant dense<0.000000e+00> : vector<32xf32>
    %41 = vector.multi_reduction <add>, %40, %cst_22 [1] : vector<32x64xf32> to vector<32xf32>
    %42 = vector.shape_cast %41 : vector<32xf32> to vector<32x1xf32>
    %cst_23 = arith.constant 6.400000e+01 : f32
    %43 = vector.broadcast %cst_23 : f32 to vector<32x1xf32>
    %44 = arith.divf %42, %43 : vector<32x1xf32>
    %cst_24 = arith.constant 9.99999997E-7 : f32
    %45 = vector.broadcast %cst_24 : f32 to vector<32x1xf32>
    %46 = arith.addf %44, %45 : vector<32x1xf32>
    %47 = math.rsqrt %46 : vector<32x1xf32>
    %48 = vector.broadcast %47 : vector<32x1xf32> to vector<32x64xf32>
    %49 = arith.mulf %38, %48 : vector<32x64xf32>
    %50 = vector.broadcast %15 : vector<1x64xf32> to vector<32x64xf32>
    %51 = arith.mulf %49, %50 : vector<32x64xf32>
    %52 = vector.extract_strided_slice %39 {offsets = [0, 64], sizes = [32, 64], strides = [1, 1]} : vector<32x128xf32> to vector<32x64xf32>
    %cst_25 = arith.constant 1.000000e+00 : f32
    %53 = vector.broadcast %cst_25 : f32 to vector<32x64xf32>
    %54 = arith.addf %53, %52 : vector<32x64xf32>
    %55 = arith.mulf %51, %54 : vector<32x64xf32>
    %56 = vector.extract_strided_slice %39 {offsets = [0, 0], sizes = [32, 64], strides = [1, 1]} : vector<32x128xf32> to vector<32x64xf32>
    %57 = arith.addf %55, %56 : vector<32x64xf32>
    %58 = arith.truncf %57 : vector<32x64xf32> to vector<32x64xbf16>
    %59 = vector.extract_strided_slice %24 {offsets = [0, 0], sizes = [64, 128], strides = [1, 1]} : vector<64x192xbf16> to vector<64x128xbf16>
    %cst_26 = arith.constant dense<0.000000e+00> : vector<32x128xf32>
    %60 = tpu.matmul %58, %59, %cst_26 {dimension_numbers = #tpu.dot_dimension_numbers<[1], [0], [0], [1], [0, 0, 1, 1], [], []>} : vector<32x64xbf16>, vector<64x128xbf16>, vector<32x128xf32> -> vector<32x128xf32>
    %61 = vector.extract_strided_slice %60 {offsets = [0, 0], sizes = [32, 64], strides = [1, 1]} : vector<32x128xf32> to vector<32x64xf32>
    %cst_27 = arith.constant 2.500000e-01 : f32
    %62 = vector.broadcast %cst_27 : f32 to vector<32x64xf32>
    %63 = arith.mulf %61, %62 : vector<32x64xf32>
    %64 = arith.mulf %63, %4 : vector<32x64xf32>
    %cst_28 = arith.constant dense<0.000000e+00> : vector<32x64xf32>
    %65 = tpu.matmul %63, %7, %cst_28 {dimension_numbers = #tpu.dot_dimension_numbers<[1], [0], [0], [1], [0, 0, 1, 1], [], []>} : vector<32x64xf32>, vector<64x64xf32>, vector<32x64xf32> -> vector<32x64xf32>
    %66 = arith.mulf %65, %6 : vector<32x64xf32>
    %67 = arith.addf %64, %66 : vector<32x64xf32>
    %68 = vector.extract_strided_slice %60 {offsets = [0, 64], sizes = [32, 32], strides = [1, 1]} : vector<32x128xf32> to vector<32x32xf32>
    %69 = vector.extract_strided_slice %4 {offsets = [0, 0], sizes = [32, 32], strides = [1, 1]} : vector<32x64xf32> to vector<32x32xf32>
    %70 = arith.mulf %68, %69 : vector<32x32xf32>
    %71 = vector.extract_strided_slice %7 {offsets = [0, 0], sizes = [32, 32], strides = [1, 1]} : vector<64x64xf32> to vector<32x32xf32>
    %cst_29 = arith.constant dense<0.000000e+00> : vector<32x32xf32>
    %72 = tpu.matmul %68, %71, %cst_29 {dimension_numbers = #tpu.dot_dimension_numbers<[1], [0], [0], [1], [0, 0, 1, 1], [], []>} : vector<32x32xf32>, vector<32x32xf32>, vector<32x32xf32> -> vector<32x32xf32>
    %73 = vector.extract_strided_slice %6 {offsets = [0, 0], sizes = [32, 32], strides = [1, 1]} : vector<32x64xf32> to vector<32x32xf32>
    %74 = arith.mulf %72, %73 : vector<32x32xf32>
    %75 = arith.addf %70, %74 : vector<32x32xf32>
    %76 = vector.extract_strided_slice %60 {offsets = [0, 96], sizes = [32, 32], strides = [1, 1]} : vector<32x128xf32> to vector<32x32xf32>
    %77 = vector.extract_strided_slice %24 {offsets = [0, 128], sizes = [64, 64], strides = [1, 1]} : vector<64x192xbf16> to vector<64x64xbf16>
    %78 = vector.extract_strided_slice %67 {offsets = [0, 0], sizes = [16, 64], strides = [1, 1]} : vector<32x64xf32> to vector<16x64xf32>
    %79 = vector.extract_strided_slice %75 {offsets = [0, 0], sizes = [16, 32], strides = [1, 1]} : vector<32x32xf32> to vector<16x32xf32>
    %80 = vector.extract_strided_slice %76 {offsets = [0, 0], sizes = [16, 32], strides = [1, 1]} : vector<32x32xf32> to vector<16x32xf32>
    %81 = vector.extract_strided_slice %78 {offsets = [0, 0], sizes = [16, 16], strides = [1, 1]} : vector<16x64xf32> to vector<16x16xf32>
    %82 = vector.extract_strided_slice %78 {offsets = [0, 16], sizes = [16, 16], strides = [1, 1]} : vector<16x64xf32> to vector<16x16xf32>
    %83 = tpu.concatenate %81, %82 in 0 : vector<16x16xf32>, vector<16x16xf32> -> vector<32x16xf32>
    %84 = vector.extract_strided_slice %79 {offsets = [0, 0], sizes = [16, 16], strides = [1, 1]} : vector<16x32xf32> to vector<16x16xf32>
    %85 = vector.extract_strided_slice %80 {offsets = [0, 0], sizes = [16, 16], strides = [1, 1]} : vector<16x32xf32> to vector<16x16xf32>
    %86 = tpu.transpose %84, [1, 0] : vector<16x16xf32> -> vector<16x16xf32>
    %cst_30 = arith.constant dense<0.000000e+00> : vector<32x16xf32>
    %87 = tpu.matmul %83, %86, %cst_30 {dimension_numbers = #tpu.dot_dimension_numbers<[1], [0], [0], [1], [0, 0, 1, 1], [], []>} : vector<32x16xf32>, vector<16x16xf32>, vector<32x16xf32> -> vector<32x16xf32>
    %cst_31 = arith.constant dense<0xFF800000> : vector<32xf32>
    %88 = vector.multi_reduction <maximumf>, %87, %cst_31 [1] : vector<32x16xf32> to vector<32xf32>
    %89 = vector.shape_cast %88 : vector<32xf32> to vector<32x1xf32>
    %90 = vector.broadcast %89 : vector<32x1xf32> to vector<32x16xf32>
    %91 = arith.subf %87, %90 : vector<32x16xf32>
    %92 = math.exp %91 : vector<32x16xf32>
    %cst_32 = arith.constant dense<0.000000e+00> : vector<32xf32>
    %93 = vector.multi_reduction <add>, %92, %cst_32 [1] : vector<32x16xf32> to vector<32xf32>
    %94 = vector.shape_cast %93 : vector<32xf32> to vector<32x1xf32>
    %95 = tpu.reciprocal %94 {approx = true} : vector<32x1xf32> -> vector<32x1xf32>
    %96 = vector.broadcast %95 : vector<32x1xf32> to vector<32x16xf32>
    %97 = arith.mulf %92, %96 : vector<32x16xf32>
    %cst_33 = arith.constant dense<0.000000e+00> : vector<32x16xf32>
    %98 = tpu.matmul %97, %85, %cst_33 {dimension_numbers = #tpu.dot_dimension_numbers<[1], [0], [0], [1], [0, 0, 1, 1], [], []>} : vector<32x16xf32>, vector<16x16xf32>, vector<32x16xf32> -> vector<32x16xf32>
    %99 = vector.extract_strided_slice %98 {offsets = [0, 0], sizes = [16, 16], strides = [1, 1]} : vector<32x16xf32> to vector<16x16xf32>
    %100 = vector.extract_strided_slice %98 {offsets = [16, 0], sizes = [16, 16], strides = [1, 1]} : vector<32x16xf32> to vector<16x16xf32>
    %101 = vector.extract_strided_slice %78 {offsets = [0, 32], sizes = [16, 16], strides = [1, 1]} : vector<16x64xf32> to vector<16x16xf32>
    %102 = vector.extract_strided_slice %78 {offsets = [0, 48], sizes = [16, 16], strides = [1, 1]} : vector<16x64xf32> to vector<16x16xf32>
    %103 = tpu.concatenate %101, %102 in 0 : vector<16x16xf32>, vector<16x16xf32> -> vector<32x16xf32>
    %104 = vector.extract_strided_slice %79 {offsets = [0, 16], sizes = [16, 16], strides = [1, 1]} : vector<16x32xf32> to vector<16x16xf32>
    %105 = vector.extract_strided_slice %80 {offsets = [0, 16], sizes = [16, 16], strides = [1, 1]} : vector<16x32xf32> to vector<16x16xf32>
    %106 = tpu.transpose %104, [1, 0] : vector<16x16xf32> -> vector<16x16xf32>
    %cst_34 = arith.constant dense<0.000000e+00> : vector<32x16xf32>
    %107 = tpu.matmul %103, %106, %cst_34 {dimension_numbers = #tpu.dot_dimension_numbers<[1], [0], [0], [1], [0, 0, 1, 1], [], []>} : vector<32x16xf32>, vector<16x16xf32>, vector<32x16xf32> -> vector<32x16xf32>
    %cst_35 = arith.constant dense<0xFF800000> : vector<32xf32>
    %108 = vector.multi_reduction <maximumf>, %107, %cst_35 [1] : vector<32x16xf32> to vector<32xf32>
    %109 = vector.shape_cast %108 : vector<32xf32> to vector<32x1xf32>
    %110 = vector.broadcast %109 : vector<32x1xf32> to vector<32x16xf32>
    %111 = arith.subf %107, %110 : vector<32x16xf32>
    %112 = math.exp %111 : vector<32x16xf32>
    %cst_36 = arith.constant dense<0.000000e+00> : vector<32xf32>
    %113 = vector.multi_reduction <add>, %112, %cst_36 [1] : vector<32x16xf32> to vector<32xf32>
    %114 = vector.shape_cast %113 : vector<32xf32> to vector<32x1xf32>
    %115 = tpu.reciprocal %114 {approx = true} : vector<32x1xf32> -> vector<32x1xf32>
    %116 = vector.broadcast %115 : vector<32x1xf32> to vector<32x16xf32>
    %117 = arith.mulf %112, %116 : vector<32x16xf32>
    %cst_37 = arith.constant dense<0.000000e+00> : vector<32x16xf32>
    %118 = tpu.matmul %117, %105, %cst_37 {dimension_numbers = #tpu.dot_dimension_numbers<[1], [0], [0], [1], [0, 0, 1, 1], [], []>} : vector<32x16xf32>, vector<16x16xf32>, vector<32x16xf32> -> vector<32x16xf32>
    %119 = vector.extract_strided_slice %118 {offsets = [0, 0], sizes = [16, 16], strides = [1, 1]} : vector<32x16xf32> to vector<16x16xf32>
    %120 = vector.extract_strided_slice %118 {offsets = [16, 0], sizes = [16, 16], strides = [1, 1]} : vector<32x16xf32> to vector<16x16xf32>
    %121 = tpu.concatenate %99, %100, %119, %120 in 1 : vector<16x16xf32>, vector<16x16xf32>, vector<16x16xf32>, vector<16x16xf32> -> vector<16x64xf32>
    %122 = vector.extract_strided_slice %67 {offsets = [16, 0], sizes = [16, 64], strides = [1, 1]} : vector<32x64xf32> to vector<16x64xf32>
    %123 = vector.extract_strided_slice %75 {offsets = [16, 0], sizes = [16, 32], strides = [1, 1]} : vector<32x32xf32> to vector<16x32xf32>
    %124 = vector.extract_strided_slice %76 {offsets = [16, 0], sizes = [16, 32], strides = [1, 1]} : vector<32x32xf32> to vector<16x32xf32>
    %125 = vector.extract_strided_slice %122 {offsets = [0, 0], sizes = [16, 16], strides = [1, 1]} : vector<16x64xf32> to vector<16x16xf32>
    %126 = vector.extract_strided_slice %122 {offsets = [0, 16], sizes = [16, 16], strides = [1, 1]} : vector<16x64xf32> to vector<16x16xf32>
    %127 = tpu.concatenate %125, %126 in 0 : vector<16x16xf32>, vector<16x16xf32> -> vector<32x16xf32>
    %128 = vector.extract_strided_slice %123 {offsets = [0, 0], sizes = [16, 16], strides = [1, 1]} : vector<16x32xf32> to vector<16x16xf32>
    %129 = vector.extract_strided_slice %124 {offsets = [0, 0], sizes = [16, 16], strides = [1, 1]} : vector<16x32xf32> to vector<16x16xf32>
    %130 = tpu.transpose %128, [1, 0] : vector<16x16xf32> -> vector<16x16xf32>
    %cst_38 = arith.constant dense<0.000000e+00> : vector<32x16xf32>
    %131 = tpu.matmul %127, %130, %cst_38 {dimension_numbers = #tpu.dot_dimension_numbers<[1], [0], [0], [1], [0, 0, 1, 1], [], []>} : vector<32x16xf32>, vector<16x16xf32>, vector<32x16xf32> -> vector<32x16xf32>
    %cst_39 = arith.constant dense<0xFF800000> : vector<32xf32>
    %132 = vector.multi_reduction <maximumf>, %131, %cst_39 [1] : vector<32x16xf32> to vector<32xf32>
    %133 = vector.shape_cast %132 : vector<32xf32> to vector<32x1xf32>
    %134 = vector.broadcast %133 : vector<32x1xf32> to vector<32x16xf32>
    %135 = arith.subf %131, %134 : vector<32x16xf32>
    %136 = math.exp %135 : vector<32x16xf32>
    %cst_40 = arith.constant dense<0.000000e+00> : vector<32xf32>
    %137 = vector.multi_reduction <add>, %136, %cst_40 [1] : vector<32x16xf32> to vector<32xf32>
    %138 = vector.shape_cast %137 : vector<32xf32> to vector<32x1xf32>
    %139 = tpu.reciprocal %138 {approx = true} : vector<32x1xf32> -> vector<32x1xf32>
    %140 = vector.broadcast %139 : vector<32x1xf32> to vector<32x16xf32>
    %141 = arith.mulf %136, %140 : vector<32x16xf32>
    %cst_41 = arith.constant dense<0.000000e+00> : vector<32x16xf32>
    %142 = tpu.matmul %141, %129, %cst_41 {dimension_numbers = #tpu.dot_dimension_numbers<[1], [0], [0], [1], [0, 0, 1, 1], [], []>} : vector<32x16xf32>, vector<16x16xf32>, vector<32x16xf32> -> vector<32x16xf32>
    %143 = vector.extract_strided_slice %142 {offsets = [0, 0], sizes = [16, 16], strides = [1, 1]} : vector<32x16xf32> to vector<16x16xf32>
    %144 = vector.extract_strided_slice %142 {offsets = [16, 0], sizes = [16, 16], strides = [1, 1]} : vector<32x16xf32> to vector<16x16xf32>
    %145 = vector.extract_strided_slice %122 {offsets = [0, 32], sizes = [16, 16], strides = [1, 1]} : vector<16x64xf32> to vector<16x16xf32>
    %146 = vector.extract_strided_slice %122 {offsets = [0, 48], sizes = [16, 16], strides = [1, 1]} : vector<16x64xf32> to vector<16x16xf32>
    %147 = tpu.concatenate %145, %146 in 0 : vector<16x16xf32>, vector<16x16xf32> -> vector<32x16xf32>
    %148 = vector.extract_strided_slice %123 {offsets = [0, 16], sizes = [16, 16], strides = [1, 1]} : vector<16x32xf32> to vector<16x16xf32>
    %149 = vector.extract_strided_slice %124 {offsets = [0, 16], sizes = [16, 16], strides = [1, 1]} : vector<16x32xf32> to vector<16x16xf32>
    %150 = tpu.transpose %148, [1, 0] : vector<16x16xf32> -> vector<16x16xf32>
    %cst_42 = arith.constant dense<0.000000e+00> : vector<32x16xf32>
    %151 = tpu.matmul %147, %150, %cst_42 {dimension_numbers = #tpu.dot_dimension_numbers<[1], [0], [0], [1], [0, 0, 1, 1], [], []>} : vector<32x16xf32>, vector<16x16xf32>, vector<32x16xf32> -> vector<32x16xf32>
    %cst_43 = arith.constant dense<0xFF800000> : vector<32xf32>
    %152 = vector.multi_reduction <maximumf>, %151, %cst_43 [1] : vector<32x16xf32> to vector<32xf32>
    %153 = vector.shape_cast %152 : vector<32xf32> to vector<32x1xf32>
    %154 = vector.broadcast %153 : vector<32x1xf32> to vector<32x16xf32>
    %155 = arith.subf %151, %154 : vector<32x16xf32>
    %156 = math.exp %155 : vector<32x16xf32>
    %cst_44 = arith.constant dense<0.000000e+00> : vector<32xf32>
    %157 = vector.multi_reduction <add>, %156, %cst_44 [1] : vector<32x16xf32> to vector<32xf32>
    %158 = vector.shape_cast %157 : vector<32xf32> to vector<32x1xf32>
    %159 = tpu.reciprocal %158 {approx = true} : vector<32x1xf32> -> vector<32x1xf32>
    %160 = vector.broadcast %159 : vector<32x1xf32> to vector<32x16xf32>
    %161 = arith.mulf %156, %160 : vector<32x16xf32>
    %cst_45 = arith.constant dense<0.000000e+00> : vector<32x16xf32>
    %162 = tpu.matmul %161, %149, %cst_45 {dimension_numbers = #tpu.dot_dimension_numbers<[1], [0], [0], [1], [0, 0, 1, 1], [], []>} : vector<32x16xf32>, vector<16x16xf32>, vector<32x16xf32> -> vector<32x16xf32>
    %163 = vector.extract_strided_slice %162 {offsets = [0, 0], sizes = [16, 16], strides = [1, 1]} : vector<32x16xf32> to vector<16x16xf32>
    %164 = vector.extract_strided_slice %162 {offsets = [16, 0], sizes = [16, 16], strides = [1, 1]} : vector<32x16xf32> to vector<16x16xf32>
    %165 = tpu.concatenate %143, %144, %163, %164 in 1 : vector<16x16xf32>, vector<16x16xf32>, vector<16x16xf32>, vector<16x16xf32> -> vector<16x64xf32>
    %166 = tpu.concatenate %121, %165 in 0 : vector<16x64xf32>, vector<16x64xf32> -> vector<32x64xf32>
    %167 = arith.truncf %166 : vector<32x64xf32> to vector<32x64xbf16>
    %cst_46 = arith.constant dense<0.000000e+00> : vector<32x64xf32>
    %168 = tpu.matmul %167, %77, %cst_46 {dimension_numbers = #tpu.dot_dimension_numbers<[1], [0], [0], [1], [0, 0, 1, 1], [], []>} : vector<32x64xbf16>, vector<64x64xbf16>, vector<32x64xf32> -> vector<32x64xf32>
    %169 = vector.broadcast %21 : vector<1x64xf32> to vector<32x64xf32>
    %170 = arith.mulf %168, %169 : vector<32x64xf32>
    %171 = arith.mulf %170, %170 : vector<32x64xf32>
    %cst_47 = arith.constant dense<0.000000e+00> : vector<32xf32>
    %172 = vector.multi_reduction <add>, %171, %cst_47 [1] : vector<32x64xf32> to vector<32xf32>
    %173 = vector.shape_cast %172 : vector<32xf32> to vector<32x1xf32>
    %cst_48 = arith.constant 6.400000e+01 : f32
    %174 = vector.broadcast %cst_48 : f32 to vector<32x1xf32>
    %175 = arith.divf %173, %174 : vector<32x1xf32>
    %cst_49 = arith.constant 9.99999997E-7 : f32
    %176 = vector.broadcast %cst_49 : f32 to vector<32x1xf32>
    %177 = arith.addf %175, %176 : vector<32x1xf32>
    %178 = math.rsqrt %177 : vector<32x1xf32>
    %179 = vector.broadcast %178 : vector<32x1xf32> to vector<32x64xf32>
    %180 = arith.mulf %170, %179 : vector<32x64xf32>
    %181 = vector.broadcast %10 : vector<1x64xf32> to vector<32x64xf32>
    %182 = arith.mulf %180, %181 : vector<32x64xf32>
    %183 = vector.extract_strided_slice %2 {offsets = [0, 128], sizes = [32, 128], strides = [1, 1]} : vector<32x768xf32> to vector<32x128xf32>
    %184 = arith.mulf %182, %182 : vector<32x64xf32>
    %cst_50 = arith.constant dense<0.000000e+00> : vector<32xf32>
    %185 = vector.multi_reduction <add>, %184, %cst_50 [1] : vector<32x64xf32> to vector<32xf32>
    %186 = vector.shape_cast %185 : vector<32xf32> to vector<32x1xf32>
    %cst_51 = arith.constant 6.400000e+01 : f32
    %187 = vector.broadcast %cst_51 : f32 to vector<32x1xf32>
    %188 = arith.divf %186, %187 : vector<32x1xf32>
    %cst_52 = arith.constant 9.99999997E-7 : f32
    %189 = vector.broadcast %cst_52 : f32 to vector<32x1xf32>
    %190 = arith.addf %188, %189 : vector<32x1xf32>
    %191 = math.rsqrt %190 : vector<32x1xf32>
    %192 = vector.broadcast %191 : vector<32x1xf32> to vector<32x64xf32>
    %193 = arith.mulf %182, %192 : vector<32x64xf32>
    %194 = vector.broadcast %16 : vector<1x64xf32> to vector<32x64xf32>
    %195 = arith.mulf %193, %194 : vector<32x64xf32>
    %196 = vector.extract_strided_slice %183 {offsets = [0, 64], sizes = [32, 64], strides = [1, 1]} : vector<32x128xf32> to vector<32x64xf32>
    %cst_53 = arith.constant 1.000000e+00 : f32
    %197 = vector.broadcast %cst_53 : f32 to vector<32x64xf32>
    %198 = arith.addf %197, %196 : vector<32x64xf32>
    %199 = arith.mulf %195, %198 : vector<32x64xf32>
    %200 = vector.extract_strided_slice %183 {offsets = [0, 0], sizes = [32, 64], strides = [1, 1]} : vector<32x128xf32> to vector<32x64xf32>
    %201 = arith.addf %199, %200 : vector<32x64xf32>
    %202 = arith.addf %0, %201 : vector<32x64xf32>
    %203 = arith.mulf %202, %202 : vector<32x64xf32>
    %cst_54 = arith.constant dense<0.000000e+00> : vector<32xf32>
    %204 = vector.multi_reduction <add>, %203, %cst_54 [1] : vector<32x64xf32> to vector<32xf32>
    %205 = vector.shape_cast %204 : vector<32xf32> to vector<32x1xf32>
    %cst_55 = arith.constant 6.400000e+01 : f32
    %206 = vector.broadcast %cst_55 : f32 to vector<32x1xf32>
    %207 = arith.divf %205, %206 : vector<32x1xf32>
    %cst_56 = arith.constant 9.99999997E-7 : f32
    %208 = vector.broadcast %cst_56 : f32 to vector<32x1xf32>
    %209 = arith.addf %207, %208 : vector<32x1xf32>
    %210 = math.rsqrt %209 : vector<32x1xf32>
    %211 = vector.broadcast %210 : vector<32x1xf32> to vector<32x64xf32>
    %212 = arith.mulf %202, %211 : vector<32x64xf32>
    %213 = vector.broadcast %11 : vector<1x64xf32> to vector<32x64xf32>
    %214 = arith.mulf %212, %213 : vector<32x64xf32>
    %215 = vector.extract_strided_slice %2 {offsets = [0, 256], sizes = [32, 128], strides = [1, 1]} : vector<32x768xf32> to vector<32x128xf32>
    %216 = arith.mulf %214, %214 : vector<32x64xf32>
    %cst_57 = arith.constant dense<0.000000e+00> : vector<32xf32>
    %217 = vector.multi_reduction <add>, %216, %cst_57 [1] : vector<32x64xf32> to vector<32xf32>
    %218 = vector.shape_cast %217 : vector<32xf32> to vector<32x1xf32>
    %cst_58 = arith.constant 6.400000e+01 : f32
    %219 = vector.broadcast %cst_58 : f32 to vector<32x1xf32>
    %220 = arith.divf %218, %219 : vector<32x1xf32>
    %cst_59 = arith.constant 9.99999997E-7 : f32
    %221 = vector.broadcast %cst_59 : f32 to vector<32x1xf32>
    %222 = arith.addf %220, %221 : vector<32x1xf32>
    %223 = math.rsqrt %222 : vector<32x1xf32>
    %224 = vector.broadcast %223 : vector<32x1xf32> to vector<32x64xf32>
    %225 = arith.mulf %214, %224 : vector<32x64xf32>
    %226 = vector.broadcast %17 : vector<1x64xf32> to vector<32x64xf32>
    %227 = arith.mulf %225, %226 : vector<32x64xf32>
    %228 = vector.extract_strided_slice %215 {offsets = [0, 64], sizes = [32, 64], strides = [1, 1]} : vector<32x128xf32> to vector<32x64xf32>
    %cst_60 = arith.constant 1.000000e+00 : f32
    %229 = vector.broadcast %cst_60 : f32 to vector<32x64xf32>
    %230 = arith.addf %229, %228 : vector<32x64xf32>
    %231 = arith.mulf %227, %230 : vector<32x64xf32>
    %232 = vector.extract_strided_slice %215 {offsets = [0, 0], sizes = [32, 64], strides = [1, 1]} : vector<32x128xf32> to vector<32x64xf32>
    %233 = arith.addf %231, %232 : vector<32x64xf32>
    %234 = vector.extract_strided_slice %26 {offsets = [0, 0], sizes = [32, 64], strides = [1, 1]} : vector<33x64xf32> to vector<32x64xf32>
    %cst_61 = arith.constant dense<0.000000e+00> : vector<16x64xf32>
    %235 = tpu.matmul %1, %234, %cst_61 {dimension_numbers = #tpu.dot_dimension_numbers<[1], [0], [0], [1], [0, 0, 1, 1], [], []>} : vector<16x32xf32>, vector<32x64xf32>, vector<16x64xf32> -> vector<16x64xf32>
    %236 = vector.extract_strided_slice %26 {offsets = [32, 0], sizes = [1, 64], strides = [1, 1]} : vector<33x64xf32> to vector<1x64xf32>
    %237 = vector.broadcast %236 : vector<1x64xf32> to vector<16x64xf32>
    %238 = arith.addf %235, %237 : vector<16x64xf32>
    %239 = arith.truncf %233 : vector<32x64xf32> to vector<32x64xbf16>
    %240 = vector.extract_strided_slice %25 {offsets = [0, 0], sizes = [64, 64], strides = [1, 1]} : vector<64x192xbf16> to vector<64x64xbf16>
    %cst_62 = arith.constant dense<0.000000e+00> : vector<32x64xf32>
    %241 = tpu.matmul %239, %240, %cst_62 {dimension_numbers = #tpu.dot_dimension_numbers<[1], [0], [0], [1], [0, 0, 1, 1], [], []>} : vector<32x64xbf16>, vector<64x64xbf16>, vector<32x64xf32> -> vector<32x64xf32>
    %cst_63 = arith.constant 2.500000e-01 : f32
    %242 = vector.broadcast %cst_63 : f32 to vector<32x64xf32>
    %243 = arith.mulf %241, %242 : vector<32x64xf32>
    %244 = arith.truncf %238 : vector<16x64xf32> to vector<16x64xbf16>
    %245 = vector.extract_strided_slice %25 {offsets = [0, 64], sizes = [64, 64], strides = [1, 1]} : vector<64x192xbf16> to vector<64x64xbf16>
    %cst_64 = arith.constant dense<0.000000e+00> : vector<16x64xf32>
    %246 = tpu.matmul %244, %245, %cst_64 {dimension_numbers = #tpu.dot_dimension_numbers<[1], [0], [0], [1], [0, 0, 1, 1], [], []>} : vector<16x64xbf16>, vector<64x64xbf16>, vector<16x64xf32> -> vector<16x64xf32>
    %247 = vector.extract_strided_slice %246 {offsets = [0, 0], sizes = [16, 32], strides = [1, 1]} : vector<16x64xf32> to vector<16x32xf32>
    %248 = vector.extract_strided_slice %246 {offsets = [0, 32], sizes = [16, 32], strides = [1, 1]} : vector<16x64xf32> to vector<16x32xf32>
    %249 = vector.extract_strided_slice %25 {offsets = [0, 128], sizes = [64, 64], strides = [1, 1]} : vector<64x192xbf16> to vector<64x64xbf16>
    %250 = vector.extract_strided_slice %243 {offsets = [0, 0], sizes = [16, 64], strides = [1, 1]} : vector<32x64xf32> to vector<16x64xf32>
    %251 = vector.extract_strided_slice %247 {offsets = [0, 0], sizes = [8, 32], strides = [1, 1]} : vector<16x32xf32> to vector<8x32xf32>
    %252 = vector.extract_strided_slice %248 {offsets = [0, 0], sizes = [8, 32], strides = [1, 1]} : vector<16x32xf32> to vector<8x32xf32>
    %253 = vector.extract_strided_slice %250 {offsets = [0, 0], sizes = [16, 16], strides = [1, 1]} : vector<16x64xf32> to vector<16x16xf32>
    %254 = vector.extract_strided_slice %250 {offsets = [0, 16], sizes = [16, 16], strides = [1, 1]} : vector<16x64xf32> to vector<16x16xf32>
    %255 = tpu.concatenate %253, %254 in 0 : vector<16x16xf32>, vector<16x16xf32> -> vector<32x16xf32>
    %256 = vector.extract_strided_slice %251 {offsets = [0, 0], sizes = [8, 16], strides = [1, 1]} : vector<8x32xf32> to vector<8x16xf32>
    %257 = vector.extract_strided_slice %252 {offsets = [0, 0], sizes = [8, 16], strides = [1, 1]} : vector<8x32xf32> to vector<8x16xf32>
    %258 = tpu.transpose %256, [1, 0] : vector<8x16xf32> -> vector<16x8xf32>
    %cst_65 = arith.constant dense<0.000000e+00> : vector<32x8xf32>
    %259 = tpu.matmul %255, %258, %cst_65 {dimension_numbers = #tpu.dot_dimension_numbers<[1], [0], [0], [1], [0, 0, 1, 1], [], []>} : vector<32x16xf32>, vector<16x8xf32>, vector<32x8xf32> -> vector<32x8xf32>
    %cst_66 = arith.constant dense<0xFF800000> : vector<32xf32>
    %260 = vector.multi_reduction <maximumf>, %259, %cst_66 [1] : vector<32x8xf32> to vector<32xf32>
    %261 = vector.shape_cast %260 : vector<32xf32> to vector<32x1xf32>
    %262 = vector.broadcast %261 : vector<32x1xf32> to vector<32x8xf32>
    %263 = arith.subf %259, %262 : vector<32x8xf32>
    %264 = math.exp %263 : vector<32x8xf32>
    %cst_67 = arith.constant dense<0.000000e+00> : vector<32xf32>
    %265 = vector.multi_reduction <add>, %264, %cst_67 [1] : vector<32x8xf32> to vector<32xf32>
    %266 = vector.shape_cast %265 : vector<32xf32> to vector<32x1xf32>
    %267 = tpu.reciprocal %266 {approx = true} : vector<32x1xf32> -> vector<32x1xf32>
    %268 = vector.broadcast %267 : vector<32x1xf32> to vector<32x8xf32>
    %269 = arith.mulf %264, %268 : vector<32x8xf32>
    %cst_68 = arith.constant dense<0.000000e+00> : vector<32x16xf32>
    %270 = tpu.matmul %269, %257, %cst_68 {dimension_numbers = #tpu.dot_dimension_numbers<[1], [0], [0], [1], [0, 0, 1, 1], [], []>} : vector<32x8xf32>, vector<8x16xf32>, vector<32x16xf32> -> vector<32x16xf32>
    %271 = vector.extract_strided_slice %270 {offsets = [0, 0], sizes = [16, 16], strides = [1, 1]} : vector<32x16xf32> to vector<16x16xf32>
    %272 = vector.extract_strided_slice %270 {offsets = [16, 0], sizes = [16, 16], strides = [1, 1]} : vector<32x16xf32> to vector<16x16xf32>
    %273 = vector.extract_strided_slice %250 {offsets = [0, 32], sizes = [16, 16], strides = [1, 1]} : vector<16x64xf32> to vector<16x16xf32>
    %274 = vector.extract_strided_slice %250 {offsets = [0, 48], sizes = [16, 16], strides = [1, 1]} : vector<16x64xf32> to vector<16x16xf32>
    %275 = tpu.concatenate %273, %274 in 0 : vector<16x16xf32>, vector<16x16xf32> -> vector<32x16xf32>
    %276 = vector.extract_strided_slice %251 {offsets = [0, 16], sizes = [8, 16], strides = [1, 1]} : vector<8x32xf32> to vector<8x16xf32>
    %277 = vector.extract_strided_slice %252 {offsets = [0, 16], sizes = [8, 16], strides = [1, 1]} : vector<8x32xf32> to vector<8x16xf32>
    %278 = tpu.transpose %276, [1, 0] : vector<8x16xf32> -> vector<16x8xf32>
    %cst_69 = arith.constant dense<0.000000e+00> : vector<32x8xf32>
    %279 = tpu.matmul %275, %278, %cst_69 {dimension_numbers = #tpu.dot_dimension_numbers<[1], [0], [0], [1], [0, 0, 1, 1], [], []>} : vector<32x16xf32>, vector<16x8xf32>, vector<32x8xf32> -> vector<32x8xf32>
    %cst_70 = arith.constant dense<0xFF800000> : vector<32xf32>
    %280 = vector.multi_reduction <maximumf>, %279, %cst_70 [1] : vector<32x8xf32> to vector<32xf32>
    %281 = vector.shape_cast %280 : vector<32xf32> to vector<32x1xf32>
    %282 = vector.broadcast %281 : vector<32x1xf32> to vector<32x8xf32>
    %283 = arith.subf %279, %282 : vector<32x8xf32>
    %284 = math.exp %283 : vector<32x8xf32>
    %cst_71 = arith.constant dense<0.000000e+00> : vector<32xf32>
    %285 = vector.multi_reduction <add>, %284, %cst_71 [1] : vector<32x8xf32> to vector<32xf32>
    %286 = vector.shape_cast %285 : vector<32xf32> to vector<32x1xf32>
    %287 = tpu.reciprocal %286 {approx = true} : vector<32x1xf32> -> vector<32x1xf32>
    %288 = vector.broadcast %287 : vector<32x1xf32> to vector<32x8xf32>
    %289 = arith.mulf %284, %288 : vector<32x8xf32>
    %cst_72 = arith.constant dense<0.000000e+00> : vector<32x16xf32>
    %290 = tpu.matmul %289, %277, %cst_72 {dimension_numbers = #tpu.dot_dimension_numbers<[1], [0], [0], [1], [0, 0, 1, 1], [], []>} : vector<32x8xf32>, vector<8x16xf32>, vector<32x16xf32> -> vector<32x16xf32>
    %291 = vector.extract_strided_slice %290 {offsets = [0, 0], sizes = [16, 16], strides = [1, 1]} : vector<32x16xf32> to vector<16x16xf32>
    %292 = vector.extract_strided_slice %290 {offsets = [16, 0], sizes = [16, 16], strides = [1, 1]} : vector<32x16xf32> to vector<16x16xf32>
    %293 = tpu.concatenate %271, %272, %291, %292 in 1 : vector<16x16xf32>, vector<16x16xf32>, vector<16x16xf32>, vector<16x16xf32> -> vector<16x64xf32>
    %294 = vector.extract_strided_slice %243 {offsets = [16, 0], sizes = [16, 64], strides = [1, 1]} : vector<32x64xf32> to vector<16x64xf32>
    %295 = vector.extract_strided_slice %247 {offsets = [8, 0], sizes = [8, 32], strides = [1, 1]} : vector<16x32xf32> to vector<8x32xf32>
    %296 = vector.extract_strided_slice %248 {offsets = [8, 0], sizes = [8, 32], strides = [1, 1]} : vector<16x32xf32> to vector<8x32xf32>
    %297 = vector.extract_strided_slice %294 {offsets = [0, 0], sizes = [16, 16], strides = [1, 1]} : vector<16x64xf32> to vector<16x16xf32>
    %298 = vector.extract_strided_slice %294 {offsets = [0, 16], sizes = [16, 16], strides = [1, 1]} : vector<16x64xf32> to vector<16x16xf32>
    %299 = tpu.concatenate %297, %298 in 0 : vector<16x16xf32>, vector<16x16xf32> -> vector<32x16xf32>
    %300 = vector.extract_strided_slice %295 {offsets = [0, 0], sizes = [8, 16], strides = [1, 1]} : vector<8x32xf32> to vector<8x16xf32>
    %301 = vector.extract_strided_slice %296 {offsets = [0, 0], sizes = [8, 16], strides = [1, 1]} : vector<8x32xf32> to vector<8x16xf32>
    %302 = tpu.transpose %300, [1, 0] : vector<8x16xf32> -> vector<16x8xf32>
    %cst_73 = arith.constant dense<0.000000e+00> : vector<32x8xf32>
    %303 = tpu.matmul %299, %302, %cst_73 {dimension_numbers = #tpu.dot_dimension_numbers<[1], [0], [0], [1], [0, 0, 1, 1], [], []>} : vector<32x16xf32>, vector<16x8xf32>, vector<32x8xf32> -> vector<32x8xf32>
    %cst_74 = arith.constant dense<0xFF800000> : vector<32xf32>
    %304 = vector.multi_reduction <maximumf>, %303, %cst_74 [1] : vector<32x8xf32> to vector<32xf32>
    %305 = vector.shape_cast %304 : vector<32xf32> to vector<32x1xf32>
    %306 = vector.broadcast %305 : vector<32x1xf32> to vector<32x8xf32>
    %307 = arith.subf %303, %306 : vector<32x8xf32>
    %308 = math.exp %307 : vector<32x8xf32>
    %cst_75 = arith.constant dense<0.000000e+00> : vector<32xf32>
    %309 = vector.multi_reduction <add>, %308, %cst_75 [1] : vector<32x8xf32> to vector<32xf32>
    %310 = vector.shape_cast %309 : vector<32xf32> to vector<32x1xf32>
    %311 = tpu.reciprocal %310 {approx = true} : vector<32x1xf32> -> vector<32x1xf32>
    %312 = vector.broadcast %311 : vector<32x1xf32> to vector<32x8xf32>
    %313 = arith.mulf %308, %312 : vector<32x8xf32>
    %cst_76 = arith.constant dense<0.000000e+00> : vector<32x16xf32>
    %314 = tpu.matmul %313, %301, %cst_76 {dimension_numbers = #tpu.dot_dimension_numbers<[1], [0], [0], [1], [0, 0, 1, 1], [], []>} : vector<32x8xf32>, vector<8x16xf32>, vector<32x16xf32> -> vector<32x16xf32>
    %315 = vector.extract_strided_slice %314 {offsets = [0, 0], sizes = [16, 16], strides = [1, 1]} : vector<32x16xf32> to vector<16x16xf32>
    %316 = vector.extract_strided_slice %314 {offsets = [16, 0], sizes = [16, 16], strides = [1, 1]} : vector<32x16xf32> to vector<16x16xf32>
    %317 = vector.extract_strided_slice %294 {offsets = [0, 32], sizes = [16, 16], strides = [1, 1]} : vector<16x64xf32> to vector<16x16xf32>
    %318 = vector.extract_strided_slice %294 {offsets = [0, 48], sizes = [16, 16], strides = [1, 1]} : vector<16x64xf32> to vector<16x16xf32>
    %319 = tpu.concatenate %317, %318 in 0 : vector<16x16xf32>, vector<16x16xf32> -> vector<32x16xf32>
    %320 = vector.extract_strided_slice %295 {offsets = [0, 16], sizes = [8, 16], strides = [1, 1]} : vector<8x32xf32> to vector<8x16xf32>
    %321 = vector.extract_strided_slice %296 {offsets = [0, 16], sizes = [8, 16], strides = [1, 1]} : vector<8x32xf32> to vector<8x16xf32>
    %322 = tpu.transpose %320, [1, 0] : vector<8x16xf32> -> vector<16x8xf32>
    %cst_77 = arith.constant dense<0.000000e+00> : vector<32x8xf32>
    %323 = tpu.matmul %319, %322, %cst_77 {dimension_numbers = #tpu.dot_dimension_numbers<[1], [0], [0], [1], [0, 0, 1, 1], [], []>} : vector<32x16xf32>, vector<16x8xf32>, vector<32x8xf32> -> vector<32x8xf32>
    %cst_78 = arith.constant dense<0xFF800000> : vector<32xf32>
    %324 = vector.multi_reduction <maximumf>, %323, %cst_78 [1] : vector<32x8xf32> to vector<32xf32>
    %325 = vector.shape_cast %324 : vector<32xf32> to vector<32x1xf32>
    %326 = vector.broadcast %325 : vector<32x1xf32> to vector<32x8xf32>
    %327 = arith.subf %323, %326 : vector<32x8xf32>
    %328 = math.exp %327 : vector<32x8xf32>
    %cst_79 = arith.constant dense<0.000000e+00> : vector<32xf32>
    %329 = vector.multi_reduction <add>, %328, %cst_79 [1] : vector<32x8xf32> to vector<32xf32>
    %330 = vector.shape_cast %329 : vector<32xf32> to vector<32x1xf32>
    %331 = tpu.reciprocal %330 {approx = true} : vector<32x1xf32> -> vector<32x1xf32>
    %332 = vector.broadcast %331 : vector<32x1xf32> to vector<32x8xf32>
    %333 = arith.mulf %328, %332 : vector<32x8xf32>
    %cst_80 = arith.constant dense<0.000000e+00> : vector<32x16xf32>
    %334 = tpu.matmul %333, %321, %cst_80 {dimension_numbers = #tpu.dot_dimension_numbers<[1], [0], [0], [1], [0, 0, 1, 1], [], []>} : vector<32x8xf32>, vector<8x16xf32>, vector<32x16xf32> -> vector<32x16xf32>
    %335 = vector.extract_strided_slice %334 {offsets = [0, 0], sizes = [16, 16], strides = [1, 1]} : vector<32x16xf32> to vector<16x16xf32>
    %336 = vector.extract_strided_slice %334 {offsets = [16, 0], sizes = [16, 16], strides = [1, 1]} : vector<32x16xf32> to vector<16x16xf32>
    %337 = tpu.concatenate %315, %316, %335, %336 in 1 : vector<16x16xf32>, vector<16x16xf32>, vector<16x16xf32>, vector<16x16xf32> -> vector<16x64xf32>
    %338 = tpu.concatenate %293, %337 in 0 : vector<16x64xf32>, vector<16x64xf32> -> vector<32x64xf32>
    %339 = arith.truncf %338 : vector<32x64xf32> to vector<32x64xbf16>
    %cst_81 = arith.constant dense<0.000000e+00> : vector<32x64xf32>
    %340 = tpu.matmul %339, %249, %cst_81 {dimension_numbers = #tpu.dot_dimension_numbers<[1], [0], [0], [1], [0, 0, 1, 1], [], []>} : vector<32x64xbf16>, vector<64x64xbf16>, vector<32x64xf32> -> vector<32x64xf32>
    %341 = vector.broadcast %22 : vector<1x64xf32> to vector<32x64xf32>
    %342 = arith.mulf %340, %341 : vector<32x64xf32>
    %343 = arith.mulf %342, %342 : vector<32x64xf32>
    %cst_82 = arith.constant dense<0.000000e+00> : vector<32xf32>
    %344 = vector.multi_reduction <add>, %343, %cst_82 [1] : vector<32x64xf32> to vector<32xf32>
    %345 = vector.shape_cast %344 : vector<32xf32> to vector<32x1xf32>
    %cst_83 = arith.constant 6.400000e+01 : f32
    %346 = vector.broadcast %cst_83 : f32 to vector<32x1xf32>
    %347 = arith.divf %345, %346 : vector<32x1xf32>
    %cst_84 = arith.constant 9.99999997E-7 : f32
    %348 = vector.broadcast %cst_84 : f32 to vector<32x1xf32>
    %349 = arith.addf %347, %348 : vector<32x1xf32>
    %350 = math.rsqrt %349 : vector<32x1xf32>
    %351 = vector.broadcast %350 : vector<32x1xf32> to vector<32x64xf32>
    %352 = arith.mulf %342, %351 : vector<32x64xf32>
    %353 = vector.broadcast %12 : vector<1x64xf32> to vector<32x64xf32>
    %354 = arith.mulf %352, %353 : vector<32x64xf32>
    %355 = vector.extract_strided_slice %2 {offsets = [0, 384], sizes = [32, 128], strides = [1, 1]} : vector<32x768xf32> to vector<32x128xf32>
    %356 = arith.mulf %354, %354 : vector<32x64xf32>
    %cst_85 = arith.constant dense<0.000000e+00> : vector<32xf32>
    %357 = vector.multi_reduction <add>, %356, %cst_85 [1] : vector<32x64xf32> to vector<32xf32>
    %358 = vector.shape_cast %357 : vector<32xf32> to vector<32x1xf32>
    %cst_86 = arith.constant 6.400000e+01 : f32
    %359 = vector.broadcast %cst_86 : f32 to vector<32x1xf32>
    %360 = arith.divf %358, %359 : vector<32x1xf32>
    %cst_87 = arith.constant 9.99999997E-7 : f32
    %361 = vector.broadcast %cst_87 : f32 to vector<32x1xf32>
    %362 = arith.addf %360, %361 : vector<32x1xf32>
    %363 = math.rsqrt %362 : vector<32x1xf32>
    %364 = vector.broadcast %363 : vector<32x1xf32> to vector<32x64xf32>
    %365 = arith.mulf %354, %364 : vector<32x64xf32>
    %366 = vector.broadcast %18 : vector<1x64xf32> to vector<32x64xf32>
    %367 = arith.mulf %365, %366 : vector<32x64xf32>
    %368 = vector.extract_strided_slice %355 {offsets = [0, 64], sizes = [32, 64], strides = [1, 1]} : vector<32x128xf32> to vector<32x64xf32>
    %cst_88 = arith.constant 1.000000e+00 : f32
    %369 = vector.broadcast %cst_88 : f32 to vector<32x64xf32>
    %370 = arith.addf %369, %368 : vector<32x64xf32>
    %371 = arith.mulf %367, %370 : vector<32x64xf32>
    %372 = vector.extract_strided_slice %355 {offsets = [0, 0], sizes = [32, 64], strides = [1, 1]} : vector<32x128xf32> to vector<32x64xf32>
    %373 = arith.addf %371, %372 : vector<32x64xf32>
    %374 = arith.addf %202, %373 : vector<32x64xf32>
    %375 = arith.mulf %374, %374 : vector<32x64xf32>
    %cst_89 = arith.constant dense<0.000000e+00> : vector<32xf32>
    %376 = vector.multi_reduction <add>, %375, %cst_89 [1] : vector<32x64xf32> to vector<32xf32>
    %377 = vector.shape_cast %376 : vector<32xf32> to vector<32x1xf32>
    %cst_90 = arith.constant 6.400000e+01 : f32
    %378 = vector.broadcast %cst_90 : f32 to vector<32x1xf32>
    %379 = arith.divf %377, %378 : vector<32x1xf32>
    %cst_91 = arith.constant 9.99999997E-7 : f32
    %380 = vector.broadcast %cst_91 : f32 to vector<32x1xf32>
    %381 = arith.addf %379, %380 : vector<32x1xf32>
    %382 = math.rsqrt %381 : vector<32x1xf32>
    %383 = vector.broadcast %382 : vector<32x1xf32> to vector<32x64xf32>
    %384 = arith.mulf %374, %383 : vector<32x64xf32>
    %385 = vector.broadcast %13 : vector<1x64xf32> to vector<32x64xf32>
    %386 = arith.mulf %384, %385 : vector<32x64xf32>
    %387 = vector.extract_strided_slice %2 {offsets = [0, 512], sizes = [32, 128], strides = [1, 1]} : vector<32x768xf32> to vector<32x128xf32>
    %388 = arith.mulf %386, %386 : vector<32x64xf32>
    %cst_92 = arith.constant dense<0.000000e+00> : vector<32xf32>
    %389 = vector.multi_reduction <add>, %388, %cst_92 [1] : vector<32x64xf32> to vector<32xf32>
    %390 = vector.shape_cast %389 : vector<32xf32> to vector<32x1xf32>
    %cst_93 = arith.constant 6.400000e+01 : f32
    %391 = vector.broadcast %cst_93 : f32 to vector<32x1xf32>
    %392 = arith.divf %390, %391 : vector<32x1xf32>
    %cst_94 = arith.constant 9.99999997E-7 : f32
    %393 = vector.broadcast %cst_94 : f32 to vector<32x1xf32>
    %394 = arith.addf %392, %393 : vector<32x1xf32>
    %395 = math.rsqrt %394 : vector<32x1xf32>
    %396 = vector.broadcast %395 : vector<32x1xf32> to vector<32x64xf32>
    %397 = arith.mulf %386, %396 : vector<32x64xf32>
    %398 = vector.broadcast %19 : vector<1x64xf32> to vector<32x64xf32>
    %399 = arith.mulf %397, %398 : vector<32x64xf32>
    %400 = vector.extract_strided_slice %387 {offsets = [0, 64], sizes = [32, 64], strides = [1, 1]} : vector<32x128xf32> to vector<32x64xf32>
    %cst_95 = arith.constant 1.000000e+00 : f32
    %401 = vector.broadcast %cst_95 : f32 to vector<32x64xf32>
    %402 = arith.addf %401, %400 : vector<32x64xf32>
    %403 = arith.mulf %399, %402 : vector<32x64xf32>
    %404 = vector.extract_strided_slice %387 {offsets = [0, 0], sizes = [32, 64], strides = [1, 1]} : vector<32x128xf32> to vector<32x64xf32>
    %405 = arith.addf %403, %404 : vector<32x64xf32>
    %406 = arith.truncf %405 : vector<32x64xf32> to vector<32x64xbf16>
    %c0_96 = arith.constant 0 : index
    %c0_97 = arith.constant 0 : index
    %407 = vector.load %arg9[%c0_96, %c0_97] : memref<64x256xbf16, #tpu.memory_space<vmem>>, vector<64x256xbf16>
    %cst_98 = arith.constant dense<0.000000e+00> : vector<32x256xf32>
    %408 = tpu.matmul %406, %407, %cst_98 {dimension_numbers = #tpu.dot_dimension_numbers<[1], [0], [0], [1], [0, 0, 1, 1], [], []>} : vector<32x64xbf16>, vector<64x256xbf16>, vector<32x256xf32> -> vector<32x256xf32>
    %409 = vector.extract_strided_slice %408 {offsets = [0, 0], sizes = [32, 128], strides = [1, 1]} : vector<32x256xf32> to vector<32x128xf32>
    %cst_99 = arith.constant 0.000000e+00 : f32
    %410 = vector.broadcast %cst_99 : f32 to vector<32x128xf32>
    %411 = arith.subf %410, %409 : vector<32x128xf32>
    %412 = math.exp %411 : vector<32x128xf32>
    %cst_100 = arith.constant 1.000000e+00 : f32
    %413 = vector.broadcast %cst_100 : f32 to vector<32x128xf32>
    %414 = arith.addf %413, %412 : vector<32x128xf32>
    %415 = tpu.reciprocal %414 {approx = true} : vector<32x128xf32> -> vector<32x128xf32>
    %416 = arith.mulf %409, %415 : vector<32x128xf32>
    %417 = vector.extract_strided_slice %408 {offsets = [0, 128], sizes = [32, 128], strides = [1, 1]} : vector<32x256xf32> to vector<32x128xf32>
    %418 = arith.mulf %416, %417 : vector<32x128xf32>
    %419 = arith.truncf %418 : vector<32x128xf32> to vector<32x128xbf16>
    %c0_101 = arith.constant 0 : index
    %c0_102 = arith.constant 0 : index
    %420 = vector.load %arg10[%c0_101, %c0_102] : memref<128x64xbf16, #tpu.memory_space<vmem>>, vector<128x64xbf16>
    %cst_103 = arith.constant dense<0.000000e+00> : vector<32x64xf32>
    %421 = tpu.matmul %419, %420, %cst_103 {dimension_numbers = #tpu.dot_dimension_numbers<[1], [0], [0], [1], [0, 0, 1, 1], [], []>} : vector<32x128xbf16>, vector<128x64xbf16>, vector<32x64xf32> -> vector<32x64xf32>
    %422 = vector.broadcast %23 : vector<1x64xf32> to vector<32x64xf32>
    %423 = arith.mulf %421, %422 : vector<32x64xf32>
    %424 = arith.mulf %423, %423 : vector<32x64xf32>
    %cst_104 = arith.constant dense<0.000000e+00> : vector<32xf32>
    %425 = vector.multi_reduction <add>, %424, %cst_104 [1] : vector<32x64xf32> to vector<32xf32>
    %426 = vector.shape_cast %425 : vector<32xf32> to vector<32x1xf32>
    %cst_105 = arith.constant 6.400000e+01 : f32
    %427 = vector.broadcast %cst_105 : f32 to vector<32x1xf32>
    %428 = arith.divf %426, %427 : vector<32x1xf32>
    %cst_106 = arith.constant 9.99999997E-7 : f32
    %429 = vector.broadcast %cst_106 : f32 to vector<32x1xf32>
    %430 = arith.addf %428, %429 : vector<32x1xf32>
    %431 = math.rsqrt %430 : vector<32x1xf32>
    %432 = vector.broadcast %431 : vector<32x1xf32> to vector<32x64xf32>
    %433 = arith.mulf %423, %432 : vector<32x64xf32>
    %434 = vector.broadcast %14 : vector<1x64xf32> to vector<32x64xf32>
    %435 = arith.mulf %433, %434 : vector<32x64xf32>
    %436 = vector.extract_strided_slice %2 {offsets = [0, 640], sizes = [32, 128], strides = [1, 1]} : vector<32x768xf32> to vector<32x128xf32>
    %437 = arith.mulf %435, %435 : vector<32x64xf32>
    %cst_107 = arith.constant dense<0.000000e+00> : vector<32xf32>
    %438 = vector.multi_reduction <add>, %437, %cst_107 [1] : vector<32x64xf32> to vector<32xf32>
    %439 = vector.shape_cast %438 : vector<32xf32> to vector<32x1xf32>
    %cst_108 = arith.constant 6.400000e+01 : f32
    %440 = vector.broadcast %cst_108 : f32 to vector<32x1xf32>
    %441 = arith.divf %439, %440 : vector<32x1xf32>
    %cst_109 = arith.constant 9.99999997E-7 : f32
    %442 = vector.broadcast %cst_109 : f32 to vector<32x1xf32>
    %443 = arith.addf %441, %442 : vector<32x1xf32>
    %444 = math.rsqrt %443 : vector<32x1xf32>
    %445 = vector.broadcast %444 : vector<32x1xf32> to vector<32x64xf32>
    %446 = arith.mulf %435, %445 : vector<32x64xf32>
    %447 = vector.broadcast %20 : vector<1x64xf32> to vector<32x64xf32>
    %448 = arith.mulf %446, %447 : vector<32x64xf32>
    %449 = vector.extract_strided_slice %436 {offsets = [0, 64], sizes = [32, 64], strides = [1, 1]} : vector<32x128xf32> to vector<32x64xf32>
    %cst_110 = arith.constant 1.000000e+00 : f32
    %450 = vector.broadcast %cst_110 : f32 to vector<32x64xf32>
    %451 = arith.addf %450, %449 : vector<32x64xf32>
    %452 = arith.mulf %448, %451 : vector<32x64xf32>
    %453 = vector.extract_strided_slice %436 {offsets = [0, 0], sizes = [32, 64], strides = [1, 1]} : vector<32x128xf32> to vector<32x64xf32>
    %454 = arith.addf %452, %453 : vector<32x64xf32>
    %455 = arith.addf %374, %454 : vector<32x64xf32>
    %c0_111 = arith.constant 0 : index
    %c0_112 = arith.constant 0 : index
    %456 = vector.load %arg11[%c0_111, %c0_112] : memref<32x64xf32, #tpu.memory_space<vmem>>, vector<32x64xf32>
    tpu.vector_store %arg11[%c0_111, %c0_112], %455 {strides = array<i32>} : memref<32x64xf32, #tpu.memory_space<vmem>>, vector<32x64xf32>,
    return
  }
}

</mosaic_0001>

<bundles_post_ra>
// kernel: dit_block_pallas.1
= control target key start
LH: loop header
LB: loop body
LE: loop exit
PB: predicated region body
PF: predicated region fallthrough
CT: control target
= control target key end

     0   :  { %vm114_vm0 = vcmask 523264   ;;  %s6021_s0 = inlined_call_operand.vmem [shape: f32[32,64], index: 0, kind: input, shape index: {}]   ;;  %s6022_s1 = inlined_call_operand.vmem [shape: f32[16,32], index: 1, kind: input, shape index: {}]   ;;  %s6023_s2 = inlined_call_operand.vmem [shape: f32[32,768], index: 2, kind: input, shape index: {}]   ;;  %s6024_s3 = inlined_call_operand.vmem [shape: f32[2,32,64], index: 3, kind: input, shape index: {}]   ;;  %s6025_s4 = inlined_call_operand.vmem [shape: f32[64,64], index: 4, kind: input, shape index: {}]   ;;  %s6026_s5 = inlined_call_operand.vmem [shape: f32[16,64], index: 5, kind: input, shape index: {}]   ;;  %s6027_s6 = inlined_call_operand.vmem [shape: bf16[64,192], index: 6, kind: input, shape index: {}]   ;;  %s6028_s7 = inlined_call_operand.vmem [shape: bf16[64,192], index: 7, kind: input, shape index: {}]   ;;  %s6029_s8 = inlined_call_operand.vmem [shape: f32[33,64], index: 8, kind: input, shape index: {}]   ;;  %s6030_s9 = inlined_call_operand.vmem [shape: bf16[64,256], index: 9, kind: input, shape index: {}]   ;;  %s6031_s10 = inlined_call_operand.vmem [shape: bf16[128,64], index: 10, kind: input, shape index: {}]   ;;  %s6032_s11 = inlined_call_operand.hbm [shape: f32[32,64], index: 11, kind: output, shape index: {}]  }
   0x1   :  { %v40_v0 = vld [vmem:[%s6021_s0] sm:$0xff]  ;;  %v42_v1 = vld [vmem:[%s6021_s0 + $0x10] sm:$0xff]  ;;  %v41_v2 = vld [vmem:[%s6021_s0 + $0x8] sm:$0xff] }
   0x2   :  { %v110_v3 = vmul.f32 %v40_v0, %v40_v0  ;;  %v112_v4 = vmul.f32 %v42_v1, %v42_v1  ;;  %v111_v5 = vmul.f32 %v41_v2, %v41_v2  ;;  %v43_v6 = vld [vmem:[%s6021_s0 + $0x18] sm:$0xff] }
   0x3   :  { %v113_v7 = vmul.f32 %v43_v6, %v43_v6 }
   0x4   :  { %v115_v8 = vsel %vm114_vm0, %v110_v3, 0.0  ;;  %v121_v9 = vsel %vm114_vm0, %v112_v4, 0.0  ;;  %v118_v10 = vsel %vm114_vm0, %v111_v5, 0.0 }
   0x5   :  { %116 = vadd.xlane.f32.xlu0 %v115_v8  ;;  %122 = vadd.xlane.f32.xlu1 %v121_v9  ;;  %v124_v11 = vsel %vm114_vm0, %v113_v7, 0.0 }
   0x9   :  { %119 = vadd.xlane.f32.xlu0 %v118_v10  ;;  %125 = vadd.xlane.f32.xlu1 %v124_v11 }
   0xa   :  { %16 = vsyncpa [#allocation3], 0  ;;  %v144_v20 = vlaneseq  ;;  %v4963_v24 = vld [vmem:[%s6026_s5] sm:$0xff]  ;;  %v52_v41 = vld [vmem:[%s6023_s2 + $0x30] sm:$0xff]  ;;  %s4868_s14 = smov 64   ;;  %vm446_vm1 = vcmask 261120  }
   0xb   :  { %v193_v42 = vadd.f32 1.0, %v52_v41  ;;  %v4985_v43 = vld [vmem:[%s6023_s2 + $0x60] sm:$0xff]  ;;  %v64_v55 = vld [vmem:[%s6023_s2 + $0x90] sm:$0xff]  ;;  %v86_v61 = vld [vmem:[%s6025_s4 + $0x38] sm:$0xff]  ;;  %vm576_vm2 = vcmask 130048   ;;  %s4869_s20 = smov 112  }
   0xc   :  { %v4957_v22 = vshrl.u32 %v144_v20, 7  ;;  %v46_v45 = vld [vmem:[%s6023_s2] sm:$0xff]  ;;  %v194_v46 = vadd.f32 1.0, %v4985_v43  ;;  %v195_v56 = vadd.f32 1.0, %v64_v55  ;;  %v4555_v57 = vld [vmem:[%s6027_s6 + $0x30] ss:$8 sps:$4 sm:$0xff]  }
   0xd   :  { %v192_v48 = vadd.f32 1.0, %v46_v45  ;;  %v4558_v58 = vld [vmem:[%s6027_s6 + $0x20] ss:$8 sps:$4 sm:$0xff]   ;;  %4209 = vmatprep.subr.bf16.mxu1 %v4555_v57  ;;  %v4560_v59 = vld [vmem:[%s6027_s6 + $0x10] ss:$8 sps:$4 sm:$0xff]   ;;  %s4871_s21 = smov 96  }
   0xe   :  { %v146_v23 = vsub.s32 0, %v4957_v22  ;;  %4210 = vmatpush3.bf16.msra.mxu1 %v4555_v57  ;;  %v4562_v60 = vld [vmem:[%s6027_s6] ss:$8 sps:$4 sm:$0xff]   ;;  %v186_v4 = vsub.s32 6, %v4957_v22  ;;  %s4872_s22 = smov 32   ;;  %s4873_s25 = smov 16  }
   0xf   :  { %4211 = vmatprep.subr.bf16.mxu1 %v4558_v58  ;;  %vm1105_vm3 = vcmask 392192   ;;  %vm4875_vm4 = vmmov 0   ;;  %vm2280_vm5 = vcmask 64512  }
  0x10   :  { %v147_v25 = vrot.slane %v4963_v24, %v146_v23  ;;  %v187_v5 = vrot.slane %v4963_v24, %v186_v4 }
  0x12   :  { %4212 = vmatpush3.bf16.msra.mxu1 %v4558_v58 }
  0x13   :  { %4213 = vmatprep.subr.bf16.mxu1 %v4560_v59 }
  0x16   :  { %4214 = vmatpush3.bf16.msra.mxu1 %v4560_v59  ;;  %v71_v59 = vld [vmem:[%s6024_s3 + $0x8] sm:$0xff] }
  0x17   :  { %4215 = vmatprep.subr.bf16.mxu1 %v4562_v60 }
  0x1a   :  { %4216 = vmatpush3.bf16.msra.mxu1 %v4562_v60 }
  0x1b   :  { %4221 = vmatprep.subr.mxu1 %v86_v61 }
  0x8e   :  { %v117_v12 = vpop.xlane.xlu0 %116  ;;  %v123_v13 = vpop.xlane.xlu1 %122 }
  0x8f   :  { %v128_v14 = vmul.f32 0.015625, %v117_v12  ;;  %v130_v15 = vmul.f32 0.015625, %v123_v13 }
  0x91   :  { %v132_v16 = vadd.f32 1e-06, %v128_v14  ;;  %v134_v17 = vadd.f32 1e-06, %v130_v15 }
  0x92   :  { %v120_v18 = vpop.xlane.xlu0 %119  ;;  %v126_v44 = vpop.xlane.xlu1 %125 }
  0x93   :  { %4599 = vrsqrt.f32 %v132_v16  ;;  %v129_v19 = vmul.f32 0.015625, %v120_v18  ;;  %v131_v47 = vmul.f32 0.015625, %v126_v44  ;;  %v81_v44 = vld [vmem:[%s6025_s4 + $0x10] sm:$0xff] }
  0x94   :  { %4601 = vrsqrt.f32 %v134_v17 }
  0x95   :  { %v133_v21 = vadd.f32 1e-06, %v129_v19  ;;  %v135_v49 = vadd.f32 1e-06, %v131_v47 }
  0x97   :  { %4603 = vrsqrt.f32 %v133_v21 }
  0x98   :  { %4605 = vrsqrt.f32 %v135_v49 }
  0xa0   :  { %v4600_v26 = vpop.eup %4599 }
  0xa1   :  { %v4602_v27 = vpop.eup %4601  ;;  %v140_v28 = vmul.f32 %v4600_v26, %v40_v0 }
  0xa2   :  { %v142_v29 = vmul.f32 %v4602_v27, %v42_v1 }
  0xa3   :  { %v4968_v30 = vmul.f32 %v147_v25, %v140_v28 }
  0xa4   :  { %v4604_v31 = vpop.eup %4603  ;;  %v4970_v32 = vmul.f32 %v147_v25, %v142_v29 }
  0xa5   :  { %v152_v33 = vmul.f32 %v4968_v30, %v4968_v30  ;;  %v141_v34 = vmul.f32 %v4604_v31, %v41_v2  ;;  %v4606_v50 = vpop.eup %4605 }
  0xa6   :  { %v154_v35 = vmul.f32 %v4970_v32, %v4970_v32  ;;  %v143_v51 = vmul.f32 %v4606_v50, %v43_v6 }
  0xa7   :  { %v156_v36 = vsel %vm114_vm0, %v152_v33, 0.0  ;;  %v149_v37 = vmul.f32 %v147_v25, %v141_v34 }
  0xa8   :  { %157 = vadd.xlane.f32.xlu0 %v156_v36  ;;  %v162_v38 = vsel %vm114_vm0, %v154_v35, 0.0  ;;  %v151_v52 = vmul.f32 %v147_v25, %v143_v51  ;;  %v70_v51 = vld [vmem:[%s6024_s3] sm:$0xff] }
  0xa9   :  { %v153_v39 = vmul.f32 %v149_v37, %v149_v37 }
  0xaa   :  { %v155_v53 = vmul.f32 %v151_v52, %v151_v52 }
  0xab   :  { %v159_v40 = vsel %vm114_vm0, %v153_v39, 0.0 }
  0xac   :  { %163 = vadd.xlane.f32.xlu0 %v162_v38  ;;  %160 = vadd.xlane.f32.xlu1 %v159_v40  ;;  %v165_v54 = vsel %vm114_vm0, %v155_v53, 0.0 }
  0xbd   :  { %202 = vrot.lane.b32.xlu1 %v193_v42, %s4868_s14  ;;  %v83_v42 = vld [vmem:[%s6025_s4 + $0x20] sm:$0xff] }
  0xc1   :  { %204 = vrot.lane.b32.xlu1 %v194_v46, %s4868_s14  ;;  %v79_v46 = vld [vmem:[%s6025_s4] sm:$0xff] }
  0xc2   :  { %200 = vrot.lane.b32.xlu0 %v192_v48, %s4868_s14  ;;  %v72_v48 = vld [vmem:[%s6024_s3 + $0x10] sm:$0xff] }
  0xe5   :  { %166 = vadd.xlane.f32.xlu1 %v165_v54 }
  0xf6   :  { %206 = vrot.lane.b32.xlu1 %v195_v56, %s4868_s14 }
 0x131   :  { %v158_v62 = vpop.xlane.xlu0 %157 }
 0x132   :  { %v168_v63 = vmul.f32 0.015625, %v158_v62 }
 0x134   :  { %v172_v0 = vadd.f32 1e-06, %v168_v63 }
 0x135   :  { %v161_v1 = vpop.xlane.xlu1 %160  ;;  %v164_v7 = vpop.xlane.xlu0 %163 }
 0x136   :  { %4607 = vrsqrt.f32 %v172_v0  ;;  %v169_v2 = vmul.f32 0.015625, %v161_v1  ;;  %v170_v20 = vmul.f32 0.015625, %v164_v7 }
 0x138   :  { %v173_v3 = vadd.f32 1e-06, %v169_v2  ;;  %v174_v21 = vadd.f32 1e-06, %v170_v20 }
 0x139   :  { %v201_v11 = vpop.permute.xlu0 %200  ;;  %v203_v15 = vpop.permute.xlu1 %202 }
 0x13a   :  { %4609 = vrsqrt.f32 %v173_v3  ;;  %v3923_v3 = vld [vmem:[%s6024_s3 + $0x28] sm:$0xff] }
 0x13b   :  { %4611 = vrsqrt.f32 %v174_v21 }
 0x13d   :  { %v205_v24 = vpop.permute.xlu1 %204 }
 0x143   :  { %v4608_v6 = vpop.eup %4607 }
 0x144   :  { %v180_v8 = vmul.f32 %v4608_v6, %v4968_v30  ;;  %v3922_v6 = vld [vmem:[%s6024_s3 + $0x20] sm:$0xff] }
 0x146   :  { %v188_v9 = vmul.f32 %v187_v5, %v180_v8 }
 0x147   :  { %v4610_v10 = vpop.eup %4609 }
 0x148   :  { %v181_v12 = vmul.f32 %v4610_v10, %v149_v37  ;;  %v212_v14 = vmul.f32 %v201_v11, %v188_v9  ;;  %v4612_v28 = vpop.eup %4611  ;;  %v3925_v9 = vld [vmem:[%s6024_s3 + $0x38] sm:$0xff] }
 0x149   :  { %v182_v29 = vmul.f32 %v4612_v28, %v4970_v32  ;;  %v84_v32 = vld [vmem:[%s6025_s4 + $0x28] sm:$0xff] }
 0x14a   :  { %v189_v13 = vmul.f32 %v187_v5, %v181_v12  ;;  %v216_v17 = vadd.f32 %v212_v14, %v46_v45  ;;  %v80_v45 = vld [vmem:[%s6025_s4 + $0x8] sm:$0xff] }
 0x14b   :  { %v190_v30 = vmul.f32 %v187_v5, %v182_v29 }
 0x14c   :  { %v213_v16 = vmul.f32 %v203_v15, %v189_v13  ;;  %v3924_v13 = vld [vmem:[%s6024_s3 + $0x30] sm:$0xff] }
 0x14d   :  { %v214_v35 = vmul.f32 %v205_v24, %v190_v30 }
 0x14e   :  { %v217_v18 = vadd.f32 %v213_v16, %v52_v41  ;;  %v85_v41 = vld [vmem:[%s6025_s4 + $0x30] sm:$0xff] }
 0x14f   :  { %v218_v38 = vadd.f32 %v214_v35, %v4985_v43  ;;  %v82_v43 = vld [vmem:[%s6025_s4 + $0x18] sm:$0xff] }
 0x150   :  { %v220_v19 = vpack.c.bf16 %v217_v18, %v216_v17  ;;  %4243 = vmatprep.subr.mxu0 %v82_v43 }
 0x151   :  { %4244 = vmatpush3.msra.mxu0 %v82_v43 }
 0x152   :  { %4217 = vmatprep.mubr.msk.bf16.mxu1 %vm114_vm0, %v220_v19  ;;  %4245 = vmatprep.subr.mxu0 %v81_v44 }
 0x153   :  { %4246 = vmatpush3.msra.mxu0 %v81_v44 }
 0x154   :  { %4247 = vmatprep.subr.mxu0 %v80_v45 }
 0x155   :  { %4248 = vmatpush3.msra.mxu0 %v80_v45 }
 0x156   :  { %4249 = vmatprep.subr.mxu0 %v79_v46 }
 0x157   :  { %4250 = vmatpush3.msra.mxu0 %v79_v46 }
 0x16e   :  { %v167_v25 = vpop.xlane.xlu1 %166 }
 0x16f   :  { %v171_v26 = vmul.f32 0.015625, %v167_v25 }
 0x171   :  { %v175_v27 = vadd.f32 1e-06, %v171_v26 }
 0x172   :  { %v207_v34 = vpop.permute.xlu1 %206 }
 0x173   :  { %4613 = vrsqrt.f32 %v175_v27 }
 0x180   :  { %v4614_v31 = vpop.eup %4613 }
 0x181   :  { %v183_v33 = vmul.f32 %v4614_v31, %v151_v52 }
 0x183   :  { %v191_v36 = vmul.f32 %v187_v5, %v183_v33 }
 0x185   :  { %v215_v37 = vmul.f32 %v207_v34, %v191_v36 }
 0x187   :  { %v219_v39 = vadd.f32 %v215_v37, %v64_v55  ;;  %v73_v55 = vld [vmem:[%s6024_s3 + $0x18] sm:$0xff]  ;;  %s4870_s3 = smov 48  }
 0x189   :  { %v221_v40 = vpack.c.bf16 %v219_v39, %v218_v38 }
 0x18b   :  { %4218 = vmatmul.mubr.msk.bf16.vlgmr.msra.gmra.mxu1 %vm114_vm0, %v221_v40 }
 0x18c   :  { %4222 = vmatpush3.msra.mxu1 %v86_v61 }
 0x18d   :  { %4223 = vmatprep.subr.mxu1 %v85_v41 }
 0x18e   :  { %4224 = vmatpush3.msra.mxu1 %v85_v41 }
 0x18f   :  { %4225 = vmatprep.subr.mxu1 %v84_v32 }
 0x190   :  { %4226 = vmatpush3.msra.mxu1 %v84_v32 }
 0x191   :  { %4227 = vmatprep.subr.mxu1 %v83_v42 }
 0x192   :  { %4228 = vmatpush3.msra.mxu1 %v83_v42 }
 0x193   :  { %4229 = vmatprep.subr.mxu1 %v82_v43 }
 0x194   :  { %4230 = vmatpush3.msra.mxu1 %v82_v43 }
 0x195   :  { %4231 = vmatprep.subr.mxu1 %v81_v44 }
 0x196   :  { %4232 = vmatpush3.msra.mxu1 %v81_v44 }
 0x197   :  { %4233 = vmatprep.subr.mxu1 %v80_v45 }
 0x198   :  { %4234 = vmatpush3.msra.mxu1 %v80_v45 }
 0x199   :  { %4235 = vmatprep.subr.mxu1 %v79_v46 }
 0x19a   :  { %4236 = vmatpush3.msra.mxu1 %v79_v46 }
 0x24b   :  { %v5044_v47 = vpop.f32.mrf.mxu1 }
 0x24c   :  { %v303_v49 = vmul.f32 0.25, %v5044_v47 }
 0x24d   :  { %v5050_v50 = vpop.f32.mrf.mxu1 }
 0x24e   :  { %438 = vrot.lane.b32.xlu0 %v5050_v50, %s4868_s14  ;;  %v301_v52 = vmul.f32 0.25, %v5050_v50  ;;  %v307_v53 = vmul.f32 %v303_v49, %v72_v48 }
 0x24f   :  { %v5058_v54 = vpop.f32.mrf.mxu1 }
 0x250   :  { %4237 = vmatprep.mubr.msk.f32.mxu1 %vm114_vm0, %v301_v52  ;;  %v304_v56 = vmul.f32 0.25, %v5058_v54  ;;  %v305_v57 = vmul.f32 %v301_v52, %v70_v51 }
 0x251   :  { %v5065_v58 = vpop.f32.mrf.mxu1 }
 0x252   :  { %v302_v60 = vmul.f32 0.25, %v5065_v58  ;;  %442 = vrot.lane.b32.xlu0 %v5044_v47, %s4868_s14  ;;  %440 = vrot.lane.b32.xlu1 %v5065_v58, %s4868_s14  ;;  %v308_v61 = vmul.f32 %v304_v56, %v73_v55 }
 0x254   :  { %4238 = vmatmul.mubr.msk.f32.vlgmr.msra.gmra.mxu1 %vm114_vm0, %v302_v60  ;;  %v306_v62 = vmul.f32 %v302_v60, %v71_v59 }
 0x255   :  { %4240 = vmatprep.mubr.msk.f32.mxu1 %vm114_vm0, %v303_v49 }
 0x256   :  { %420 = vrot.lane.b32.xlu0 %v71_v59, %s4868_s14  ;;  %444 = vrot.lane.b32.xlu1 %v5058_v54, %s4868_s14 }
 0x258   :  { %4241 = vmatmul.mubr.msk.f32.gmra.mxu1 %vm114_vm0, %v304_v56 }
 0x25a   :  { %418 = vrot.lane.b32.xlu0 %v70_v51, %s4868_s14 }
 0x25e   :  { %424 = vrot.lane.b32.xlu0 %v73_v55, %s4868_s14 }
 0x262   :  { %422 = vrot.lane.b32.xlu0 %v72_v48, %s4868_s14 }
 0x2c0   :  { %v439_v63 = vpop.permute.xlu0 %438 }
 0x2c1   :  { %4251 = vmatprep.mubr.msk.f32.mxu0 %vm446_vm1, %v439_v63 }
 0x2c4   :  { %v443_v0 = vpop.permute.xlu0 %442  ;;  %v441_v1 = vpop.permute.xlu1 %440 }
 0x2c5   :  { %4252 = vmatmul.mubr.msk.f32.vlgmr.msra.gmra.mxu0 %vm446_vm1, %v441_v1 }
 0x2c6   :  { %4254 = vmatprep.mubr.msk.f32.mxu0 %vm446_vm1, %v443_v0 }
 0x2c8   :  { %v445_v2 = vpop.permute.xlu1 %444  ;;  %v421_v30 = vpop.permute.xlu0 %420 }
 0x2c9   :  { %4255 = vmatmul.mubr.msk.f32.gmra.mxu0 %vm446_vm1, %v445_v2  ;;  %v431_v31 = vmul.f32 %v421_v30, %v5065_v58  ;;  %v4557_v2 = vld [vmem:[%s6027_s6 + $0x34] ss:$8 sps:$4 sm:$0xff]  }
 0x2cc   :  { %v419_v33 = vpop.permute.xlu0 %418 }
 0x2cd   :  { %v430_v36 = vmul.f32 %v419_v33, %v5050_v50 }
 0x2d0   :  { %v425_v39 = vpop.permute.xlu0 %424 }
 0x2d1   :  { %v433_v41 = vmul.f32 %v5058_v54, %v425_v39 }
 0x2d4   :  { %v423_v43 = vpop.permute.xlu0 %422 }
 0x2d5   :  { %v432_v46 = vmul.f32 %v5044_v47, %v423_v43 }
 0x314   :  { %v4239_v5 = vpop.f32.mrf.mxu1 }
 0x315   :  { %v407_v7 = vmul.f32 %v4239_v5, %v3923_v3 }
 0x316   :  { %v387_v8 = vpop.f32.mrf.mxu1 }
 0x317   :  { %v5097_v10 = vadd.f32 %v407_v7, %v306_v62  ;;  %v406_v11 = vmul.f32 %v3922_v6, %v387_v8 }
 0x318   :  { %v4242_v12 = vpop.f32.mrf.mxu1 }
 0x319   :  { %v410_v14 = vadd.f32 %v406_v11, %v305_v57  ;;  %v409_v15 = vmul.f32 %v4242_v12, %v3925_v9 }
 0x31a   :  { %v397_v16 = vpop.f32.mrf.mxu1 }
 0x31b   :  { %v5102_v17 = vadd.f32 %v409_v15, %v308_v61  ;;  %v408_v18 = vmul.f32 %v3924_v13, %v397_v16  ;;  %566 = vrot.lane.b32.xlu0 %v410_v14, %s4869_s20  ;;  %4261 = vmatprep.mubr.msk.f32.mxu1 %vm576_vm2, %v410_v14 }
 0x31d   :  { %v5106_v19 = vadd.f32 %v408_v18, %v307_v53 }
 0x31f   :  { %1110 = vrot.lane.b32.xlu0 %v5106_v19, %s4869_s20 }
 0x385   :  { %v4253_v20 = vpop.f32.mrf.mxu0 }
 0x386   :  { %v541_v21 = vmul.f32 %v4253_v20, %v3923_v3 }
 0x387   :  { %v521_v24 = vpop.f32.mrf.mxu0 }
 0x388   :  { %550 = vrot.lane.b32.xlu1 %v541_v21, %s4868_s14  ;;  %v540_v25 = vmul.f32 %v3922_v6, %v521_v24 }
 0x389   :  { %v4256_v26 = vpop.f32.mrf.mxu0 }
 0x38a   :  { %v543_v27 = vmul.f32 %v4256_v26, %v3925_v9 }
 0x38b   :  { %v531_v28 = vpop.f32.mrf.mxu0 }
 0x38c   :  { %548 = vrot.lane.b32.xlu1 %v540_v25, %s4868_s14  ;;  %v542_v29 = vmul.f32 %v3924_v13, %v531_v28 }
 0x38d   :  { %v567_v44 = vpop.permute.xlu0 %566 }
 0x390   :  { %554 = vrot.lane.b32.xlu1 %v543_v27, %s4868_s14 }
 0x391   :  { %v1111_v49 = vpop.permute.xlu0 %1110 }
 0x394   :  { %552 = vrot.lane.b32.xlu1 %v542_v29, %s4868_s14 }
 0x398   :  { %568 = vrot.lane.b32.xlu1 %v5097_v10, %s4869_s20 }
 0x39c   :  { %1112 = vrot.lane.b32.xlu1 %v5102_v17, %s4869_s20 }
 0x3fa   :  { %v551_v34 = vpop.permute.xlu1 %550 }
 0x3fb   :  { %v561_v35 = vadd.f32 %v551_v34, %v431_v31 }
 0x3fd   :  { %574 = vrot.lane.b32.xlu0 %v561_v35, %s4868_s14 }
 0x3fe   :  { %v549_v37 = vpop.permute.xlu1 %548 }
 0x3ff   :  { %v560_v38 = vadd.f32 %v549_v37, %v430_v36 }
 0x401   :  { %831 = vrot.lane.b32.xlu0 %v561_v35, %s4870_s3  ;;  %572 = vrot.lane.b32.xlu1 %v560_v38, %s4868_s14 }
 0x402   :  { %v555_v40 = vpop.permute.xlu1 %554 }
 0x403   :  { %v563_v42 = vadd.f32 %v555_v40, %v433_v41 }
 0x405   :  { %821 = vrot.lane.b32.xlu0 %v410_v14, %s4871_s21  ;;  %823 = vrot.lane.b32.xlu1 %v5097_v10, %s4871_s21 }
 0x406   :  { %v553_v32 = vpop.permute.xlu1 %552 }
 0x407   :  { %v562_v48 = vadd.f32 %v553_v32, %v432_v46 }
 0x409   :  { %1118 = vrot.lane.b32.xlu0 %v563_v42, %s4868_s14  ;;  %829 = vrot.lane.b32.xlu1 %v560_v38, %s4870_s3 }
 0x40a   :  { %v569_v45 = vpop.permute.xlu1 %568 }
 0x40d   :  { %825 = vrot.lane.b32.xlu1 %v567_v44, %s4871_s21  ;;  %827 = vrot.lane.b32.xlu0 %v569_v45, %s4871_s21 }
 0x40e   :  { %v1113_v51 = vpop.permute.xlu1 %1112 }
 0x411   :  { %1116 = vrot.lane.b32.xlu1 %v562_v48, %s4868_s14  ;;  %1374 = vrot.lane.b32.xlu0 %v563_v42, %s4870_s3 }
 0x415   :  { %1372 = vrot.lane.b32.xlu1 %v562_v48, %s4870_s3  ;;  %1364 = vrot.lane.b32.xlu0 %v5106_v19, %s4871_s21 }
 0x419   :  { %1366 = vrot.lane.b32.xlu1 %v5102_v17, %s4871_s21  ;;  %1368 = vrot.lane.b32.xlu0 %v1111_v49, %s4871_s21 }
 0x41d   :  { %1370 = vrot.lane.b32.xlu1 %v1113_v51, %s4871_s21 }
 0x421   :  { %720 = vrot.lane.b32.xlu1 %v5065_v58, %s4872_s22 }
 0x46f   :  { %v575_v52 = vpop.permute.xlu0 %574 }
 0x470   :  { %4257 = vmatprep.subr.msk.mxu1 %vm576_vm2, %v575_v52 }
 0x471   :  { %4258 = vmatpush3.xpose.msk.msra.mxu1 %vm576_vm2, %v575_v52 }
 0x473   :  { %v832_v53 = vpop.permute.xlu0 %831  ;;  %v573_v55 = vpop.permute.xlu1 %572 }
 0x474   :  { %4259 = vmatprep.subr.msk.mxu1 %vm576_vm2, %v573_v55 }
 0x475   :  { %4260 = vmatpush3.xpose.msk.msra.mxu1 %vm576_vm2, %v573_v55 }
 0x476   :  { %4277 = vmatprep.subr.msk.mxu1 %vm576_vm2, %v832_v53 }
 0x477   :  { %v822_v56 = vpop.permute.xlu0 %821  ;;  %v824_v57 = vpop.permute.xlu1 %823 }
 0x478   :  { %4262 = vmatmul.mubr.msk.f32.vlgmr.msra.gmra.mxu1 %vm576_vm2, %v5097_v10 }
 0x479   :  { %4264 = vmatprep.mubr.msk.f32.mxu1 %vm576_vm2, %v567_v44  ;;  %4278 = vmatpush3.xpose.msk.msra.mxu1 %vm576_vm2, %v832_v53 }
 0x47b   :  { %v1119_v59 = vpop.permute.xlu0 %1118  ;;  %v830_v60 = vpop.permute.xlu1 %829 }
 0x47c   :  { %4265 = vmatmul.mubr.msk.f32.gmra.mxu1 %vm576_vm2, %v569_v45  ;;  %4279 = vmatprep.subr.msk.mxu1 %vm576_vm2, %v830_v60 }
 0x47d   :  { %4280 = vmatpush3.xpose.msk.msra.mxu1 %vm576_vm2, %v830_v60  ;;  %4281 = vmatprep.mubr.msk.f32.mxu1 %vm576_vm2, %v822_v56 }
 0x47e   :  { %4297 = vmatprep.subr.msk.mxu1 %vm576_vm2, %v1119_v59 }
 0x47f   :  { %v828_v61 = vpop.permute.xlu0 %827  ;;  %v826_v62 = vpop.permute.xlu1 %825 }
 0x480   :  { %4282 = vmatmul.mubr.msk.f32.vlgmr.msra.gmra.mxu1 %vm576_vm2, %v824_v57 }
 0x481   :  { %4284 = vmatprep.mubr.msk.f32.mxu1 %vm576_vm2, %v826_v62  ;;  %4298 = vmatpush3.xpose.msk.msra.mxu1 %vm576_vm2, %v1119_v59 }
 0x483   :  { %v1117_v63 = vpop.permute.xlu1 %1116  ;;  %v1375_v0 = vpop.permute.xlu0 %1374 }
 0x484   :  { %4285 = vmatmul.mubr.msk.f32.gmra.mxu1 %vm576_vm2, %v828_v61  ;;  %4299 = vmatprep.subr.msk.mxu1 %vm576_vm2, %v1117_v63 }
 0x485   :  { %4300 = vmatpush3.xpose.msk.msra.mxu1 %vm576_vm2, %v1117_v63  ;;  %4301 = vmatprep.mubr.msk.f32.mxu1 %vm576_vm2, %v5106_v19 }
 0x486   :  { %4317 = vmatprep.subr.msk.mxu1 %vm576_vm2, %v1375_v0 }
 0x487   :  { %v1373_v1 = vpop.permute.xlu1 %1372  ;;  %v1365_v3 = vpop.permute.xlu0 %1364 }
 0x488   :  { %4302 = vmatmul.mubr.msk.f32.vlgmr.msra.gmra.mxu1 %vm576_vm2, %v5102_v17 }
 0x489   :  { %4304 = vmatprep.mubr.msk.f32.mxu1 %vm576_vm2, %v1111_v49  ;;  %4318 = vmatpush3.xpose.msk.msra.mxu1 %vm576_vm2, %v1375_v0 }
 0x48a   :  { %4319 = vmatprep.subr.msk.mxu1 %vm576_vm2, %v1373_v1 }
 0x48b   :  { %v1367_v5 = vpop.permute.xlu1 %1366  ;;  %v1369_v7 = vpop.permute.xlu0 %1368 }
 0x48c   :  { %4305 = vmatmul.mubr.msk.f32.gmra.mxu1 %vm576_vm2, %v1113_v51 }
 0x48d   :  { %4320 = vmatpush3.xpose.msk.msra.mxu1 %vm576_vm2, %v1373_v1  ;;  %4321 = vmatprep.mubr.msk.f32.mxu1 %vm576_vm2, %v1365_v3 }
 0x48e   :  { %4337 = vmatprep.subr.bf16.mxu1 %v4557_v2 }
 0x48f   :  { %v1371_v6 = vpop.permute.xlu1 %1370 }
 0x490   :  { %4322 = vmatmul.mubr.msk.f32.vlgmr.msra.gmra.mxu1 %vm576_vm2, %v1367_v5 }
 0x491   :  { %4324 = vmatprep.mubr.msk.f32.mxu1 %vm576_vm2, %v1369_v7  ;;  %4338 = vmatpush3.bf16.msra.mxu1 %v4557_v2 }
 0x493   :  { %v721_v8 = vpop.permute.xlu1 %720 }
 0x494   :  { %4267 = vmatprep.subr.mxu0 %v721_v8  ;;  %4325 = vmatmul.mubr.msk.f32.gmra.mxu1 %vm576_vm2, %v1371_v6 }
 0x495   :  { %4268 = vmatpush3.msra.mxu0 %v721_v8 }
 0x538   :  { %v4263_v9 = vpop.f32.mrf.mxu1 }
 0x539   :  { %v677_v10 = vsel %vm576_vm2, %v4263_v9, -inf }
 0x53a   :  { %678 = vmax.xlane.f32.xlu1 %v677_v10  ;;  %v655_v11 = vpop.f32.mrf.mxu1 }
 0x53b   :  { %v674_v12 = vsel %vm576_vm2, %v655_v11, -inf }
 0x53c   :  { %675 = vmax.xlane.f32.xlu0 %v674_v12  ;;  %v4266_v13 = vpop.f32.mrf.mxu1 }
 0x53d   :  { %v683_v15 = vsel %vm576_vm2, %v4266_v13, -inf }
 0x53e   :  { %v5182_v14 = vpop.f32.mrf.mxu1 }
 0x53f   :  { %v680_v19 = vsel %vm576_vm2, %v5182_v14, -inf }
 0x540   :  { %684 = vmax.xlane.f32.xlu0 %v683_v15  ;;  %v4283_v16 = vpop.f32.mrf.mxu1 }
 0x541   :  { %v933_v17 = vsel %vm576_vm2, %v4283_v16, -inf }
 0x542   :  { %934 = vmax.xlane.f32.xlu1 %v933_v17  ;;  %v5186_v18 = vpop.f32.mrf.mxu1 }
 0x543   :  { %v930_v25 = vsel %vm576_vm2, %v5186_v18, -inf }
 0x544   :  { %681 = vmax.xlane.f32.xlu0 %v680_v19  ;;  %v4286_v20 = vpop.f32.mrf.mxu1 }
 0x545   :  { %v939_v21 = vsel %vm576_vm2, %v4286_v20, -inf }
 0x546   :  { %940 = vmax.xlane.f32.xlu1 %v939_v21  ;;  %v5191_v24 = vpop.f32.mrf.mxu1 }
 0x547   :  { %v936_v29 = vsel %vm576_vm2, %v5191_v24, -inf }
 0x548   :  { %931 = vmax.xlane.f32.xlu0 %v930_v25  ;;  %v4303_v26 = vpop.f32.mrf.mxu1 }
 0x549   :  { %v1220_v27 = vsel %vm576_vm2, %v4303_v26, -inf }
 0x54a   :  { %1221 = vmax.xlane.f32.xlu1 %v1220_v27  ;;  %v5196_v28 = vpop.f32.mrf.mxu1 }
 0x54b   :  { %v1217_v34 = vsel %vm576_vm2, %v5196_v28, -inf }
 0x54c   :  { %937 = vmax.xlane.f32.xlu0 %v936_v29  ;;  %v5200_v30 = vpop.f32.mrf.mxu1 }
 0x54d   :  { %v1226_v31 = vsel %vm576_vm2, %v5200_v30, -inf }
 0x54e   :  { %1227 = vmax.xlane.f32.xlu1 %v1226_v31  ;;  %v5204_v33 = vpop.f32.mrf.mxu1 }
 0x54f   :  { %v1223_v38 = vsel %vm576_vm2, %v5204_v33, -inf }
 0x550   :  { %1218 = vmax.xlane.f32.xlu0 %v1217_v34  ;;  %v5208_v35 = vpop.f32.mrf.mxu1 }
 0x551   :  { %v1476_v36 = vsel %vm576_vm2, %v5208_v35, -inf }
 0x552   :  { %1477 = vmax.xlane.f32.xlu1 %v1476_v36  ;;  %v5212_v37 = vpop.f32.mrf.mxu1 }
 0x553   :  { %v1473_v41 = vsel %vm576_vm2, %v5212_v37, -inf }
 0x554   :  { %1224 = vmax.xlane.f32.xlu0 %v1223_v38  ;;  %v5216_v39 = vpop.f32.mrf.mxu1 }
 0x555   :  { %v1482_v40 = vsel %vm576_vm2, %v5216_v39, -inf }
 0x556   :  { %1483 = vmax.xlane.f32.xlu1 %v1482_v40  ;;  %v5222_v32 = vpop.f32.mrf.mxu1 }
 0x557   :  { %v1479_v42 = vsel %vm576_vm2, %v5222_v32, -inf }
 0x558   :  { %1474 = vmax.xlane.f32.xlu0 %v1473_v41 }
 0x55c   :  { %1480 = vmax.xlane.f32.xlu0 %v1479_v42 }
 0x567   :  { %976 = vrot.lane.b32.xlu1 %v5065_v58, %s4873_s25 }
 0x572   :  { %718 = vrot.lane.b32.xlu0 %v5050_v50, %s4872_s22 }
 0x5c3   :  { %v679_v43 = vpop.xlane.xlu1 %678 }
 0x5c4   :  { %v687_v44 = vsub.f32 %v4263_v9, %v679_v43 }
 0x5c5   :  { %v676_v45 = vpop.xlane.xlu0 %675 }
 0x5c6   :  { %v692_v46 = vmul.f32 1.442695, %v687_v44  ;;  %v686_v48 = vsub.f32 %v655_v11, %v676_v45 }
 0x5c8   :  { %4615 = vpow2.f32 %v692_v46  ;;  %v690_v49 = vmul.f32 1.442695, %v686_v48 }
 0x5c9   :  { %v685_v51 = vpop.xlane.xlu0 %684 }
 0x5ca   :  { %4617 = vpow2.f32 %v690_v49  ;;  %v689_v52 = vsub.f32 %v4266_v13, %v685_v51 }
 0x5cb   :  { %v935_v53 = vpop.xlane.xlu1 %934 }
 0x5cc   :  { %v696_v55 = vmul.f32 1.442695, %v689_v52  ;;  %v943_v56 = vsub.f32 %v4283_v16, %v935_v53 }
 0x5cd   :  { %v682_v57 = vpop.xlane.xlu0 %681 }
 0x5ce   :  { %4619 = vpow2.f32 %v696_v55  ;;  %v948_v59 = vmul.f32 1.442695, %v943_v56  ;;  %v688_v58 = vsub.f32 %v5182_v14, %v682_v57 }
 0x5cf   :  { %v941_v60 = vpop.xlane.xlu1 %940 }
 0x5d0   :  { %4621 = vpow2.f32 %v948_v59  ;;  %v694_v61 = vmul.f32 1.442695, %v688_v58  ;;  %v945_v62 = vsub.f32 %v4286_v20, %v941_v60 }
 0x5d1   :  { %v932_v63 = vpop.xlane.xlu0 %931 }
 0x5d2   :  { %4623 = vpow2.f32 %v694_v61  ;;  %v952_v0 = vmul.f32 1.442695, %v945_v62  ;;  %v942_v1 = vsub.f32 %v5186_v18, %v932_v63 }
 0x5d3   :  { %v1222_v2 = vpop.xlane.xlu1 %1221 }
 0x5d4   :  { %4625 = vpow2.f32 %v952_v0  ;;  %v946_v3 = vmul.f32 1.442695, %v942_v1  ;;  %v1230_v5 = vsub.f32 %v4303_v26, %v1222_v2 }
 0x5d5   :  { %v5232_v6 = vpop.eup %4615  ;;  %v938_v7 = vpop.xlane.xlu0 %937 }
 0x5d6   :  { %4627 = vpow2.f32 %v946_v3  ;;  %v1235_v8 = vmul.f32 1.442695, %v1230_v5  ;;  %v944_v9 = vsub.f32 %v5191_v24, %v938_v7  ;;  %v701_v10 = vsel %vm576_vm2, %v5232_v6, 0.0 }
 0x5d7   :  { %v5237_v11 = vpop.eup %4617  ;;  %702 = vadd.xlane.f32.xlu1 %v701_v10  ;;  %v1228_v12 = vpop.xlane.xlu1 %1227 }
 0x5d8   :  { %4629 = vpow2.f32 %v1235_v8  ;;  %v950_v13 = vmul.f32 1.442695, %v944_v9  ;;  %v1232_v14 = vsub.f32 %v5200_v30, %v1228_v12  ;;  %v698_v15 = vsel %vm576_vm2, %v5237_v11, 0.0 }
 0x5d9   :  { %v1219_v16 = vpop.xlane.xlu0 %1218  ;;  %699 = vadd.xlane.f32.xlu0 %v698_v15 }
 0x5da   :  { %4631 = vpow2.f32 %v950_v13  ;;  %v1239_v17 = vmul.f32 1.442695, %v1232_v14  ;;  %v1229_v18 = vsub.f32 %v5196_v28, %v1219_v16 }
 0x5db   :  { %v5243_v19 = vpop.eup %4619  ;;  %v1478_v20 = vpop.xlane.xlu1 %1477 }
 0x5dc   :  { %4633 = vpow2.f32 %v1239_v17  ;;  %v1233_v21 = vmul.f32 1.442695, %v1229_v18  ;;  %v1486_v24 = vsub.f32 %v5208_v35, %v1478_v20  ;;  %v707_v25 = vsel %vm576_vm2, %v5243_v19, 0.0 }
 0x5dd   :  { %v5248_v26 = vpop.eup %4621  ;;  %v1225_v27 = vpop.xlane.xlu0 %1224  ;;  %708 = vadd.xlane.f32.xlu1 %v707_v25 }
 0x5de   :  { %4635 = vpow2.f32 %v1233_v21  ;;  %v1231_v29 = vsub.f32 %v5204_v33, %v1225_v27  ;;  %v1491_v28 = vmul.f32 1.442695, %v1486_v24  ;;  %v957_v35 = vsel %vm576_vm2, %v5248_v26, 0.0 }
 0x5df   :  { %v5251_v30 = vpop.eup %4623  ;;  %v1484_v38 = vpop.xlane.xlu1 %1483 }
 0x5e0   :  { %v1237_v31 = vmul.f32 1.442695, %v1231_v29  ;;  %v704_v34 = vsel %vm576_vm2, %v5251_v30, 0.0  ;;  %v1488_v42 = vsub.f32 %v5216_v39, %v1484_v38 }
 0x5e1   :  { %v5257_v36 = vpop.eup %4625  ;;  %v1475_v40 = vpop.xlane.xlu0 %1474  ;;  %705 = vadd.xlane.f32.xlu0 %v704_v34  ;;  %958 = vadd.xlane.f32.xlu1 %v957_v35 }
 0x5e2   :  { %4637 = vpow2.f32 %v1237_v31  ;;  %v1485_v41 = vsub.f32 %v5212_v37, %v1475_v40  ;;  %v963_v45 = vsel %vm576_vm2, %v5257_v36, 0.0  ;;  %v1495_v37 = vmul.f32 1.442695, %v1488_v42 }
 0x5e3   :  { %v5260_v33 = vpop.eup %4627  ;;  %4639 = vpow2.f32 %v1491_v28  ;;  %v977_v56 = vpop.permute.xlu1 %976 }
 0x5e4   :  { %v1489_v43 = vmul.f32 1.442695, %v1485_v41  ;;  %v954_v44 = vsel %vm576_vm2, %v5260_v33, 0.0 }
 0x5e5   :  { %v5267_v46 = vpop.eup %4629  ;;  %955 = vadd.xlane.f32.xlu0 %v954_v44  ;;  %v1481_v48 = vpop.xlane.xlu0 %1480  ;;  %964 = vadd.xlane.f32.xlu1 %v963_v45 }
 0x5e6   :  { %4641 = vpow2.f32 %v1489_v43  ;;  %v1244_v39 = vsel %vm576_vm2, %v5267_v46, 0.0  ;;  %v1487_v3 = vsub.f32 %v5222_v32, %v1481_v48 }
 0x5e7   :  { %v5269_v49 = vpop.eup %4631  ;;  %4643 = vpow2.f32 %v1495_v37 }
 0x5e8   :  { %v960_v51 = vsel %vm576_vm2, %v5269_v49, 0.0  ;;  %v1493_v5 = vmul.f32 1.442695, %v1487_v3 }
 0x5e9   :  { %v5275_v52 = vpop.eup %4633  ;;  %961 = vadd.xlane.f32.xlu0 %v960_v51  ;;  %v719_v53 = vpop.permute.xlu0 %718  ;;  %1245 = vadd.xlane.f32.xlu1 %v1244_v39 }
 0x5ea   :  { %4269 = vmatprep.subr.mxu0 %v719_v53  ;;  %v1250_v59 = vsel %vm576_vm2, %v5275_v52, 0.0  ;;  %4645 = vpow2.f32 %v1493_v5 }
 0x5eb   :  { %v5277_v55 = vpop.eup %4635  ;;  %4270 = vmatpush3.msra.mxu0 %v719_v53 }
 0x5ec   :  { %4287 = vmatprep.subr.mxu0 %v977_v56  ;;  %v1241_v57 = vsel %vm576_vm2, %v5277_v55, 0.0 }
 0x5ed   :  { %1242 = vadd.xlane.f32.xlu0 %v1241_v57  ;;  %1251 = vadd.xlane.f32.xlu1 %v1250_v59 }
 0x5ef   :  { %v5283_v58 = vpop.eup %4637 }
 0x5f0   :  { %v5285_v60 = vpop.eup %4639  ;;  %v1247_v61 = vsel %vm576_vm2, %v5283_v58, 0.0 }
 0x5f1   :  { %1248 = vadd.xlane.f32.xlu0 %v1247_v61  ;;  %v1500_v62 = vsel %vm576_vm2, %v5285_v60, 0.0 }
 0x5f3   :  { %v5291_v63 = vpop.eup %4641 }
 0x5f4   :  { %v1497_v0 = vsel %vm576_vm2, %v5291_v63, 0.0  ;;  %v5295_v1 = vpop.eup %4643 }
 0x5f5   :  { %1501 = vadd.xlane.f32.xlu0 %v1500_v62  ;;  %v1506_v2 = vsel %vm576_vm2, %v5295_v1, 0.0 }
 0x5f7   :  { %v5308_v7 = vpop.eup %4645 }
 0x5f8   :  { %v1503_v8 = vsel %vm576_vm2, %v5308_v7, 0.0 }
 0x5f9   :  { %1498 = vadd.xlane.f32.xlu0 %v1497_v0 }
 0x5fd   :  { %1507 = vadd.xlane.f32.xlu0 %v1506_v2 }
 0x5fe   :  { %1263 = vrot.lane.b32.xlu1 %v5058_v54, %s4872_s22 }
 0x602   :  { %1261 = vrot.lane.b32.xlu1 %v5044_v47, %s4872_s22 }
 0x606   :  { %1519 = vrot.lane.b32.xlu1 %v5058_v54, %s4873_s25 }
 0x613   :  { %974 = vrot.lane.b32.xlu0 %v5050_v50, %s4873_s25 }
 0x62a   :  { %1504 = vadd.xlane.f32.xlu1 %v1503_v8 }
 0x63b   :  { %1517 = vrot.lane.b32.xlu1 %v5044_v47, %s4873_s25 }
 0x660   :  { %v703_v9 = vpop.xlane.xlu1 %702 }
 0x661   :  { %4647 = vrcp.f32 %v703_v9 }
 0x662   :  { %v700_v10 = vpop.xlane.xlu0 %699 }
 0x663   :  { %4649 = vrcp.f32 %v700_v10 }
 0x666   :  { %v709_v54 = vpop.xlane.xlu1 %708 }
 0x667   :  { %4651 = vrcp.f32 %v709_v54 }
 0x66a   :  { %v706_v32 = vpop.xlane.xlu0 %705  ;;  %v959_v50 = vpop.xlane.xlu1 %958 }
 0x66b   :  { %4653 = vrcp.f32 %v706_v32 }
 0x66e   :  { %v956_v12 = vpop.xlane.xlu0 %955  ;;  %v4648_v13 = vpop.eup %4647 }
 0x66f   :  { %4655 = vrcp.f32 %v956_v12  ;;  %v715_v16 = vmul.f32 %v4648_v13, %v5232_v6  ;;  %v965_v17 = vpop.xlane.xlu1 %964 }
 0x670   :  { %v4650_v14 = vpop.eup %4649  ;;  %4657 = vrcp.f32 %v959_v50 }
 0x671   :  { %v714_v15 = vmul.f32 %v4650_v14, %v5237_v11 }
 0x672   :  { %v962_v18 = vpop.xlane.xlu0 %961 }
 0x673   :  { %4271 = vmatprep.mubr.msk.f32.mxu0 %vm576_vm2, %v714_v15  ;;  %v1246_v24 = vpop.xlane.xlu1 %1245  ;;  %4659 = vrcp.f32 %v962_v18  ;;  %v4564_v15 = vld [vmem:[%s6027_s6 + $0x24] ss:$8 sps:$4 sm:$0xff]  }
 0x674   :  { %4272 = vmatmul.mubr.msk.f32.vlgmr.msra.gmra.mxu0 %vm576_vm2, %v715_v16  ;;  %v4652_v20 = vpop.eup %4651  ;;  %4661 = vrcp.f32 %v965_v17  ;;  %v4565_v16 = vld [vmem:[%s6027_s6 + $0x14] ss:$8 sps:$4 sm:$0xff]   ;;  %4339 = vmatprep.subr.bf16.mxu1 %v4564_v15 }
 0x675   :  { %4288 = vmatpush3.msra.mxu0 %v977_v56  ;;  %v717_v29 = vmul.f32 %v4652_v20, %v5243_v19  ;;  %4340 = vmatpush3.bf16.msra.mxu1 %v4564_v15  ;;  %v4566_v20 = vld [vmem:[%s6027_s6 + $0x4] ss:$8 sps:$4 sm:$0xff]  }
 0x676   :  { %v1243_v47 = vpop.xlane.xlu0 %1242  ;;  %4341 = vmatprep.subr.bf16.mxu1 %v4565_v16 }
 0x677   :  { %v1252_v28 = vpop.xlane.xlu1 %1251  ;;  %4663 = vrcp.f32 %v1243_v47 }
 0x678   :  { %v4654_v21 = vpop.eup %4653  ;;  %4665 = vrcp.f32 %v1246_v24 }
 0x679   :  { %v716_v25 = vmul.f32 %v4654_v21, %v5251_v30  ;;  %4342 = vmatpush3.bf16.msra.mxu1 %v4565_v16  ;;  %v5397_v16 = vld [vmem:[%s6023_s2 + $0x68] sm:$0xff] }
 0x67a   :  { %v1249_v27 = vpop.xlane.xlu0 %1248  ;;  %4343 = vmatprep.subr.bf16.mxu1 %v4566_v20 }
 0x67b   :  { %4274 = vmatprep.mubr.msk.f32.mxu0 %vm576_vm2, %v716_v25  ;;  %4667 = vrcp.f32 %v1249_v27  ;;  %v1264_v30 = vpop.permute.xlu1 %1263 }
 0x67c   :  { %v4656_v6 = vpop.eup %4655  ;;  %4275 = vmatmul.mubr.msk.f32.gmra.mxu0 %vm576_vm2, %v717_v29  ;;  %4669 = vrcp.f32 %v1252_v28 }
 0x67d   :  { %v970_v11 = vmul.f32 %v4656_v6, %v5260_v33  ;;  %v4658_v35 = vpop.eup %4657  ;;  %4344 = vmatpush3.bf16.msra.mxu1 %v4566_v20 }
 0x67e   :  { %v1502_v31 = vpop.xlane.xlu0 %1501  ;;  %v971_v42 = vmul.f32 %v4658_v35, %v5248_v26 }
 0x67f   :  { %4291 = vmatprep.mubr.msk.f32.mxu0 %vm576_vm2, %v970_v11  ;;  %v1262_v40 = vpop.permute.xlu1 %1261 }
 0x680   :  { %v4660_v38 = vpop.eup %4659 }
 0x681   :  { %v4662_v33 = vpop.eup %4661  ;;  %v972_v43 = vmul.f32 %v4660_v38, %v5269_v49 }
 0x682   :  { %v1499_v34 = vpop.xlane.xlu0 %1498  ;;  %v973_v45 = vmul.f32 %v4662_v33, %v5257_v36 }
 0x683   :  { %4671 = vrcp.f32 %v1499_v34  ;;  %v1520_v37 = vpop.permute.xlu1 %1519 }
 0x684   :  { %v4664_v44 = vpop.eup %4663  ;;  %4673 = vrcp.f32 %v1502_v31 }
 0x685   :  { %v4666_v48 = vpop.eup %4665  ;;  %v1257_v26 = vmul.f32 %v4664_v44, %v5277_v55 }
 0x686   :  { %v1508_v19 = vpop.xlane.xlu0 %1507  ;;  %v1258_v49 = vmul.f32 %v4666_v48, %v5267_v46 }
 0x687   :  { %4675 = vrcp.f32 %v1508_v19 }
 0x688   :  { %v4668_v51 = vpop.eup %4667 }
 0x689   :  { %v4670_v39 = vpop.eup %4669  ;;  %v1259_v53 = vmul.f32 %v4668_v51, %v5283_v58 }
 0x68a   :  { %v975_v41 = vpop.permute.xlu0 %974  ;;  %v1260_v36 = vmul.f32 %v4670_v39, %v5275_v52 }
 0x68b   :  { %4289 = vmatprep.subr.mxu0 %v975_v41 }
 0x68c   :  { %4290 = vmatpush3.msra.mxu0 %v975_v41 }
 0x68d   :  { %4292 = vmatmul.mubr.msk.f32.vlgmr.msra.gmra.mxu0 %vm576_vm2, %v971_v42  ;;  %4307 = vmatprep.subr.mxu0 %v1264_v30 }
 0x68e   :  { %4294 = vmatprep.mubr.msk.f32.mxu0 %vm576_vm2, %v972_v43  ;;  %4308 = vmatpush3.msra.mxu0 %v1264_v30 }
 0x68f   :  { %4309 = vmatprep.subr.mxu0 %v1262_v40 }
 0x690   :  { %4310 = vmatpush3.msra.mxu0 %v1262_v40  ;;  %v4672_v56 = vpop.eup %4671 }
 0x691   :  { %4295 = vmatmul.mubr.msk.f32.gmra.mxu0 %vm576_vm2, %v973_v45  ;;  %4327 = vmatprep.subr.mxu0 %v1520_v37  ;;  %v1513_v55 = vmul.f32 %v4672_v56, %v5291_v63  ;;  %v4674_v57 = vpop.eup %4673 }
 0x692   :  { %4311 = vmatprep.mubr.msk.f32.mxu0 %vm576_vm2, %v1257_v26  ;;  %v1514_v58 = vmul.f32 %v4674_v57, %v5285_v60 }
 0x694   :  { %v4676_v61 = vpop.eup %4675 }
 0x695   :  { %4312 = vmatmul.mubr.msk.f32.vlgmr.msra.gmra.mxu0 %vm576_vm2, %v1258_v49  ;;  %v1516_v63 = vmul.f32 %v4676_v61, %v5295_v1  ;;  %v1725_v61 = vsub.s32 4, %v4957_v22 }
 0x696   :  { %4328 = vmatpush3.msra.mxu0 %v1520_v37  ;;  %4314 = vmatprep.mubr.msk.f32.mxu0 %vm576_vm2, %v1259_v53 }
 0x699   :  { %4315 = vmatmul.mubr.msk.f32.gmra.mxu0 %vm576_vm2, %v1260_v36 }
 0x69a   :  { %4331 = vmatprep.mubr.msk.f32.mxu0 %vm576_vm2, %v1513_v55 }
 0x6b3   :  { %v1505_v46 = vpop.xlane.xlu1 %1504 }
 0x6b4   :  { %4677 = vrcp.f32 %v1505_v46 }
 0x6b7   :  { %v1518_v59 = vpop.permute.xlu1 %1517 }
 0x6b8   :  { %4329 = vmatprep.subr.mxu0 %v1518_v59 }
 0x6b9   :  { %4330 = vmatpush3.msra.mxu0 %v1518_v59 }
 0x6ba   :  { %4332 = vmatmul.mubr.msk.f32.vlgmr.msra.gmra.mxu0 %vm576_vm2, %v1514_v58 }
 0x6c1   :  { %v4678_v52 = vpop.eup %4677 }
 0x6c2   :  { %v1515_v62 = vmul.f32 %v4678_v52, %v5308_v7  ;;  %v5379_v52 = vld [vmem:[%s6026_s5 + $0x8] sm:$0xff] }
 0x6c4   :  { %4334 = vmatprep.mubr.msk.f32.mxu0 %vm576_vm2, %v1515_v62  ;;  %v1726_v62 = vrot.slane %v5379_v52, %v1725_v61 }
 0x6c5   :  { %4335 = vmatmul.mubr.msk.f32.gmra.mxu0 %vm576_vm2, %v1516_v63 }
 0x734   :  { %v4273_v0 = vpop.f32.mrf.mxu0 }
 0x736   :  { %v802_v2 = vpop.f32.mrf.mxu0 }
 0x73c   :  { %v4276_v3 = vpop.f32.mrf.mxu0 }
 0x73e   :  { %v812_v5 = vpop.f32.mrf.mxu0 }
 0x73f   :  { %v4495_v8 = vpack.i.bf16 %v4276_v3, %v812_v5 }
 0x741   :  { %4496 = vrot.lane.b32.xlu0 %v4495_v8, %s4873_s25 }
 0x74d   :  { %v4293_v60 = vpop.f32.mrf.mxu0 }
 0x74f   :  { %v1058_v9 = vpop.f32.mrf.mxu0 }
 0x750   :  { %v4500_v10 = vpack.i.bf16 %v4293_v60, %v1058_v9 }
 0x751   :  { %v4296_v54 = vpop.f32.mrf.mxu0 }
 0x752   :  { %4501 = vrot.lane.b32.xlu1 %v4500_v10, %s4872_s22 }
 0x753   :  { %v1068_v7 = vpop.f32.mrf.mxu0 }
 0x754   :  { %v4505_v32 = vpack.i.bf16 %v4296_v54, %v1068_v7 }
 0x755   :  { %v4313_v1 = vpop.f32.mrf.mxu0 }
 0x756   :  { %4506 = vrot.lane.b32.xlu1 %v4505_v32, %s4870_s3 }
 0x757   :  { %v1345_v50 = vpop.f32.mrf.mxu0 }
 0x759   :  { %v4316_v12 = vpop.f32.mrf.mxu0 }
 0x75b   :  { %v1355_v13 = vpop.f32.mrf.mxu0 }
 0x75c   :  { %v4510_v14 = vpack.i.bf16 %v4316_v12, %v1355_v13 }
 0x75e   :  { %4511 = vrot.lane.b32.xlu0 %v4510_v14, %s4873_s25  ;;  %v5391_v14 = vld [vmem:[%s6023_s2 + $0x38] sm:$0xff] }
 0x75f   :  { %v1812_v15 = vadd.f32 1.0, %v5391_v14 }
 0x77a   :  { %v4333_v17 = vpop.f32.mrf.mxu0 }
 0x77c   :  { %v1601_v18 = vpop.f32.mrf.mxu0 }
 0x77d   :  { %v4515_v47 = vpack.i.bf16 %v4333_v17, %v1601_v18  ;;  %v1813_v17 = vadd.f32 1.0, %v5397_v16 }
 0x77f   :  { %4516 = vrot.lane.b32.xlu0 %v4515_v47, %s4872_s22 }
 0x785   :  { %v4336_v21 = vpop.f32.mrf.mxu0 }
 0x787   :  { %v1611_v24 = vpop.f32.mrf.mxu0 }
 0x788   :  { %v4520_v25 = vpack.i.bf16 %v4336_v21, %v1611_v24 }
 0x78a   :  { %4521 = vrot.lane.b32.xlu1 %v4520_v25, %s4870_s3 }
 0x7b3   :  { %v4497_v27 = vpop.permute.xlu0 %4496 }
 0x7b4   :  { %v4499_v6 = vunpack.i.h.bf16 %v4497_v27  ;;  %v4498_v11 = vunpack.i.l.bf16 %v4497_v27 }
 0x7b6   :  { %v1102_v30 = vsel %vm576_vm2, %v4273_v0, %v4499_v6  ;;  %v1101_v19 = vsel %vm576_vm2, %v802_v2, %v4498_v11 }
 0x7c4   :  { %v4502_v29 = vpop.permute.xlu1 %4501 }
 0x7c5   :  { %v4504_v28 = vunpack.i.h.bf16 %v4502_v29  ;;  %v4503_v31 = vunpack.i.l.bf16 %v4502_v29 }
 0x7c7   :  { %v1104_v40 = vsel %vm446_vm1, %v1102_v30, %v4504_v28  ;;  %v1103_v41 = vsel %vm446_vm1, %v1101_v19, %v4503_v31  ;;  %v5406_v30 = vld [vmem:[%s6026_s5] sm:$0xff] }
 0x7c8   :  { %v4507_v34 = vpop.permute.xlu1 %4506 }
 0x7c9   :  { %v4509_v35 = vunpack.i.h.bf16 %v4507_v34  ;;  %v4508_v38 = vunpack.i.l.bf16 %v4507_v34  ;;  %v1765_v34 = vsub.s32 1, %v4957_v22 }
 0x7cb   :  { %v1106_v42 = vsel %vm1105_vm3, %v1103_v41, %v4508_v38  ;;  %v1107_v33 = vsel %vm1105_vm3, %v1104_v40, %v4509_v35  ;;  %v1766_v19 = vrot.slane %v5406_v30, %v1765_v34 }
 0x7cc   :  { %v1650_v43 = vpack.c.bf16 %v1107_v33, %v1106_v42 }
 0x7ce   :  { %4345 = vmatprep.mubr.msk.bf16.mxu1 %vm114_vm0, %v1650_v43 }
 0x7d0   :  { %v4512_v44 = vpop.permute.xlu0 %4511 }
 0x7d1   :  { %v4514_v48 = vunpack.i.h.bf16 %v4512_v44  ;;  %v4513_v37 = vunpack.i.l.bf16 %v4512_v44 }
 0x7d3   :  { %v1645_v39 = vsel %vm576_vm2, %v4313_v1, %v4514_v48  ;;  %v1644_v53 = vsel %vm576_vm2, %v1345_v50, %v4513_v37 }
 0x7f1   :  { %v4517_v45 = vpop.permute.xlu0 %4516 }
 0x7f2   :  { %v4519_v26 = vunpack.i.h.bf16 %v4517_v45  ;;  %v4518_v51 = vunpack.i.l.bf16 %v4517_v45 }
 0x7f4   :  { %v1647_v55 = vsel %vm446_vm1, %v1645_v39, %v4519_v26  ;;  %v1646_v46 = vsel %vm446_vm1, %v1644_v53, %v4518_v51 }
 0x7fc   :  { %v4522_v49 = vpop.permute.xlu1 %4521 }
 0x7fd   :  { %v4524_v56 = vunpack.i.h.bf16 %v4522_v49  ;;  %v4523_v36 = vunpack.i.l.bf16 %v4522_v49 }
 0x7ff   :  { %v1649_v57 = vsel %vm1105_vm3, %v1647_v55, %v4524_v56  ;;  %v1648_v59 = vsel %vm1105_vm3, %v1646_v46, %v4523_v36 }
 0x800   :  { %v1651_v58 = vpack.c.bf16 %v1649_v57, %v1648_v59  ;;  %v47_v57 = vld [vmem:[%s6023_s2 + $0x8] sm:$0xff] }
 0x801   :  { %v1811_v59 = vadd.f32 1.0, %v47_v57 }
 0x802   :  { %4346 = vmatmul.mubr.msk.bf16.vlgmr.msra.gmra.mxu1 %vm114_vm0, %v1651_v58  ;;  %v65_v58 = vld [vmem:[%s6023_s2 + $0x98] sm:$0xff] }
 0x8c2   :  { %v4347_v63 = vpop.f32.mrf.mxu1 }
 0x8c3   :  { %v1729_v2 = vmul.f32 %v4347_v63, %v1726_v62  ;;  %v108_v63 = vld [vmem:[%s6029_s8 + $0x18] sm:$0xff] }
 0x8c4   :  { %v1708_v0 = vpop.f32.mrf.mxu1  ;;  %4349 = vmatprep.subr.mxu0 %v108_v63 }
 0x8c5   :  { %v1727_v3 = vmul.f32 %v1726_v62, %v1708_v0  ;;  %v1733_v7 = vmul.f32 %v1729_v2, %v1729_v2  ;;  %4350 = vmatpush3.msra.mxu0 %v108_v63  ;;  %v107_v0 = vld [vmem:[%s6029_s8 + $0x10] sm:$0xff] }
 0x8c6   :  { %v4348_v5 = vpop.f32.mrf.mxu1  ;;  %4351 = vmatprep.subr.mxu0 %v107_v0 }
 0x8c7   :  { %v1731_v8 = vmul.f32 %v1727_v3, %v1727_v3  ;;  %v1730_v9 = vmul.f32 %v4348_v5, %v1726_v62  ;;  %v1741_v1 = vsel %vm114_vm0, %v1733_v7, 0.0  ;;  %4352 = vmatpush3.msra.mxu0 %v107_v0  ;;  %v44_v0 = vld [vmem:[%s6022_s1] sm:$0xff] }
 0x8c8   :  { %v1711_v60 = vpop.f32.mrf.mxu1  ;;  %4357 = vmatprep.mubr.msk.f32.mxu0 %vm446_vm1, %v44_v0 }
 0x8c9   :  { %v1728_v10 = vmul.f32 %v1726_v62, %v1711_v60  ;;  %v1735_v54 = vsel %vm114_vm0, %v1731_v8, 0.0  ;;  %v1734_v12 = vmul.f32 %v1730_v9, %v1730_v9  ;;  %v1814_v62 = vadd.f32 1.0, %v65_v58 }
 0x8ca   :  { %1736 = vadd.xlane.f32.xlu0 %v1735_v54 }
 0x8cb   :  { %v1732_v32 = vmul.f32 %v1728_v10, %v1728_v10  ;;  %v1744_v13 = vsel %vm114_vm0, %v1734_v12, 0.0 }
 0x8cd   :  { %v1738_v50 = vsel %vm114_vm0, %v1732_v32, 0.0 }
 0x8ce   :  { %1742 = vadd.xlane.f32.xlu0 %v1741_v1  ;;  %1739 = vadd.xlane.f32.xlu1 %v1738_v50 }
 0x8d2   :  { %1745 = vadd.xlane.f32.xlu0 %v1744_v13 }
 0x8df   :  { %1821 = vrot.lane.b32.xlu1 %v1812_v15, %s4868_s14 }
 0x8e3   :  { %1823 = vrot.lane.b32.xlu1 %v1813_v17, %s4868_s14  ;;  %v1805_v17 = vsub.s32 7, %v4957_v22 }
 0x953   :  { %v1737_v18 = vpop.xlane.xlu0 %1736 }
 0x954   :  { %v1747_v47 = vmul.f32 0.015625, %v1737_v18 }
 0x956   :  { %v1751_v20 = vadd.f32 1e-06, %v1747_v47  ;;  %v1806_v47 = vrot.slane %v5406_v30, %v1805_v17 }
 0x957   :  { %v1743_v21 = vpop.xlane.xlu0 %1742  ;;  %v1740_v24 = vpop.xlane.xlu1 %1739 }
 0x958   :  { %4679 = vrsqrt.f32 %v1751_v20  ;;  %v1749_v25 = vmul.f32 0.015625, %v1743_v21  ;;  %v1748_v27 = vmul.f32 0.015625, %v1740_v24 }
 0x95a   :  { %v1753_v29 = vadd.f32 1e-06, %v1749_v25  ;;  %v1752_v6 = vadd.f32 1e-06, %v1748_v27 }
 0x95b   :  { %v1746_v11 = vpop.xlane.xlu0 %1745  ;;  %v1822_v5 = vpop.permute.xlu1 %1821 }
 0x95c   :  { %4681 = vrsqrt.f32 %v1753_v29  ;;  %v1750_v28 = vmul.f32 0.015625, %v1746_v11 }
 0x95d   :  { %4683 = vrsqrt.f32 %v1752_v6 }
 0x95e   :  { %v1754_v31 = vadd.f32 1e-06, %v1750_v28 }
 0x960   :  { %4685 = vrsqrt.f32 %v1754_v31 }
 0x965   :  { %v4680_v35 = vpop.eup %4679 }
 0x966   :  { %v1759_v38 = vmul.f32 %v4680_v35, %v1727_v3  ;;  %v105_v3 = vld [vmem:[%s6029_s8] sm:$0xff] }
 0x968   :  { %v1767_v40 = vmul.f32 %v1766_v19, %v1759_v38 }
 0x969   :  { %v4682_v41 = vpop.eup %4681 }
 0x96a   :  { %v4684_v42 = vpop.eup %4683  ;;  %v1771_v33 = vmul.f32 %v1767_v40, %v1767_v40  ;;  %v1761_v43 = vmul.f32 %v4682_v41, %v1729_v2  ;;  %v106_v2 = vld [vmem:[%s6029_s8 + $0x8] sm:$0xff] }
 0x96b   :  { %v1760_v48 = vmul.f32 %v4684_v42, %v1728_v10  ;;  %4353 = vmatprep.subr.mxu0 %v106_v2  ;;  %v1824_v10 = vpop.permute.xlu1 %1823 }
 0x96c   :  { %v1775_v44 = vsel %vm114_vm0, %v1771_v33, 0.0  ;;  %v1769_v45 = vmul.f32 %v1766_v19, %v1761_v43  ;;  %4354 = vmatpush3.msra.mxu0 %v106_v2 }
 0x96d   :  { %v4686_v37 = vpop.eup %4685  ;;  %1776 = vadd.xlane.f32.xlu0 %v1775_v44  ;;  %v5413_v53 = vmul.f32 %v1766_v19, %v1760_v48  ;;  %4355 = vmatprep.subr.mxu0 %v105_v3 }
 0x96e   :  { %v1773_v26 = vmul.f32 %v1769_v45, %v1769_v45  ;;  %v1762_v51 = vmul.f32 %v4686_v37, %v1730_v9  ;;  %4356 = vmatpush3.msra.mxu0 %v105_v3  ;;  %v4841_v37 = vld [vmem:[%s6021_s0 + $0x10] sm:$0xff] }
 0x96f   :  { %v1772_v55 = vmul.f32 %v5413_v53, %v5413_v53  ;;  %v5487_v3 = vld [vmem:[%s6023_s2 + $0x10] sm:$0xff] }
 0x970   :  { %v1781_v49 = vsel %vm114_vm0, %v1773_v26, 0.0  ;;  %v1770_v39 = vmul.f32 %v1766_v19, %v1762_v51  ;;  %v4840_v19 = vld [vmem:[%s6021_s0] sm:$0xff] }
 0x971   :  { %1782 = vadd.xlane.f32.xlu0 %v1781_v49  ;;  %v1778_v46 = vsel %vm114_vm0, %v1772_v55, 0.0 }
 0x972   :  { %v1774_v56 = vmul.f32 %v1770_v39, %v1770_v39 }
 0x974   :  { %v1784_v36 = vsel %vm114_vm0, %v1774_v56, 0.0 }
 0x975   :  { %1785 = vadd.xlane.f32.xlu1 %v1784_v36 }
 0x979   :  { %1779 = vadd.xlane.f32.xlu1 %v1778_v46 }
 0x987   :  { %1819 = vrot.lane.b32.xlu0 %v1811_v59, %s4868_s14 }
 0x98a   :  { %1825 = vrot.lane.b32.xlu1 %v1814_v62, %s4868_s14 }
 0x9f6   :  { %v1777_v8 = vpop.xlane.xlu0 %1776 }
 0x9f7   :  { %v1787_v60 = vmul.f32 0.015625, %v1777_v8  ;;  %v5493_v8 = vld [vmem:[%s6023_s2 + $0x40] sm:$0xff] }
 0x9f9   :  { %v1791_v9 = vadd.f32 1e-06, %v1787_v60  ;;  %v1924_v60 = vadd.f32 1.0, %v5493_v8 }
 0x9fa   :  { %v1783_v54 = vpop.xlane.xlu0 %1782 }
 0x9fb   :  { %4687 = vrsqrt.f32 %v1791_v9  ;;  %v1789_v7 = vmul.f32 0.015625, %v1783_v54  ;;  %v4567_v9 = vld [vmem:[%s6028_s7 + $0x20] ss:$8 sps:$4 sm:$0xff]   ;;  %v4571_v54 = vld [vmem:[%s6028_s7 + $0x10] ss:$8 sps:$4 sm:$0xff]  }
 0x9fd   :  { %v1793_v32 = vadd.f32 1e-06, %v1789_v7  ;;  %v4573_v7 = vld [vmem:[%s6028_s7] ss:$8 sps:$4 sm:$0xff]  }
 0x9fe   :  { %v1786_v1 = vpop.xlane.xlu1 %1785  ;;  %v1820_v24 = vpop.permute.xlu0 %1819 }
 0x9ff   :  { %4689 = vrsqrt.f32 %v1793_v32  ;;  %v1790_v50 = vmul.f32 0.015625, %v1786_v1 }
 0xa01   :  { %v1794_v12 = vadd.f32 1e-06, %v1790_v50 }
 0xa02   :  { %v1780_v13 = vpop.xlane.xlu1 %1779 }
 0xa03   :  { %4691 = vrsqrt.f32 %v1794_v12  ;;  %v1788_v15 = vmul.f32 0.015625, %v1780_v13 }
 0xa05   :  { %v1792_v18 = vadd.f32 1e-06, %v1788_v15 }
 0xa06   :  { %v1826_v42 = vpop.permute.xlu1 %1825 }
 0xa07   :  { %4693 = vrsqrt.f32 %v1792_v18 }
 0xa08   :  { %v4688_v20 = vpop.eup %4687 }
 0xa09   :  { %v1799_v21 = vmul.f32 %v4688_v20, %v1767_v40 }
 0xa0b   :  { %v1807_v25 = vmul.f32 %v1806_v47, %v1799_v21 }
 0xa0c   :  { %v4690_v27 = vpop.eup %4689 }
 0xa0d   :  { %v1831_v29 = vmul.f32 %v1820_v24, %v1807_v25  ;;  %v1801_v6 = vmul.f32 %v4690_v27, %v1769_v45  ;;  %v1877_v25 = vsub.s32 2, %v4957_v22 }
 0xa0f   :  { %v1835_v11 = vadd.f32 %v1831_v29, %v47_v57  ;;  %v1809_v28 = vmul.f32 %v1806_v47, %v1801_v6  ;;  %v1878_v29 = vrot.slane %v5406_v30, %v1877_v25 }
 0xa10   :  { %v4692_v31 = vpop.eup %4691 }
 0xa11   :  { %v5444_v35 = vadd.f32 %v4840_v19, %v1835_v11  ;;  %v1802_v38 = vmul.f32 %v4692_v31, %v1770_v39  ;;  %v1833_v41 = vmul.f32 %v1824_v10, %v1809_v28  ;;  %v4569_v10 = vld [vmem:[%s6028_s7 + $0x30] ss:$8 sps:$4 sm:$0xff]  }
 0xa12   :  { %4360 = vmatprep.subr.bf16.mxu0 %v4569_v10 }
 0xa13   :  { %v1810_v33 = vmul.f32 %v1806_v47, %v1802_v38  ;;  %v1843_v40 = vmul.f32 %v5444_v35, %v5444_v35  ;;  %v1837_v43 = vadd.f32 %v1833_v41, %v5397_v16  ;;  %v4842_v16 = vld [vmem:[%s6021_s0 + $0x18] sm:$0xff] }
 0xa14   :  { %v4694_v44 = vpop.eup %4693 }
 0xa15   :  { %v1834_v45 = vmul.f32 %v1826_v42, %v1810_v33  ;;  %v1847_v48 = vsel %vm114_vm0, %v1843_v40, 0.0  ;;  %v5453_v26 = vadd.f32 %v4841_v37, %v1837_v43  ;;  %v1800_v51 = vmul.f32 %v4694_v44, %v5413_v53 }
 0xa16   :  { %1848 = vadd.xlane.f32.xlu0 %v1847_v48 }
 0xa17   :  { %v1838_v49 = vadd.f32 %v1834_v45, %v65_v58  ;;  %v1845_v39 = vmul.f32 %v5453_v26, %v5453_v26  ;;  %v1808_v56 = vmul.f32 %v1806_v47, %v1800_v51  ;;  %v4843_v58 = vld [vmem:[%s6021_s0 + $0x8] sm:$0xff] }
 0xa19   :  { %v5461_v36 = vadd.f32 %v4842_v16, %v1838_v49  ;;  %v1853_v55 = vsel %vm114_vm0, %v1845_v39, 0.0  ;;  %v1832_v46 = vmul.f32 %v1822_v5, %v1808_v56  ;;  %v1923_v5 = vadd.f32 1.0, %v5487_v3  ;;  %v5542_v56 = vld [vmem:[%s6023_s2 + $0xa0] sm:$0xff] }
 0xa1a   :  { %1854 = vadd.xlane.f32.xlu0 %v1853_v55  ;;  %v4874_v16 = vmov 0.0   ;;  %v1926_v55 = vadd.f32 1.0, %v5542_v56 }
 0xa1b   :  { %v1846_v57 = vmul.f32 %v5461_v36, %v5461_v36  ;;  %v1836_v53 = vadd.f32 %v1832_v46, %v5391_v14  ;;  %v45_v14 = vld [vmem:[%s6022_s1 + $0x8] sm:$0xff]  ;;  %4372 = vmatprep.subr.bf16.mxu1 %v4874_v16  ;;  %v5548_v46 = vld [vmem:[%s6023_s2 + $0x70] sm:$0xff]  ;;  %4380 = vmatprep.mubr.msk.bf16.mxu1 %vm4875_vm4, %v4874_v16 }
 0xa1c   :  { %4358 = vmatmul.mubr.msk.f32.vlgmr.msra.gmra.mxu0 %vm446_vm1, %v45_v14 }
 0xa1d   :  { %v1856_v59 = vsel %vm114_vm0, %v1846_v57, 0.0  ;;  %v5471_v62 = vadd.f32 %v4843_v58, %v1836_v53  ;;  %4361 = vmatpush3.bf16.msra.mxu0 %v4569_v10  ;;  %v1925_v57 = vadd.f32 1.0, %v5548_v46 }
 0xa1e   :  { %1857 = vadd.xlane.f32.xlu0 %v1856_v59  ;;  %4362 = vmatprep.subr.bf16.mxu0 %v4567_v9 }
 0xa1f   :  { %v1844_v63 = vmul.f32 %v5471_v62, %v5471_v62 }
 0xa21   :  { %v1850_v2 = vsel %vm114_vm0, %v1844_v63, 0.0  ;;  %4363 = vmatpush3.bf16.msra.mxu0 %v4567_v9 }
 0xa22   :  { %1851 = vadd.xlane.f32.xlu1 %v1850_v2  ;;  %4364 = vmatprep.subr.bf16.mxu0 %v4571_v54 }
 0xa25   :  { %4365 = vmatpush3.bf16.msra.mxu0 %v4571_v54 }
 0xa26   :  { %4366 = vmatprep.subr.bf16.mxu0 %v4573_v7 }
 0xa29   :  { %4367 = vmatpush3.bf16.msra.mxu0 %v4573_v7 }
 0xa33   :  { %1931 = vrot.lane.b32.xlu1 %v1923_v5, %s4868_s14 }
 0xa37   :  { %1933 = vrot.lane.b32.xlu1 %v1924_v60, %s4868_s14 }
 0xa3b   :  { %2126 = vrot.lane.b32.xlu1 %v4567_v9, %s4868_s14 }
 0xa9f   :  { %v1849_v32 = vpop.xlane.xlu0 %1848 }
 0xaa0   :  { %v1859_v1 = vmul.f32 0.015625, %v1849_v32 }
 0xaa2   :  { %v1863_v50 = vadd.f32 1e-06, %v1859_v1 }
 0xaa3   :  { %v1855_v12 = vpop.xlane.xlu0 %1854 }
 0xaa4   :  { %4695 = vrsqrt.f32 %v1863_v50  ;;  %v1861_v13 = vmul.f32 0.015625, %v1855_v12 }
 0xaa6   :  { %v1865_v15 = vadd.f32 1e-06, %v1861_v13 }
 0xaa7   :  { %v1858_v17 = vpop.xlane.xlu0 %1857 }
 0xaa8   :  { %4697 = vrsqrt.f32 %v1865_v15  ;;  %v1862_v18 = vmul.f32 0.015625, %v1858_v17  ;;  %v3986_v17 = vld [vmem:[%s6029_s8 + $0x20] ss:$0 sm:$0xff]  ;;  %s4876_s8 = smov 80  }
 0xaaa   :  { %v1866_v47 = vadd.f32 1e-06, %v1862_v18 }
 0xaab   :  { %v1852_v20 = vpop.xlane.xlu1 %1851 }
 0xaac   :  { %4699 = vrsqrt.f32 %v1866_v47  ;;  %v1860_v21 = vmul.f32 0.015625, %v1852_v20 }
 0xaae   :  { %v1864_v24 = vadd.f32 1e-06, %v1860_v21 }
 0xaaf   :  { %v1932_v53 = vpop.permute.xlu1 %1931 }
 0xab0   :  { %4701 = vrsqrt.f32 %v1864_v24 }
 0xab1   :  { %v4696_v27 = vpop.eup %4695 }
 0xab2   :  { %v1871_v6 = vmul.f32 %v4696_v27, %v5444_v35 }
 0xab3   :  { %v1934_v59 = vpop.permute.xlu1 %1933 }
 0xab4   :  { %v5519_v19 = vmul.f32 %v1878_v29, %v1871_v6 }
 0xab5   :  { %v4698_v11 = vpop.eup %4697 }
 0xab6   :  { %v1873_v28 = vmul.f32 %v4698_v11, %v5453_v26  ;;  %v1883_v30 = vmul.f32 %v5519_v19, %v5519_v19 }
 0xab7   :  { %v2127_v58 = vpop.permute.xlu1 %2126 }
 0xab8   :  { %v5517_v31 = vmul.f32 %v1878_v29, %v1873_v28  ;;  %v1887_v48 = vsel %vm114_vm0, %v1883_v30, 0.0  ;;  %v1918_v28 = vrot.slane %v5379_v52, %v146_v23 }
 0xab9   :  { %v4700_v38 = vpop.eup %4699 }
 0xaba   :  { %v1885_v41 = vmul.f32 %v5517_v31, %v5517_v31  ;;  %v1874_v42 = vmul.f32 %v4700_v38, %v5461_v36 }
 0xabc   :  { %v1893_v33 = vsel %vm114_vm0, %v1885_v41, 0.0  ;;  %v5527_v40 = vmul.f32 %v1878_v29, %v1874_v42 }
 0xabd   :  { %v4702_v43 = vpop.eup %4701  ;;  %1894 = vadd.xlane.f32.xlu0 %v1893_v33 }
 0xabe   :  { %v1886_v44 = vmul.f32 %v5527_v40, %v5527_v40  ;;  %v1872_v45 = vmul.f32 %v4702_v43, %v5471_v62 }
 0xac0   :  { %v1896_v37 = vsel %vm114_vm0, %v1886_v44, 0.0  ;;  %v5534_v51 = vmul.f32 %v1878_v29, %v1872_v45 }
 0xac1   :  { %1888 = vadd.xlane.f32.xlu0 %v1887_v48  ;;  %1897 = vadd.xlane.f32.xlu1 %v1896_v37 }
 0xac2   :  { %v1884_v49 = vmul.f32 %v5534_v51, %v5534_v51 }
 0xac4   :  { %v1890_v39 = vsel %vm114_vm0, %v1884_v49, 0.0 }
 0xac5   :  { %1891 = vadd.xlane.f32.xlu1 %v1890_v39 }
 0xad6   :  { %1937 = vrot.lane.b32.xlu1 %v1926_v55, %s4868_s14 }
 0xad7   :  { %2128 = vrot.lane.b32.xlu0 %v4569_v10, %s4868_s14 }
 0xada   :  { %2122 = vrot.lane.b32.xlu1 %v4573_v7, %s4868_s14 }
 0xadb   :  { %1935 = vrot.lane.b32.xlu0 %v1925_v57, %s4868_s14 }
 0xadf   :  { %2124 = vrot.lane.b32.xlu0 %v4571_v54, %s4868_s14  ;;  %v4359_v54 = vpop.f32.mrf.mxu0 }
 0xae0   :  { %v2033_v20 = vadd.f32 %v4359_v54, %v3986_v17 }
 0xae1   :  { %v2027_v18 = vpop.f32.mrf.mxu0 }
 0xae2   :  { %v2028_v21 = vadd.f32 %v3986_v17, %v2027_v18 }
 0xae4   :  { %v2121_v29 = vpack.c.bf16 %v2033_v20, %v2028_v21 }
 0xb46   :  { %v1895_v63 = vpop.xlane.xlu0 %1894 }
 0xb47   :  { %v1901_v0 = vmul.f32 0.015625, %v1895_v63 }
 0xb49   :  { %v1905_v2 = vadd.f32 1e-06, %v1901_v0 }
 0xb4a   :  { %v1889_v14 = vpop.xlane.xlu0 %1888  ;;  %v1898_v5 = vpop.xlane.xlu1 %1897 }
 0xb4b   :  { %v1899_v60 = vmul.f32 0.015625, %v1889_v14  ;;  %v1902_v9 = vmul.f32 0.015625, %v1898_v5  ;;  %4703 = vrsqrt.f32 %v1905_v2 }
 0xb4d   :  { %v1903_v10 = vadd.f32 1e-06, %v1899_v60  ;;  %v1906_v32 = vadd.f32 1e-06, %v1902_v9 }
 0xb4e   :  { %v2129_v7 = vpop.permute.xlu0 %2128  ;;  %v1892_v1 = vpop.xlane.xlu1 %1891 }
 0xb4f   :  { %4705 = vrsqrt.f32 %v1903_v10  ;;  %v1900_v50 = vmul.f32 0.015625, %v1892_v1  ;;  %4373 = vmatpush3.bf16.msra.mxu1 %v2129_v7 }
 0xb50   :  { %4707 = vrsqrt.f32 %v1906_v32  ;;  %4374 = vmatprep.subr.bf16.mxu1 %v4874_v16 }
 0xb51   :  { %v1904_v12 = vadd.f32 1e-06, %v1900_v50 }
 0xb52   :  { %v1936_v13 = vpop.permute.xlu0 %1935  ;;  %v1938_v15 = vpop.permute.xlu1 %1937 }
 0xb53   :  { %4709 = vrsqrt.f32 %v1904_v12  ;;  %4375 = vmatpush3.bf16.msra.mxu1 %v2127_v58 }
 0xb54   :  { %4376 = vmatprep.subr.bf16.mxu1 %v4874_v16 }
 0xb56   :  { %v2125_v47 = vpop.permute.xlu0 %2124  ;;  %v2123_v24 = vpop.permute.xlu1 %2122 }
 0xb57   :  { %4377 = vmatpush3.bf16.msra.mxu1 %v2125_v47 }
 0xb58   :  { %4378 = vmatprep.subr.bf16.mxu1 %v4874_v16  ;;  %v4704_v27 = vpop.eup %4703 }
 0xb59   :  { %v1913_v11 = vmul.f32 %v4704_v27, %v5517_v31 }
 0xb5b   :  { %4379 = vmatpush3.bf16.msra.mxu1 %v2123_v24  ;;  %v1921_v43 = vmul.f32 %v1918_v28, %v1913_v11 }
 0xb5c   :  { %v4706_v6 = vpop.eup %4705 }
 0xb5d   :  { %v4708_v38 = vpop.eup %4707  ;;  %v1911_v41 = vmul.f32 %v4706_v6, %v5519_v19  ;;  %v1945_v49 = vmul.f32 %v1936_v13, %v1921_v43 }
 0xb5e   :  { %v1914_v42 = vmul.f32 %v4708_v38, %v5527_v40  ;;  %4381 = vmatmul.mubr.msk.bf16.vlgmr.msra.gmra.mxu1 %vm114_vm0, %v2121_v29 }
 0xb5f   :  { %v1919_v33 = vmul.f32 %v1918_v28, %v1911_v41  ;;  %v1949_v40 = vadd.f32 %v1945_v49, %v5548_v46 }
 0xb60   :  { %v4710_v30 = vpop.eup %4709  ;;  %v1922_v44 = vmul.f32 %v1918_v28, %v1914_v42 }
 0xb61   :  { %v1912_v45 = vmul.f32 %v4710_v30, %v5534_v51  ;;  %v1943_v31 = vmul.f32 %v1932_v53, %v1919_v33 }
 0xb62   :  { %v1946_v48 = vmul.f32 %v1938_v15, %v1922_v44 }
 0xb63   :  { %v1920_v37 = vmul.f32 %v1918_v28, %v1912_v45  ;;  %v1947_v52 = vadd.f32 %v1943_v31, %v5487_v3 }
 0xb64   :  { %v1950_v23 = vadd.f32 %v1946_v48, %v5542_v56 }
 0xb65   :  { %v1944_v39 = vmul.f32 %v1934_v59, %v1920_v37 }
 0xb66   :  { %v2037_v55 = vpack.c.bf16 %v1950_v23, %v1949_v40 }
 0xb67   :  { %v1948_v19 = vadd.f32 %v1944_v39, %v5493_v8 }
 0xb69   :  { %v2036_v16 = vpack.c.bf16 %v1948_v19, %v1947_v52 }
 0xb6b   :  { %4368 = vmatprep.mubr.msk.bf16.mxu0 %vm114_vm0, %v2036_v16 }
 0xb6c   :  { %4369 = vmatmul.mubr.msk.bf16.vlgmr.msra.gmra.mxu0 %vm114_vm0, %v2037_v55 }
 0xc1e   :  { %v5573_v51 = vpop.f32.mrf.mxu1 }
 0xc1f   :  { %4384 = vmatprep.subr.msk.mxu0 %vm576_vm2, %v5573_v51 }
 0xc20   :  { %v4382_v57 = vpop.f32.mrf.mxu1  ;;  %4385 = vmatpush3.xpose.msk.msra.mxu0 %vm576_vm2, %v5573_v51 }
 0xc22   :  { %v5579_v3 = vpop.f32.mrf.mxu1 }
 0xc24   :  { %v4383_v8 = vpop.f32.mrf.mxu1 }
 0xc2c   :  { %v4370_v56 = vpop.f32.mrf.mxu0 }
 0xc2d   :  { %v5591_v9 = vmul.f32 0.25, %v4370_v56 }
 0xc2e   :  { %v2102_v46 = vpop.f32.mrf.mxu0 }
 0xc2f   :  { %v2117_v53 = vmul.f32 0.25, %v2102_v46 }
 0xc30   :  { %v4371_v59 = vpop.f32.mrf.mxu0 }
 0xc31   :  { %4386 = vmatprep.mubr.msk.f32.mxu0 %vm576_vm2, %v2117_v53  ;;  %v5586_v60 = vmul.f32 0.25, %v4371_v59 }
 0xc32   :  { %v2105_v58 = vpop.f32.mrf.mxu0 }
 0xc33   :  { %v2118_v63 = vmul.f32 0.25, %v2105_v58 }
 0xc35   :  { %4387 = vmatmul.mubr.msk.f32.vlgmr.msra.gmra.mxu0 %vm576_vm2, %v2118_v63 }
 0xcf5   :  { %v4388_v0 = vpop.f32.mrf.mxu0 }
 0xcf6   :  { %v2284_v2 = vsel %vm2280_vm5, %v4388_v0, -inf }
 0xcf7   :  { %2285 = vmax.xlane.f32.xlu1 %v2284_v2  ;;  %v2261_v14 = vpop.f32.mrf.mxu0 }
 0xcf8   :  { %v2281_v5 = vsel %vm2280_vm5, %v2261_v14, -inf }
 0xcf9   :  { %2282 = vmax.xlane.f32.xlu0 %v2281_v5 }
 0xd08   :  { %2182 = vrot.lane.b32.xlu1 %v2118_v63, %s4869_s20 }
 0xd0c   :  { %2708 = vrot.lane.b32.xlu1 %v5586_v60, %s4869_s20 }
 0xd0f   :  { %2180 = vrot.lane.b32.xlu0 %v2117_v53, %s4869_s20 }
 0xd13   :  { %2706 = vrot.lane.b32.xlu0 %v5591_v9, %s4869_s20 }
 0xd80   :  { %v2286_v10 = vpop.xlane.xlu1 %2285 }
 0xd81   :  { %v2294_v32 = vsub.f32 %v4388_v0, %v2286_v10 }
 0xd82   :  { %v2283_v7 = vpop.xlane.xlu0 %2282 }
 0xd83   :  { %v2299_v1 = vmul.f32 1.442695, %v2294_v32  ;;  %v2293_v50 = vsub.f32 %v2261_v14, %v2283_v7 }
 0xd84   :  { %v2183_v13 = vpop.permute.xlu1 %2182 }
 0xd85   :  { %4711 = vpow2.f32 %v2299_v1  ;;  %v2297_v54 = vmul.f32 1.442695, %v2293_v50 }
 0xd86   :  { %v2181_v12 = vpop.permute.xlu0 %2180 }
 0xd87   :  { %4713 = vpow2.f32 %v2297_v54  ;;  %4389 = vmatprep.mubr.msk.f32.mxu0 %vm576_vm2, %v2181_v12 }
 0xd88   :  { %4390 = vmatmul.mubr.msk.f32.gmra.mxu0 %vm576_vm2, %v2183_v13  ;;  %v2709_v21 = vpop.permute.xlu1 %2708 }
 0xd8a   :  { %v2707_v20 = vpop.permute.xlu0 %2706 }
 0xd92   :  { %v4712_v15 = vpop.eup %4711 }
 0xd93   :  { %v2308_v17 = vsel %vm2280_vm5, %v4712_v15, 0.0 }
 0xd94   :  { %v4714_v18 = vpop.eup %4713  ;;  %2309 = vadd.xlane.f32.xlu1 %v2308_v17 }
 0xd95   :  { %v2305_v47 = vsel %vm2280_vm5, %v4714_v18, 0.0 }
 0xd96   :  { %2306 = vadd.xlane.f32.xlu0 %v2305_v47 }
 0xda5   :  { %2433 = vrot.lane.b32.xlu1 %v5573_v51, %s4869_s20 }
 0xda9   :  { %2427 = vrot.lane.b32.xlu1 %v2118_v63, %s4871_s21 }
 0xdac   :  { %2325 = vrot.lane.b32.xlu0 %v5573_v51, %s4871_s21 }
 0xdad   :  { %2431 = vrot.lane.b32.xlu1 %v2183_v13, %s4871_s21 }
 0xdb0   :  { %2425 = vrot.lane.b32.xlu0 %v2117_v53, %s4871_s21 }
 0xdb1   :  { %2950 = vrot.lane.b32.xlu1 %v5591_v9, %s4871_s21 }
 0xdb4   :  { %2429 = vrot.lane.b32.xlu0 %v2181_v12, %s4871_s21 }
 0xdb5   :  { %2954 = vrot.lane.b32.xlu1 %v2707_v20, %s4871_s21 }
 0xdb8   :  { %2958 = vrot.lane.b32.xlu0 %v5579_v3, %s4869_s20 }
 0xdbc   :  { %2952 = vrot.lane.b32.xlu0 %v5586_v60, %s4871_s21 }
 0xdc0   :  { %2956 = vrot.lane.b32.xlu0 %v2709_v21, %s4871_s21 }
 0xe1d   :  { %v2310_v24 = vpop.xlane.xlu1 %2309 }
 0xe1e   :  { %4715 = vrcp.f32 %v2310_v24 }
 0xe1f   :  { %v2307_v27 = vpop.xlane.xlu0 %2306 }
 0xe20   :  { %4717 = vrcp.f32 %v2307_v27 }
 0xe21   :  { %v2434_v6 = vpop.permute.xlu1 %2433 }
 0xe23   :  { %v2326_v29 = vpop.permute.xlu0 %2325 }
 0xe24   :  { %4392 = vmatprep.subr.mxu0 %v2326_v29  ;;  %4480 = vmatprep.subr.mxu1 %v2326_v29 }
 0xe25   :  { %4393 = vmatpush3.msra.mxu0 %v2326_v29  ;;  %4481 = vmatpush3.msra.mxu1 %v2326_v29  ;;  %v2428_v30 = vpop.permute.xlu1 %2427 }
 0xe26   :  { %4400 = vmatprep.subr.msk.mxu0 %vm576_vm2, %v2434_v6 }
 0xe27   :  { %v2426_v11 = vpop.permute.xlu0 %2425 }
 0xe29   :  { %v2432_v44 = vpop.permute.xlu1 %2431 }
 0xe2b   :  { %v4716_v28 = vpop.eup %4715  ;;  %v2430_v33 = vpop.permute.xlu0 %2429 }
 0xe2c   :  { %v2322_v42 = vmul.f32 %v4716_v28, %v4712_v15 }
 0xe2d   :  { %v4718_v38 = vpop.eup %4717  ;;  %v2951_v45 = vpop.permute.xlu1 %2950 }
 0xe2e   :  { %v2321_v41 = vmul.f32 %v4718_v38, %v4714_v18 }
 0xe2f   :  { %v2959_v43 = vpop.permute.xlu0 %2958 }
 0xe30   :  { %4394 = vmatprep.mubr.msk.f32.mxu0 %vm2280_vm5, %v2321_v41 }
 0xe31   :  { %4395 = vmatmul.mubr.msk.f32.vlgmr.msra.gmra.mxu0 %vm2280_vm5, %v2322_v42  ;;  %v2955_v37 = vpop.permute.xlu1 %2954 }
 0xe32   :  { %4401 = vmatpush3.xpose.msk.msra.mxu0 %vm576_vm2, %v2434_v6  ;;  %4402 = vmatprep.mubr.msk.f32.mxu0 %vm576_vm2, %v2426_v11 }
 0xe33   :  { %4416 = vmatprep.subr.msk.mxu0 %vm576_vm2, %v5579_v3  ;;  %v2953_v48 = vpop.permute.xlu0 %2952 }
 0xe35   :  { %4403 = vmatmul.mubr.msk.f32.vlgmr.msra.gmra.mxu0 %vm576_vm2, %v2428_v30 }
 0xe36   :  { %4417 = vmatpush3.xpose.msk.msra.mxu0 %vm576_vm2, %v5579_v3  ;;  %4405 = vmatprep.mubr.msk.f32.mxu0 %vm576_vm2, %v2430_v33 }
 0xe37   :  { %4432 = vmatprep.subr.msk.mxu0 %vm576_vm2, %v2959_v43  ;;  %v2957_v31 = vpop.permute.xlu0 %2956 }
 0xe39   :  { %4406 = vmatmul.mubr.msk.f32.gmra.mxu0 %vm576_vm2, %v2432_v44 }
 0xe3a   :  { %4418 = vmatprep.mubr.msk.f32.mxu0 %vm576_vm2, %v5591_v9 }
 0xe3d   :  { %4419 = vmatmul.mubr.msk.f32.vlgmr.msra.gmra.mxu0 %vm576_vm2, %v5586_v60 }
 0xe3e   :  { %4433 = vmatpush3.xpose.msk.msra.mxu0 %vm576_vm2, %v2959_v43  ;;  %4421 = vmatprep.mubr.msk.f32.mxu0 %vm576_vm2, %v2707_v20 }
 0xe41   :  { %4422 = vmatmul.mubr.msk.f32.gmra.mxu0 %vm576_vm2, %v2709_v21 }
 0xe42   :  { %4434 = vmatprep.mubr.msk.f32.mxu0 %vm576_vm2, %v2951_v45 }
 0xe45   :  { %4435 = vmatmul.mubr.msk.f32.vlgmr.msra.gmra.mxu0 %vm576_vm2, %v2953_v48 }
 0xe46   :  { %4437 = vmatprep.mubr.msk.f32.mxu0 %vm576_vm2, %v2955_v37 }
 0xe48   :  { %v4391_v49 = vpop.f32.mrf.mxu0 }
 0xe49   :  { %4438 = vmatmul.mubr.msk.f32.gmra.mxu0 %vm576_vm2, %v2957_v31  ;;  %v2290_v39 = vsel %vm2280_vm5, %v4391_v49, -inf }
 0xe4a   :  { %v2271_v23 = vpop.f32.mrf.mxu0  ;;  %2291 = vmax.xlane.f32.xlu0 %v2290_v39 }
 0xe4b   :  { %v2287_v52 = vsel %vm2280_vm5, %v2271_v23, -inf }
 0xe4c   :  { %2288 = vmax.xlane.f32.xlu1 %v2287_v52 }
 0xed3   :  { %v2292_v46 = vpop.xlane.xlu0 %2291 }
 0xed4   :  { %v2296_v58 = vsub.f32 %v4391_v49, %v2292_v46 }
 0xed5   :  { %v2289_v16 = vpop.xlane.xlu1 %2288 }
 0xed6   :  { %v2295_v8 = vsub.f32 %v2271_v23, %v2289_v16  ;;  %v2303_v60 = vmul.f32 1.442695, %v2296_v58 }
 0xed8   :  { %v2301_v63 = vmul.f32 1.442695, %v2295_v8 }
 0xeda   :  { %4719 = vpow2.f32 %v2301_v63 }
 0xedb   :  { %4721 = vpow2.f32 %v2303_v60 }
 0xee7   :  { %v5661_v21 = vpop.eup %4719 }
 0xee8   :  { %v2311_v27 = vsel %vm2280_vm5, %v5661_v21, 0.0  ;;  %v5667_v29 = vpop.eup %4721 }
 0xee9   :  { %v2314_v6 = vsel %vm2280_vm5, %v5667_v29, 0.0 }
 0xef1   :  { %v5641_v19 = vpop.f32.mrf.mxu0 }
 0xef3   :  { %v5643_v40 = vpop.f32.mrf.mxu0 }
 0xef5   :  { %v4404_v55 = vpop.f32.mrf.mxu0 }
 0xef6   :  { %v2533_v2 = vsel %vm2280_vm5, %v4404_v55, -inf }
 0xef7   :  { %v2511_v57 = vpop.f32.mrf.mxu0 }
 0xef8   :  { %v2530_v56 = vsel %vm2280_vm5, %v2511_v57, -inf }
 0xef9   :  { %v4407_v53 = vpop.f32.mrf.mxu0  ;;  %2531 = vmax.xlane.f32.xlu0 %v2530_v56 }
 0xefa   :  { %v2539_v9 = vsel %vm2280_vm5, %v4407_v53, -inf }
 0xefb   :  { %v2521_v59 = vpop.f32.mrf.mxu0 }
 0xefc   :  { %v2536_v0 = vsel %vm2280_vm5, %v2521_v59, -inf }
 0xefd   :  { %2537 = vmax.xlane.f32.xlu1 %v2536_v0  ;;  %2534 = vmax.xlane.f32.xlu0 %v2533_v2  ;;  %v4420_v14 = vpop.f32.mrf.mxu0 }
 0xefe   :  { %v2809_v1 = vsel %vm2280_vm5, %v4420_v14, -inf }
 0xeff   :  { %v2787_v5 = vpop.f32.mrf.mxu0 }
 0xf00   :  { %v2806_v10 = vsel %vm2280_vm5, %v2787_v5, -inf }
 0xf01   :  { %2540 = vmax.xlane.f32.xlu0 %v2539_v9  ;;  %2807 = vmax.xlane.f32.xlu1 %v2806_v10  ;;  %v4423_v32 = vpop.f32.mrf.mxu0 }
 0xf02   :  { %v2815_v13 = vsel %vm2280_vm5, %v4423_v32, -inf }
 0xf03   :  { %v2797_v7 = vpop.f32.mrf.mxu0 }
 0xf04   :  { %v2812_v50 = vsel %vm2280_vm5, %v2797_v7, -inf }
 0xf05   :  { %2810 = vmax.xlane.f32.xlu0 %v2809_v1  ;;  %v5652_v54 = vpop.f32.mrf.mxu0  ;;  %2813 = vmax.xlane.f32.xlu1 %v2812_v50 }
 0xf06   :  { %v3058_v47 = vsel %vm2280_vm5, %v5652_v54, -inf }
 0xf07   :  { %v3036_v12 = vpop.f32.mrf.mxu0 }
 0xf08   :  { %v3055_v15 = vsel %vm2280_vm5, %v3036_v12, -inf }
 0xf09   :  { %2816 = vmax.xlane.f32.xlu0 %v2815_v13  ;;  %v5656_v17 = vpop.f32.mrf.mxu0  ;;  %3056 = vmax.xlane.f32.xlu1 %v3055_v15 }
 0xf0a   :  { %v3064_v24 = vsel %vm2280_vm5, %v5656_v17, -inf }
 0xf0b   :  { %v3046_v18 = vpop.f32.mrf.mxu0 }
 0xf0c   :  { %v3061_v20 = vsel %vm2280_vm5, %v3046_v18, -inf }
 0xf0d   :  { %3059 = vmax.xlane.f32.xlu0 %v3058_v47  ;;  %3062 = vmax.xlane.f32.xlu1 %v3061_v20 }
 0xf11   :  { %3065 = vmax.xlane.f32.xlu0 %v3064_v24  ;;  %2312 = vadd.xlane.f32.xlu1 %v2311_v27 }
 0xf15   :  { %2315 = vadd.xlane.f32.xlu0 %v2314_v6 }
 0xf22   :  { %2574 = vrot.lane.b32.xlu1 %v5573_v51, %s4876_s8 }
 0xf82   :  { %v2532_v11 = vpop.xlane.xlu0 %2531 }
 0xf83   :  { %v2542_v28 = vsub.f32 %v2511_v57, %v2532_v11 }
 0xf85   :  { %v2546_v38 = vmul.f32 1.442695, %v2542_v28 }
 0xf86   :  { %v2538_v41 = vpop.xlane.xlu1 %2537  ;;  %v2535_v42 = vpop.xlane.xlu0 %2534 }
 0xf87   :  { %4723 = vpow2.f32 %v2546_v38  ;;  %v2544_v33 = vsub.f32 %v2521_v59, %v2538_v41  ;;  %v2543_v30 = vsub.f32 %v4404_v55, %v2535_v42 }
 0xf89   :  { %v2550_v43 = vmul.f32 1.442695, %v2544_v33  ;;  %v2548_v44 = vmul.f32 1.442695, %v2543_v30 }
 0xf8a   :  { %v2541_v45 = vpop.xlane.xlu0 %2540  ;;  %v2808_v48 = vpop.xlane.xlu1 %2807 }
 0xf8b   :  { %4725 = vpow2.f32 %v2550_v43  ;;  %v2545_v37 = vsub.f32 %v4407_v53, %v2541_v45  ;;  %v2818_v31 = vsub.f32 %v2787_v5, %v2808_v48 }
 0xf8c   :  { %4727 = vpow2.f32 %v2548_v44 }
 0xf8d   :  { %v2552_v49 = vmul.f32 1.442695, %v2545_v37  ;;  %v2822_v39 = vmul.f32 1.442695, %v2818_v31 }
 0xf8e   :  { %v2811_v23 = vpop.xlane.xlu0 %2810  ;;  %v2814_v51 = vpop.xlane.xlu1 %2813 }
 0xf8f   :  { %4729 = vpow2.f32 %v2552_v49  ;;  %v2819_v52 = vsub.f32 %v4420_v14, %v2811_v23  ;;  %v2820_v16 = vsub.f32 %v2797_v7, %v2814_v51 }
 0xf90   :  { %4731 = vpow2.f32 %v2822_v39 }
 0xf91   :  { %v2824_v57 = vmul.f32 1.442695, %v2819_v52  ;;  %v2826_v8 = vmul.f32 1.442695, %v2820_v16 }
 0xf92   :  { %v2817_v56 = vpop.xlane.xlu0 %2816  ;;  %v3057_v55 = vpop.xlane.xlu1 %3056 }
 0xf93   :  { %4733 = vpow2.f32 %v2824_v57  ;;  %v2821_v46 = vsub.f32 %v4423_v32, %v2817_v56  ;;  %v3067_v59 = vsub.f32 %v3036_v12, %v3057_v55 }
 0xf94   :  { %v5673_v58 = vpop.eup %4723  ;;  %4735 = vpow2.f32 %v2826_v8 }
 0xf95   :  { %v2828_v53 = vmul.f32 1.442695, %v2821_v46  ;;  %v3071_v63 = vmul.f32 1.442695, %v3067_v59  ;;  %v2554_v0 = vsel %vm2280_vm5, %v5673_v58, 0.0 }
 0xf96   :  { %v3060_v2 = vpop.xlane.xlu0 %3059  ;;  %2555 = vadd.xlane.f32.xlu1 %v2554_v0  ;;  %v3063_v14 = vpop.xlane.xlu1 %3062 }
 0xf97   :  { %4737 = vpow2.f32 %v2828_v53  ;;  %v3068_v5 = vsub.f32 %v5652_v54, %v3060_v2  ;;  %v3069_v60 = vsub.f32 %v3046_v18, %v3063_v14 }
 0xf98   :  { %v5678_v9 = vpop.eup %4725  ;;  %4739 = vpow2.f32 %v3071_v63 }
 0xf99   :  { %v5680_v10 = vpop.eup %4727  ;;  %v3073_v32 = vmul.f32 1.442695, %v3068_v5  ;;  %v3075_v7 = vmul.f32 1.442695, %v3069_v60  ;;  %v2560_v1 = vsel %vm2280_vm5, %v5678_v9, 0.0 }
 0xf9a   :  { %v2557_v50 = vsel %vm2280_vm5, %v5680_v10, 0.0  ;;  %v3066_v12 = vpop.xlane.xlu0 %3065  ;;  %2561 = vadd.xlane.f32.xlu1 %v2560_v1  ;;  %v2313_v13 = vpop.xlane.xlu1 %2312 }
 0xf9b   :  { %4741 = vpow2.f32 %v3073_v32  ;;  %2558 = vadd.xlane.f32.xlu0 %v2557_v50  ;;  %v3070_v54 = vsub.f32 %v5656_v17, %v3066_v12 }
 0xf9c   :  { %v5687_v15 = vpop.eup %4729  ;;  %4743 = vpow2.f32 %v3075_v7 }
 0xf9d   :  { %v5689_v18 = vpop.eup %4731  ;;  %v3077_v47 = vmul.f32 1.442695, %v3070_v54  ;;  %4745 = vrcp.f32 %v2313_v13  ;;  %v2563_v20 = vsel %vm2280_vm5, %v5687_v15, 0.0 }
 0xf9e   :  { %v2316_v24 = vpop.xlane.xlu0 %2315  ;;  %v2830_v27 = vsel %vm2280_vm5, %v5689_v18, 0.0  ;;  %v2575_v6 = vpop.permute.xlu1 %2574 }
 0xf9f   :  { %4747 = vpow2.f32 %v3077_v47  ;;  %2564 = vadd.xlane.f32.xlu0 %v2563_v20  ;;  %2831 = vadd.xlane.f32.xlu1 %v2830_v27 }
 0xfa0   :  { %v5695_v11 = vpop.eup %4733  ;;  %4749 = vrcp.f32 %v2316_v24  ;;  %4408 = vmatprep.subr.mxu1 %v2575_v6 }
 0xfa1   :  { %v5697_v17 = vpop.eup %4735  ;;  %v2833_v28 = vsel %vm2280_vm5, %v5695_v11, 0.0 }
 0xfa2   :  { %v2836_v38 = vsel %vm2280_vm5, %v5697_v17, 0.0 }
 0xfa3   :  { %2834 = vadd.xlane.f32.xlu0 %v2833_v28  ;;  %2837 = vadd.xlane.f32.xlu1 %v2836_v38 }
 0xfa4   :  { %v5703_v41 = vpop.eup %4737 }
 0xfa5   :  { %v5705_v42 = vpop.eup %4739  ;;  %v2839_v33 = vsel %vm2280_vm5, %v5703_v41, 0.0 }
 0xfa6   :  { %v3079_v30 = vsel %vm2280_vm5, %v5705_v42, 0.0 }
 0xfa7   :  { %2840 = vadd.xlane.f32.xlu0 %v2839_v33  ;;  %3080 = vadd.xlane.f32.xlu1 %v3079_v30  ;;  %v4575_v30 = vld [vmem:[%s6028_s7 + $0x34] ss:$8 sps:$4 sm:$0xff]  }
 0xfa8   :  { %v5711_v43 = vpop.eup %4741  ;;  %4448 = vmatprep.subr.bf16.mxu0 %v4575_v30 }
 0xfa9   :  { %v5713_v44 = vpop.eup %4743  ;;  %v3082_v45 = vsel %vm2280_vm5, %v5711_v43, 0.0  ;;  %4449 = vmatpush3.bf16.msra.mxu0 %v4575_v30 }
 0xfaa   :  { %v4746_v48 = vpop.eup %4745  ;;  %v3085_v37 = vsel %vm2280_vm5, %v5713_v44, 0.0 }
 0xfab   :  { %3083 = vadd.xlane.f32.xlu0 %v3082_v45  ;;  %3086 = vadd.xlane.f32.xlu1 %v3085_v37  ;;  %v2323_v31 = vmul.f32 %v4746_v48, %v5661_v21  ;;  %v4576_v37 = vld [vmem:[%s6028_s7 + $0x24] ss:$8 sps:$4 sm:$0xff]  }
 0xfac   :  { %v5720_v49 = vpop.eup %4747  ;;  %4450 = vmatprep.subr.bf16.mxu0 %v4576_v37 }
 0xfad   :  { %v4750_v39 = vpop.eup %4749  ;;  %4397 = vmatprep.mubr.msk.f32.mxu1 %vm2280_vm5, %v2323_v31  ;;  %v3088_v23 = vsel %vm2280_vm5, %v5720_v49, 0.0  ;;  %4451 = vmatpush3.bf16.msra.mxu0 %v4576_v37 }
 0xfae   :  { %v2324_v51 = vmul.f32 %v4750_v39, %v5667_v29  ;;  %v4577_v39 = vld [vmem:[%s6028_s7 + $0x14] ss:$8 sps:$4 sm:$0xff]  }
 0xfaf   :  { %3089 = vadd.xlane.f32.xlu0 %v3088_v23  ;;  %4452 = vmatprep.subr.bf16.mxu0 %v4577_v39 }
 0xfb0   :  { %4398 = vmatmul.mubr.msk.f32.vlgmr.msra.gmra.mxu1 %vm2280_vm5, %v2324_v51 }
 0xfb1   :  { %4409 = vmatpush3.msra.mxu1 %v2575_v6  ;;  %4453 = vmatpush3.bf16.msra.mxu0 %v4577_v39 }
 0xfbc   :  { %3099 = vrot.lane.b32.xlu1 %v5579_v3, %s4876_s8 }
 0xfc5   :  { %2850 = vrot.lane.b32.xlu0 %v5579_v3, %s4871_s21 }
0x101f   :  { %v2556_v21 = vpop.xlane.xlu1 %2555 }
0x1020   :  { %4751 = vrcp.f32 %v2556_v21  ;;  %v4578_v21 = vld [vmem:[%s6028_s7 + $0x4] ss:$8 sps:$4 sm:$0xff]  }
0x1021   :  { %4454 = vmatprep.subr.bf16.mxu0 %v4578_v21 }
0x1022   :  { %4455 = vmatpush3.bf16.msra.mxu0 %v4578_v21 }
0x1023   :  { %v2562_v52 = vpop.xlane.xlu1 %2561 }
0x1024   :  { %v2559_v16 = vpop.xlane.xlu0 %2558  ;;  %4753 = vrcp.f32 %v2562_v52 }
0x1025   :  { %4755 = vrcp.f32 %v2559_v16 }
0x1028   :  { %v2565_v57 = vpop.xlane.xlu0 %2564  ;;  %v2832_v8 = vpop.xlane.xlu1 %2831 }
0x1029   :  { %4757 = vrcp.f32 %v2565_v57 }
0x102a   :  { %4759 = vrcp.f32 %v2832_v8 }
0x102c   :  { %v2835_v29 = vpop.xlane.xlu0 %2834  ;;  %v2838_v56 = vpop.xlane.xlu1 %2837 }
0x102d   :  { %v4752_v55 = vpop.eup %4751  ;;  %4761 = vrcp.f32 %v2835_v29 }
0x102e   :  { %4763 = vrcp.f32 %v2838_v56  ;;  %v2570_v46 = vmul.f32 %v4752_v55, %v5673_v58 }
0x1030   :  { %v2841_v59 = vpop.xlane.xlu0 %2840  ;;  %v3081_v53 = vpop.xlane.xlu1 %3080  ;;  %4410 = vmatprep.mubr.msk.f32.mxu1 %vm2280_vm5, %v2570_v46 }
0x1031   :  { %v4754_v3 = vpop.eup %4753  ;;  %4765 = vrcp.f32 %v2841_v59 }
0x1032   :  { %v4756_v63 = vpop.eup %4755  ;;  %4767 = vrcp.f32 %v3081_v53  ;;  %v2572_v0 = vmul.f32 %v4754_v3, %v5678_v9 }
0x1033   :  { %v2571_v2 = vmul.f32 %v4756_v63, %v5680_v10 }
0x1034   :  { %v3084_v14 = vpop.xlane.xlu0 %3083  ;;  %v3087_v5 = vpop.xlane.xlu1 %3086 }
0x1035   :  { %4769 = vrcp.f32 %v3084_v14  ;;  %4411 = vmatmul.mubr.msk.f32.vlgmr.msra.gmra.mxu1 %vm2280_vm5, %v2571_v2 }
0x1036   :  { %v4758_v60 = vpop.eup %4757  ;;  %4771 = vrcp.f32 %v3087_v5  ;;  %4413 = vmatprep.mubr.msk.f32.mxu1 %vm2280_vm5, %v2572_v0 }
0x1037   :  { %v4760_v58 = vpop.eup %4759  ;;  %v2573_v32 = vmul.f32 %v4758_v60, %v5687_v15 }
0x1038   :  { %v3090_v7 = vpop.xlane.xlu0 %3089  ;;  %v2846_v1 = vmul.f32 %v4760_v58, %v5689_v18  ;;  %v3100_v54 = vpop.permute.xlu1 %3099 }
0x1039   :  { %4773 = vrcp.f32 %v3090_v7  ;;  %4414 = vmatmul.mubr.msk.f32.gmra.mxu1 %vm2280_vm5, %v2573_v32 }
0x103a   :  { %v4762_v9 = vpop.eup %4761  ;;  %4426 = vmatprep.mubr.msk.f32.mxu1 %vm2280_vm5, %v2846_v1 }
0x103b   :  { %v4764_v10 = vpop.eup %4763  ;;  %v2847_v12 = vmul.f32 %v4762_v9, %v5695_v11 }
0x103c   :  { %v2851_v50 = vpop.permute.xlu0 %2850  ;;  %v2848_v47 = vmul.f32 %v4764_v10, %v5697_v17 }
0x103d   :  { %4424 = vmatprep.subr.mxu1 %v2851_v50 }
0x103e   :  { %v4766_v13 = vpop.eup %4765  ;;  %4425 = vmatpush3.msra.mxu1 %v2851_v50 }
0x103f   :  { %v4768_v15 = vpop.eup %4767  ;;  %4427 = vmatmul.mubr.msk.f32.vlgmr.msra.gmra.mxu1 %vm2280_vm5, %v2847_v12  ;;  %4440 = vmatprep.subr.mxu1 %v3100_v54  ;;  %v2849_v18 = vmul.f32 %v4766_v13, %v5703_v41 }
0x1040   :  { %4429 = vmatprep.mubr.msk.f32.mxu1 %vm2280_vm5, %v2848_v47  ;;  %4441 = vmatpush3.msra.mxu1 %v3100_v54  ;;  %v3095_v24 = vmul.f32 %v4768_v15, %v5705_v42 }
0x1042   :  { %v4770_v20 = vpop.eup %4769 }
0x1043   :  { %v4772_v27 = vpop.eup %4771  ;;  %4430 = vmatmul.mubr.msk.f32.gmra.mxu1 %vm2280_vm5, %v2849_v18  ;;  %v3096_v6 = vmul.f32 %v4770_v20, %v5711_v43 }
0x1044   :  { %4442 = vmatprep.mubr.msk.f32.mxu1 %vm2280_vm5, %v3095_v24  ;;  %v3097_v17 = vmul.f32 %v4772_v27, %v5713_v44 }
0x1046   :  { %v4774_v11 = vpop.eup %4773 }
0x1047   :  { %4443 = vmatmul.mubr.msk.f32.vlgmr.msra.gmra.mxu1 %vm2280_vm5, %v3096_v6  ;;  %v3098_v28 = vmul.f32 %v4774_v11, %v5720_v49 }
0x1048   :  { %4445 = vmatprep.mubr.msk.f32.mxu1 %vm2280_vm5, %v3097_v17 }
0x104b   :  { %4446 = vmatmul.mubr.msk.f32.gmra.mxu1 %vm2280_vm5, %v3098_v28 }
0x1070   :  { %v4399_v38 = vpop.f32.mrf.mxu1 }
0x1072   :  { %v2416_v41 = vpop.f32.mrf.mxu1 }
0x1073   :  { %v4525_v42 = vpack.i.bf16 %v4399_v38, %v2416_v41  ;;  %v3304_v41 = vsub.s32 5, %v4957_v22 }
0x1075   :  { %4526 = vrot.lane.b32.xlu1 %v4525_v42, %s4873_s25  ;;  %v5793_v42 = vld [vmem:[%s6026_s5 + $0x8] sm:$0xff] }
0x10e7   :  { %v4527_v59 = vpop.permute.xlu1 %4526 }
0x10e8   :  { %v4529_v3 = vunpack.i.h.bf16 %v4527_v59  ;;  %v4528_v63 = vunpack.i.l.bf16 %v4527_v59 }
0x10ea   :  { %v2699_v5 = vsel %vm576_vm2, %v5641_v19, %v4529_v3  ;;  %v2698_v60 = vsel %vm576_vm2, %v5643_v40, %v4528_v63 }
0x10f5   :  { %v4412_v33 = vpop.f32.mrf.mxu1 }
0x10f7   :  { %v2655_v43 = vpop.f32.mrf.mxu1 }
0x10f8   :  { %v4530_v44 = vpack.i.bf16 %v4412_v33, %v2655_v43  ;;  %v3305_v33 = vrot.slane %v5793_v42, %v3304_v41 }
0x10f9   :  { %v4415_v45 = vpop.f32.mrf.mxu1 }
0x10fa   :  { %4531 = vrot.lane.b32.xlu1 %v4530_v44, %s4872_s22 }
0x10fb   :  { %v2665_v48 = vpop.f32.mrf.mxu1 }
0x10fc   :  { %v4535_v31 = vpack.i.bf16 %v4415_v45, %v2665_v48 }
0x10fe   :  { %4536 = vrot.lane.b32.xlu1 %v4535_v31, %s4870_s3 }
0x10ff   :  { %v4428_v49 = vpop.f32.mrf.mxu1 }
0x1101   :  { %v2931_v23 = vpop.f32.mrf.mxu1 }
0x1103   :  { %v4431_v51 = vpop.f32.mrf.mxu1 }
0x1105   :  { %v2941_v52 = vpop.f32.mrf.mxu1 }
0x1106   :  { %v4540_v16 = vpack.i.bf16 %v4431_v51, %v2941_v52 }
0x1107   :  { %v4444_v57 = vpop.f32.mrf.mxu1 }
0x1108   :  { %4541 = vrot.lane.b32.xlu0 %v4540_v16, %s4873_s25 }
0x1109   :  { %v3180_v8 = vpop.f32.mrf.mxu1 }
0x110a   :  { %v4545_v29 = vpack.i.bf16 %v4444_v57, %v3180_v8 }
0x110b   :  { %v4447_v56 = vpop.f32.mrf.mxu1 }
0x110c   :  { %4546 = vrot.lane.b32.xlu0 %v4545_v29, %s4872_s22 }
0x110d   :  { %v3190_v55 = vpop.f32.mrf.mxu1 }
0x110e   :  { %v4550_v46 = vpack.i.bf16 %v4447_v56, %v3190_v55 }
0x1110   :  { %4551 = vrot.lane.b32.xlu1 %v4550_v46, %s4870_s3 }
0x116c   :  { %v4532_v53 = vpop.permute.xlu1 %4531 }
0x116d   :  { %v4534_v0 = vunpack.i.h.bf16 %v4532_v53  ;;  %v4533_v2 = vunpack.i.l.bf16 %v4532_v53 }
0x116f   :  { %v2701_v7 = vsel %vm446_vm1, %v2699_v5, %v4534_v0  ;;  %v2700_v1 = vsel %vm446_vm1, %v2698_v60, %v4533_v2  ;;  %v3344_v60 = vsub.s32 3, %v4957_v22 }
0x1170   :  { %v4537_v14 = vpop.permute.xlu1 %4536 }
0x1171   :  { %v4539_v58 = vunpack.i.h.bf16 %v4537_v14  ;;  %v4538_v32 = vunpack.i.l.bf16 %v4537_v14 }
0x1173   :  { %v2703_v9 = vsel %vm1105_vm3, %v2701_v7, %v4539_v58  ;;  %v2702_v10 = vsel %vm1105_vm3, %v2700_v1, %v4538_v32  ;;  %v5806_v58 = vld [vmem:[%s6026_s5] sm:$0xff] }
0x1174   :  { %v3229_v50 = vpack.c.bf16 %v2703_v9, %v2702_v10  ;;  %v3345_v32 = vrot.slane %v5806_v58, %v3344_v60 }
0x1176   :  { %4456 = vmatprep.mubr.msk.bf16.mxu0 %vm114_vm0, %v3229_v50 }
0x117a   :  { %v4542_v12 = vpop.permute.xlu0 %4541 }
0x117b   :  { %v4544_v54 = vunpack.i.h.bf16 %v4542_v12  ;;  %v4543_v19 = vunpack.i.l.bf16 %v4542_v12 }
0x117d   :  { %v3224_v18 = vsel %vm576_vm2, %v4428_v49, %v4544_v54  ;;  %v3223_v20 = vsel %vm576_vm2, %v2931_v23, %v4543_v19 }
0x117e   :  { %v4547_v13 = vpop.permute.xlu0 %4546 }
0x117f   :  { %v4549_v47 = vunpack.i.h.bf16 %v4547_v13  ;;  %v4548_v15 = vunpack.i.l.bf16 %v4547_v13 }
0x1181   :  { %v3226_v6 = vsel %vm446_vm1, %v3224_v18, %v4549_v47  ;;  %v3225_v11 = vsel %vm446_vm1, %v3223_v20, %v4548_v15 }
0x1182   :  { %v4552_v40 = vpop.permute.xlu1 %4551 }
0x1183   :  { %v4554_v24 = vunpack.i.h.bf16 %v4552_v40  ;;  %v4553_v27 = vunpack.i.l.bf16 %v4552_v40 }
0x1185   :  { %v3228_v17 = vsel %vm1105_vm3, %v3226_v6, %v4554_v24  ;;  %v3227_v28 = vsel %vm1105_vm3, %v3225_v11, %v4553_v27 }
0x1186   :  { %v3230_v38 = vpack.c.bf16 %v3228_v17, %v3227_v28 }
0x1188   :  { %4457 = vmatmul.mubr.msk.bf16.vlgmr.msra.gmra.mxu0 %vm114_vm0, %v3230_v38  ;;  %v49_v38 = vld [vmem:[%s6023_s2 + $0x18] sm:$0xff] }
0x1248   :  { %v4458_v30 = vpop.f32.mrf.mxu0 }
0x1249   :  { %v3308_v44 = vmul.f32 %v4458_v30, %v3305_v33  ;;  %v55_v30 = vld [vmem:[%s6023_s2 + $0x48] sm:$0xff] }
0x124a   :  { %v3287_v43 = vpop.f32.mrf.mxu0 }
0x124b   :  { %v3306_v45 = vmul.f32 %v3305_v33, %v3287_v43  ;;  %v3312_v49 = vmul.f32 %v3308_v44, %v3308_v44  ;;  %v3391_v43 = vadd.f32 1.0, %v55_v30 }
0x124c   :  { %v4459_v48 = vpop.f32.mrf.mxu0 }
0x124d   :  { %v3310_v37 = vmul.f32 %v3306_v45, %v3306_v45  ;;  %v3309_v39 = vmul.f32 %v4459_v48, %v3305_v33  ;;  %v3320_v16 = vsel %vm114_vm0, %v3312_v49, 0.0  ;;  %v67_v48 = vld [vmem:[%s6023_s2 + $0xa8] sm:$0xff] }
0x124e   :  { %v3290_v31 = vpop.f32.mrf.mxu0 }
0x124f   :  { %v3307_v23 = vmul.f32 %v3305_v33, %v3290_v31  ;;  %v3314_v51 = vsel %vm114_vm0, %v3310_v37, 0.0  ;;  %v3313_v52 = vmul.f32 %v3309_v39, %v3309_v39  ;;  %v3390_v33 = vadd.f32 1.0, %v49_v38 }
0x1250   :  { %3315 = vadd.xlane.f32.xlu0 %v3314_v51  ;;  %v3393_v37 = vadd.f32 1.0, %v67_v48 }
0x1251   :  { %v3311_v21 = vmul.f32 %v3307_v23, %v3307_v23  ;;  %v3323_v8 = vsel %vm114_vm0, %v3313_v52, 0.0 }
0x1253   :  { %v3317_v57 = vsel %vm114_vm0, %v3311_v21, 0.0 }
0x1254   :  { %3321 = vadd.xlane.f32.xlu0 %v3320_v16  ;;  %3318 = vadd.xlane.f32.xlu1 %v3317_v57 }
0x1258   :  { %3324 = vadd.xlane.f32.xlu0 %v3323_v8 }
0x12d9   :  { %v3316_v29 = vpop.xlane.xlu0 %3315 }
0x12da   :  { %v3326_v56 = vmul.f32 0.015625, %v3316_v29 }
0x12dc   :  { %v3330_v55 = vadd.f32 1e-06, %v3326_v56 }
0x12dd   :  { %v3322_v46 = vpop.xlane.xlu0 %3321  ;;  %v3319_v59 = vpop.xlane.xlu1 %3318 }
0x12de   :  { %4775 = vrsqrt.f32 %v3330_v55  ;;  %v3328_v53 = vmul.f32 0.015625, %v3322_v46  ;;  %v3327_v3 = vmul.f32 0.015625, %v3319_v59  ;;  %v3385_v46 = vrot.slane %v5793_v42, %v1765_v34 }
0x12e0   :  { %v3332_v63 = vadd.f32 1e-06, %v3328_v53  ;;  %v3331_v0 = vadd.f32 1e-06, %v3327_v3 }
0x12e1   :  { %v3325_v2 = vpop.xlane.xlu0 %3324 }
0x12e2   :  { %4777 = vrsqrt.f32 %v3332_v63  ;;  %v3329_v14 = vmul.f32 0.015625, %v3325_v2 }
0x12e3   :  { %4779 = vrsqrt.f32 %v3331_v0 }
0x12e4   :  { %v3333_v5 = vadd.f32 1e-06, %v3329_v14 }
0x12e6   :  { %4781 = vrsqrt.f32 %v3333_v5 }
0x12eb   :  { %v4776_v7 = vpop.eup %4775 }
0x12ec   :  { %v3338_v1 = vmul.f32 %v4776_v7, %v3306_v45 }
0x12ee   :  { %v3346_v9 = vmul.f32 %v3345_v32, %v3338_v1 }
0x12ef   :  { %v4778_v10 = vpop.eup %4777 }
0x12f0   :  { %v4780_v50 = vpop.eup %4779  ;;  %v3350_v12 = vmul.f32 %v3346_v9, %v3346_v9  ;;  %v3340_v13 = vmul.f32 %v4778_v10, %v3308_v44  ;;  %v61_v44 = vld [vmem:[%s6023_s2 + $0x78] sm:$0xff] }
0x12f1   :  { %v3339_v47 = vmul.f32 %v4780_v50, %v3307_v23  ;;  %v3392_v45 = vadd.f32 1.0, %v61_v44 }
0x12f2   :  { %v3354_v54 = vsel %vm114_vm0, %v3350_v12, 0.0  ;;  %v3348_v19 = vmul.f32 %v3345_v32, %v3340_v13 }
0x12f3   :  { %v4782_v15 = vpop.eup %4781  ;;  %3355 = vadd.xlane.f32.xlu0 %v3354_v54  ;;  %v3347_v27 = vmul.f32 %v3345_v32, %v3339_v47 }
0x12f4   :  { %v3352_v40 = vmul.f32 %v3348_v19, %v3348_v19  ;;  %v3341_v18 = vmul.f32 %v4782_v15, %v3309_v39 }
0x12f5   :  { %v3351_v17 = vmul.f32 %v3347_v27, %v3347_v27 }
0x12f6   :  { %v3360_v20 = vsel %vm114_vm0, %v3352_v40, 0.0  ;;  %v3349_v24 = vmul.f32 %v3345_v32, %v3341_v18 }
0x12f7   :  { %3361 = vadd.xlane.f32.xlu0 %v3360_v20  ;;  %v3357_v28 = vsel %vm114_vm0, %v3351_v17, 0.0 }
0x12f8   :  { %v3353_v6 = vmul.f32 %v3349_v24, %v3349_v24 }
0x12fa   :  { %v3363_v11 = vsel %vm114_vm0, %v3353_v6, 0.0 }
0x12fb   :  { %3364 = vadd.xlane.f32.xlu1 %v3363_v11 }
0x12ff   :  { %3358 = vadd.xlane.f32.xlu1 %v3357_v28 }
0x130d   :  { %3398 = vrot.lane.b32.xlu0 %v3390_v33, %s4868_s14 }
0x1310   :  { %3400 = vrot.lane.b32.xlu1 %v3391_v43, %s4868_s14 }
0x1314   :  { %3402 = vrot.lane.b32.xlu1 %v3392_v45, %s4868_s14 }
0x1318   :  { %3404 = vrot.lane.b32.xlu1 %v3393_v37, %s4868_s14 }
0x137c   :  { %v3356_v31 = vpop.xlane.xlu0 %3355 }
0x137d   :  { %v3366_v49 = vmul.f32 0.015625, %v3356_v31 }
0x137f   :  { %v3370_v39 = vadd.f32 1e-06, %v3366_v49 }
0x1380   :  { %v3362_v23 = vpop.xlane.xlu0 %3361 }
0x1381   :  { %4783 = vrsqrt.f32 %v3370_v39  ;;  %v3368_v51 = vmul.f32 0.015625, %v3362_v23 }
0x1383   :  { %v3372_v21 = vadd.f32 1e-06, %v3368_v51 }
0x1384   :  { %v3365_v52 = vpop.xlane.xlu1 %3364  ;;  %v3399_v3 = vpop.permute.xlu0 %3398 }
0x1385   :  { %4785 = vrsqrt.f32 %v3372_v21  ;;  %v3369_v16 = vmul.f32 0.015625, %v3365_v52  ;;  %v3457_v21 = vrot.slane %v5806_v58, %v1725_v61 }
0x1387   :  { %v3373_v57 = vadd.f32 1e-06, %v3369_v16 }
0x1388   :  { %v3359_v8 = vpop.xlane.xlu1 %3358 }
0x1389   :  { %4787 = vrsqrt.f32 %v3373_v57  ;;  %v3367_v29 = vmul.f32 0.015625, %v3359_v8 }
0x138b   :  { %v3371_v56 = vadd.f32 1e-06, %v3367_v29 }
0x138c   :  { %v3401_v55 = vpop.permute.xlu1 %3400 }
0x138d   :  { %4789 = vrsqrt.f32 %v3371_v56 }
0x138e   :  { %v4784_v59 = vpop.eup %4783 }
0x138f   :  { %v3378_v53 = vmul.f32 %v4784_v59, %v3346_v9 }
0x1390   :  { %v3403_v2 = vpop.permute.xlu1 %3402 }
0x1391   :  { %v3386_v63 = vmul.f32 %v3385_v46, %v3378_v53 }
0x1392   :  { %v4786_v0 = vpop.eup %4785 }
0x1393   :  { %v3410_v14 = vmul.f32 %v3399_v3, %v3386_v63  ;;  %v3380_v5 = vmul.f32 %v4786_v0, %v3348_v19 }
0x1394   :  { %v3405_v13 = vpop.permute.xlu1 %3404 }
0x1395   :  { %v3414_v32 = vadd.f32 %v3410_v14, %v49_v38  ;;  %v3388_v7 = vmul.f32 %v3385_v46, %v3380_v5 }
0x1396   :  { %v4788_v1 = vpop.eup %4787 }
0x1397   :  { %v5835_v10 = vadd.f32 %v3414_v32, %v5444_v35  ;;  %v3412_v50 = vmul.f32 %v3403_v2, %v3388_v7  ;;  %v3381_v12 = vmul.f32 %v4788_v1, %v3349_v24 }
0x1399   :  { %v3416_v54 = vadd.f32 %v3412_v50, %v61_v44  ;;  %v3389_v47 = vmul.f32 %v3385_v46, %v3381_v12  ;;  %v3422_v34 = vmul.f32 %v5835_v10, %v5835_v10  ;;  %v5884_v50 = vld [vmem:[%s6023_s2 + $0x20] sm:$0xff] }
0x139a   :  { %v4790_v9 = vpop.eup %4789  ;;  %v3502_v12 = vadd.f32 1.0, %v5884_v50 }
0x139b   :  { %v3379_v15 = vmul.f32 %v4790_v9, %v3347_v27  ;;  %v5840_v40 = vadd.f32 %v3416_v54, %v5453_v26  ;;  %v3413_v19 = vmul.f32 %v3405_v13, %v3389_v47  ;;  %v3426_v18 = vsel %vm114_vm0, %v3422_v34, 0.0  ;;  %v5890_v13 = vld [vmem:[%s6023_s2 + $0x50] sm:$0xff]  ;;  %v5897_v47 = vld [vmem:[%s6023_s2 + $0x80] sm:$0xff] }
0x139c   :  { %3427 = vadd.xlane.f32.xlu0 %v3426_v18  ;;  %v3503_v54 = vadd.f32 1.0, %v5890_v13  ;;  %v3504_v34 = vadd.f32 1.0, %v5897_v47  ;;  %v5904_v9 = vld [vmem:[%s6023_s2 + $0xb0] sm:$0xff] }
0x139d   :  { %v3387_v20 = vmul.f32 %v3385_v46, %v3379_v15  ;;  %v3417_v35 = vadd.f32 %v3413_v19, %v67_v48  ;;  %v3424_v24 = vmul.f32 %v5840_v40, %v5840_v40  ;;  %v3505_v15 = vadd.f32 1.0, %v5904_v9  ;;  %v4581_v19 = vld [vmem:[%s6030_s9 + $0x34] ss:$8 sps:$4 sm:$0xff]   ;;  %v4579_v18 = vld [vmem:[%s6030_s9 + $0x30] ss:$8 sps:$4 sm:$0xff]  }
0x139e   :  { %3594 = vmatprep.subr.bf16.mxu1 %v4581_v19  ;;  %v4597_v19 = vld [vmem:[%s6031_s10 + $0x8] sm:$0xff]  }
0x139f   :  { %v3411_v6 = vmul.f32 %v3401_v55, %v3387_v20  ;;  %v5846_v11 = vadd.f32 %v3417_v35, %v5461_v36  ;;  %v3432_v17 = vsel %vm114_vm0, %v3424_v24, 0.0  ;;  %3595 = vmatpush1.bf16.msra.mxu1 %v4579_v18  ;;  %v4584_v20 = vld [vmem:[%s6030_s9 + $0x24] ss:$8 sps:$4 sm:$0xff]   ;;  %v4582_v35 = vld [vmem:[%s6030_s9 + $0x20] ss:$8 sps:$4 sm:$0xff]  }
0x13a0   :  { %3433 = vadd.xlane.f32.xlu0 %v3432_v17  ;;  %3596 = vmatprep.subr.bf16.mxu1 %v4584_v20  ;;  %v4587_v24 = vld [vmem:[%s6030_s9 + $0x14] ss:$8 sps:$4 sm:$0xff]   ;;  %v4590_v17 = vld [vmem:[%s6030_s9 + $0x4] ss:$8 sps:$4 sm:$0xff]  }
0x13a1   :  { %v3415_v27 = vadd.f32 %v3411_v6, %v55_v30  ;;  %v3425_v26 = vmul.f32 %v5846_v11, %v5846_v11  ;;  %v4585_v6 = vld [vmem:[%s6030_s9 + $0x10] ss:$8 sps:$4 sm:$0xff]   ;;  %v4598_v18 = vld [vmem:[%s6031_s10] sm:$0xff]  }
0x13a3   :  { %v5852_v28 = vadd.f32 %v3415_v27, %v5471_v62  ;;  %v3435_v38 = vsel %vm114_vm0, %v3425_v26, 0.0  ;;  %3597 = vmatpush1.bf16.msra.mxu1 %v4582_v35  ;;  %v4588_v27 = vld [vmem:[%s6030_s9] ss:$8 sps:$4 sm:$0xff]   ;;  %v4877_v26 = vmov 0  }
0x13a4   :  { %3436 = vadd.xlane.f32.xlu0 %v3435_v38  ;;  %3598 = vmatprep.subr.bf16.mxu1 %v4587_v24 }
0x13a5   :  { %v3423_v33 = vmul.f32 %v5852_v28, %v5852_v28  ;;  %3618 = vmatprep.mubr.bf16.mxu1 %v4877_v26 }
0x13a7   :  { %v3429_v43 = vsel %vm114_vm0, %v3423_v33, 0.0  ;;  %3599 = vmatpush1.bf16.msra.mxu1 %v4585_v6 }
0x13a8   :  { %3430 = vadd.xlane.f32.xlu1 %v3429_v43  ;;  %3600 = vmatprep.subr.bf16.mxu1 %v4590_v17 }
0x13ab   :  { %3601 = vmatpush1.bf16.msra.mxu1 %v4588_v27 }
0x1425   :  { %v3428_v36 = vpop.xlane.xlu0 %3427 }
0x1426   :  { %v3438_v44 = vmul.f32 0.015625, %v3428_v36 }
0x1428   :  { %v3442_v45 = vadd.f32 1e-06, %v3438_v44 }
0x1429   :  { %v3434_v48 = vpop.xlane.xlu0 %3433 }
0x142a   :  { %4791 = vrsqrt.f32 %v3442_v45  ;;  %v3440_v30 = vmul.f32 0.015625, %v3434_v48 }
0x142c   :  { %v3444_v37 = vadd.f32 1e-06, %v3440_v30 }
0x142d   :  { %v3437_v31 = vpop.xlane.xlu0 %3436 }
0x142e   :  { %4793 = vrsqrt.f32 %v3444_v37  ;;  %v3441_v62 = vmul.f32 0.015625, %v3437_v31 }
0x1430   :  { %v3445_v49 = vadd.f32 1e-06, %v3441_v62 }
0x1431   :  { %v3431_v39 = vpop.xlane.xlu1 %3430 }
0x1432   :  { %4795 = vrsqrt.f32 %v3445_v49  ;;  %v3439_v23 = vmul.f32 0.015625, %v3431_v39 }
0x1434   :  { %v3443_v51 = vadd.f32 1e-06, %v3439_v23 }
0x1436   :  { %4797 = vrsqrt.f32 %v3443_v51 }
0x1437   :  { %v4792_v52 = vpop.eup %4791 }
0x1438   :  { %v3450_v16 = vmul.f32 %v4792_v52, %v5835_v10 }
0x143a   :  { %v5862_v57 = vmul.f32 %v3457_v21, %v3450_v16 }
0x143b   :  { %v4794_v8 = vpop.eup %4793 }
0x143c   :  { %v3462_v29 = vmul.f32 %v5862_v57, %v5862_v57  ;;  %v3452_v56 = vmul.f32 %v4794_v8, %v5840_v40 }
0x143e   :  { %v3466_v55 = vsel %vm114_vm0, %v3462_v29, 0.0  ;;  %v5868_v46 = vmul.f32 %v3457_v21, %v3452_v56 }
0x143f   :  { %v4796_v59 = vpop.eup %4795  ;;  %3467 = vadd.xlane.f32.xlu0 %v3466_v55 }
0x1440   :  { %v3464_v61 = vmul.f32 %v5868_v46, %v5868_v46  ;;  %v3453_v53 = vmul.f32 %v4796_v59, %v5846_v11 }
0x1442   :  { %v3472_v3 = vsel %vm114_vm0, %v3464_v61, 0.0  ;;  %v5874_v63 = vmul.f32 %v3457_v21, %v3453_v53 }
0x1443   :  { %v4798_v0 = vpop.eup %4797  ;;  %3473 = vadd.xlane.f32.xlu0 %v3472_v3 }
0x1444   :  { %v3465_v2 = vmul.f32 %v5874_v63, %v5874_v63  ;;  %v3451_v14 = vmul.f32 %v4798_v0, %v5852_v28 }
0x1446   :  { %v3475_v5 = vsel %vm114_vm0, %v3465_v2, 0.0  ;;  %v3459_v32 = vmul.f32 %v3457_v21, %v3451_v14  ;;  %v3497_v21 = vrot.slane %v5793_v42, %v1877_v25 }
0x1447   :  { %3476 = vadd.xlane.f32.xlu1 %v3475_v5 }
0x1448   :  { %v3463_v7 = vmul.f32 %v3459_v32, %v3459_v32 }
0x144a   :  { %v3469_v1 = vsel %vm114_vm0, %v3463_v7, 0.0 }
0x144b   :  { %3470 = vadd.xlane.f32.xlu1 %v3469_v1 }
0x1459   :  { %3510 = vrot.lane.b32.xlu0 %v3502_v12, %s4868_s14 }
0x145c   :  { %3512 = vrot.lane.b32.xlu1 %v3503_v54, %s4868_s14 }
0x1460   :  { %3514 = vrot.lane.b32.xlu1 %v3504_v34, %s4868_s14 }
0x1464   :  { %3516 = vrot.lane.b32.xlu1 %v3505_v15, %s4868_s14  ;;  %v4596_v15 = vld [vmem:[%s6031_s10 + $0x10] sm:$0xff]  }
0x14c8   :  { %v3468_v38 = vpop.xlane.xlu0 %3467 }
0x14c9   :  { %v3478_v33 = vmul.f32 0.015625, %v3468_v38 }
0x14cb   :  { %v3482_v43 = vadd.f32 1e-06, %v3478_v33 }
0x14cc   :  { %v3474_v36 = vpop.xlane.xlu0 %3473 }
0x14cd   :  { %v3480_v44 = vmul.f32 0.015625, %v3474_v36  ;;  %4799 = vrsqrt.f32 %v3482_v43 }
0x14cf   :  { %v3484_v37 = vadd.f32 1e-06, %v3480_v44 }
0x14d0   :  { %v3477_v45 = vpop.xlane.xlu1 %3476  ;;  %v3511_v56 = vpop.permute.xlu0 %3510 }
0x14d1   :  { %v3481_v48 = vmul.f32 0.015625, %v3477_v45 }
0x14d3   :  { %v3485_v30 = vadd.f32 1e-06, %v3481_v48 }
0x14d4   :  { %v3471_v31 = vpop.xlane.xlu1 %3470 }
0x14d5   :  { %v3479_v62 = vmul.f32 0.015625, %v3471_v31  ;;  %4801 = vrsqrt.f32 %v3485_v30 }
0x14d6   :  { %4803 = vrsqrt.f32 %v3484_v37 }
0x14d7   :  { %v3483_v49 = vadd.f32 1e-06, %v3479_v62 }
0x14d8   :  { %v3513_v23 = vpop.permute.xlu1 %3512 }
0x14d9   :  { %4805 = vrsqrt.f32 %v3483_v49 }
0x14da   :  { %v4800_v39 = vpop.eup %4799 }
0x14db   :  { %v3490_v51 = vmul.f32 %v4800_v39, %v5862_v57 }
0x14dc   :  { %v3515_v55 = vpop.permute.xlu1 %3514 }
0x14dd   :  { %v3498_v8 = vmul.f32 %v3497_v21, %v3490_v51 }
0x14df   :  { %v3522_v53 = vmul.f32 %v3511_v56, %v3498_v8 }
0x14e0   :  { %v3517_v57 = vpop.permute.xlu1 %3516 }
0x14e1   :  { %v3526_v5 = vadd.f32 %v3522_v53, %v5884_v50  ;;  %v4592_v50 = vld [vmem:[%s6031_s10 + $0x30] sm:$0xff]  }
0x14e2   :  { %v4802_v52 = vpop.eup %4801 }
0x14e3   :  { %v4804_v16 = vpop.eup %4803  ;;  %v3493_v61 = vmul.f32 %v4802_v52, %v5874_v63 }
0x14e4   :  { %v3492_v0 = vmul.f32 %v4804_v16, %v5868_v46  ;;  %v4591_v46 = vld [vmem:[%s6031_s10 + $0x38] sm:$0xff]  }
0x14e5   :  { %v3501_v14 = vmul.f32 %v3497_v21, %v3493_v61  ;;  %4460 = vmatprep.subr.bf16.mxu0 %v4591_v46 }
0x14e6   :  { %v4806_v29 = vpop.eup %4805  ;;  %v3500_v7 = vmul.f32 %v3497_v21, %v3492_v0  ;;  %4461 = vmatpush3.bf16.msra.mxu0 %v4591_v46 }
0x14e7   :  { %v3491_v59 = vmul.f32 %v4806_v29, %v3459_v32  ;;  %v3525_v12 = vmul.f32 %v3517_v57, %v3501_v14  ;;  %4462 = vmatprep.subr.bf16.mxu0 %v4592_v50 }
0x14e8   :  { %v3524_v54 = vmul.f32 %v3515_v55, %v3500_v7 }
0x14e9   :  { %v3499_v3 = vmul.f32 %v3497_v21, %v3491_v59  ;;  %v3529_v63 = vadd.f32 %v3525_v12, %v5904_v9  ;;  %v4595_v9 = vld [vmem:[%s6031_s10 + $0x18] sm:$0xff]  }
0x14ea   :  { %v3528_v32 = vadd.f32 %v3524_v54, %v5897_v47  ;;  %4463 = vmatpush3.bf16.msra.mxu0 %v4592_v50  ;;  %v4594_v47 = vld [vmem:[%s6031_s10 + $0x20] sm:$0xff]  }
0x14eb   :  { %v3523_v2 = vmul.f32 %v3513_v23, %v3499_v3 }
0x14ec   :  { %v3531_v34 = vpack.c.bf16 %v3529_v63, %v3528_v32 }
0x14ed   :  { %v3527_v25 = vadd.f32 %v3523_v2, %v5890_v13  ;;  %v4593_v13 = vld [vmem:[%s6031_s10 + $0x28] sm:$0xff]  }
0x14ee   :  { %4464 = vmatprep.subr.bf16.mxu0 %v4593_v13 }
0x14ef   :  { %v3530_v1 = vpack.c.bf16 %v3527_v25, %v3526_v5  ;;  %4465 = vmatpush3.bf16.msra.mxu0 %v4593_v13  ;;  %v3785_v25 = vrot.slane %v5793_v42, %v186_v4 }
0x14f0   :  { %4466 = vmatprep.subr.bf16.mxu0 %v4594_v47 }
0x14f1   :  { %4046 = vmatmul.mubr.msk.bf16.vlgmr.msra.gmra.mxu1 %vm114_vm0, %v3530_v1 }
0x14f2   :  { %3628 = vmatprep.mubr.bf16.mxu1 %v4877_v26 }
0x14f3   :  { %4467 = vmatpush3.bf16.msra.mxu0 %v4594_v47 }
0x14f4   :  { %4468 = vmatprep.subr.bf16.mxu0 %v4595_v9 }
0x14f7   :  { %4469 = vmatpush3.bf16.msra.mxu0 %v4595_v9 }
0x14f8   :  { %4470 = vmatprep.subr.bf16.mxu0 %v4596_v15 }
0x14f9   :  { %4047 = vmatmul.mubr.msk.bf16.gmra.mxu1 %vm114_vm0, %v3531_v34 }
0x14fb   :  { %4471 = vmatpush3.bf16.msra.mxu0 %v4596_v15 }
0x14fc   :  { %4472 = vmatprep.subr.bf16.mxu0 %v4597_v19 }
0x14ff   :  { %4473 = vmatpush3.bf16.msra.mxu0 %v4597_v19 }
0x1500   :  { %4474 = vmatprep.subr.bf16.mxu0 %v4598_v18 }
0x1503   :  { %4475 = vmatpush3.bf16.msra.mxu0 %v4598_v18 }
0x15b1   :  { %v3620_v20 = vpop.f32.mrf.mxu1 }
0x15b2   :  { %v3639_v35 = vsub.f32 0.0, %v3620_v20 }
0x15b3   :  { %v3622_v24 = vpop.f32.mrf.mxu1 }
0x15b4   :  { %v3643_v6 = vmul.f32 1.442695, %v3639_v35 }
0x15b5   :  { %v3624_v17 = vpop.f32.mrf.mxu1 }
0x15b6   :  { %4807 = vpow2.f32 %v3643_v6  ;;  %v3640_v27 = vsub.f32 0.0, %v3624_v17 }
0x15b7   :  { %v3626_v26 = vpop.f32.mrf.mxu1 }
0x15b8   :  { %v3645_v38 = vmul.f32 1.442695, %v3640_v27 }
0x15b9   :  { %v3630_v33 = vpop.f32.mrf.mxu1 }
0x15ba   :  { %4809 = vpow2.f32 %v3645_v38  ;;  %v3641_v43 = vsub.f32 0.0, %v3630_v33 }
0x15bb   :  { %v3632_v36 = vpop.f32.mrf.mxu1 }
0x15bc   :  { %v3647_v44 = vmul.f32 1.442695, %v3641_v43 }
0x15bd   :  { %v3634_v45 = vpop.f32.mrf.mxu1 }
0x15be   :  { %4811 = vpow2.f32 %v3647_v44  ;;  %v3642_v48 = vsub.f32 0.0, %v3634_v45 }
0x15bf   :  { %v3636_v2 = vpop.f32.mrf.mxu1 }
0x15c0   :  { %v3649_v30 = vmul.f32 1.442695, %v3642_v48 }
0x15c2   :  { %4813 = vpow2.f32 %v3649_v30 }
0x15c3   :  { %v4808_v37 = vpop.eup %4807 }
0x15c4   :  { %v3651_v31 = vadd.f32 1.0, %v4808_v37 }
0x15c6   :  { %4815 = vrcp.f32 %v3651_v31  ;;  %v3825_v31 = vrot.slane %v5806_v58, %v3304_v41 }
0x15c7   :  { %v4810_v62 = vpop.eup %4809 }
0x15c8   :  { %v3652_v49 = vadd.f32 1.0, %v4810_v62 }
0x15ca   :  { %4817 = vrcp.f32 %v3652_v49 }
0x15cb   :  { %v4812_v39 = vpop.eup %4811 }
0x15cc   :  { %v3653_v23 = vadd.f32 1.0, %v4812_v39 }
0x15ce   :  { %4819 = vrcp.f32 %v3653_v23 }
0x15cf   :  { %v4814_v51 = vpop.eup %4813 }
0x15d0   :  { %v3654_v21 = vadd.f32 1.0, %v4814_v51 }
0x15d2   :  { %4821 = vrcp.f32 %v3654_v21 }
0x15d3   :  { %v4816_v52 = vpop.eup %4815 }
0x15d4   :  { %v3659_v16 = vmul.f32 %v4816_v52, %v3620_v20  ;;  %v5979_v20 = vld [vmem:[%s6023_s2 + $0x58] sm:$0xff] }
0x15d5   :  { %v3871_v35 = vadd.f32 1.0, %v5979_v20 }
0x15d6   :  { %v3663_v56 = vmul.f32 %v3659_v16, %v3622_v24  ;;  %v5985_v24 = vld [vmem:[%s6023_s2 + $0x88] sm:$0xff] }
0x15d7   :  { %v4818_v8 = vpop.eup %4817  ;;  %v3872_v6 = vadd.f32 1.0, %v5985_v24 }
0x15d8   :  { %v3660_v29 = vmul.f32 %v4818_v8, %v3624_v17 }
0x15da   :  { %v3664_v55 = vmul.f32 %v3660_v29, %v3626_v26 }
0x15db   :  { %v4820_v59 = vpop.eup %4819 }
0x15dc   :  { %v3667_v61 = vpack.c.bf16 %v3664_v55, %v3663_v56  ;;  %v3661_v53 = vmul.f32 %v4820_v59, %v3630_v33 }
0x15de   :  { %4476 = vmatprep.mubr.bf16.mxu0 %v3667_v61  ;;  %v3665_v14 = vmul.f32 %v3661_v53, %v3632_v36 }
0x15df   :  { %v4822_v3 = vpop.eup %4821 }
0x15e0   :  { %v3662_v0 = vmul.f32 %v4822_v3, %v3634_v45 }
0x15e2   :  { %v3666_v57 = vmul.f32 %v3662_v0, %v3636_v2 }
0x15e4   :  { %v3668_v5 = vpack.c.bf16 %v3666_v57, %v3665_v14  ;;  %v51_v14 = vld [vmem:[%s6023_s2 + $0x28] sm:$0xff] }
0x15e5   :  { %v3870_v57 = vadd.f32 1.0, %v51_v14 }
0x15e6   :  { %4477 = vmatmul.mubr.bf16.vlgmr.msra.gmra.mxu0 %v3668_v5  ;;  %v69_v5 = vld [vmem:[%s6023_s2 + $0xb8] sm:$0xff]  ;;  %s4878_s2 = smov [#allocation2]  }
0x16a6   :  { %v4478_v7 = vpop.f32.mrf.mxu0 }
0x16a7   :  { %v3788_v12 = vmul.f32 %v4478_v7, %v3785_v25 }
0x16a8   :  { %v3767_v1 = vpop.f32.mrf.mxu0 }
0x16a9   :  { %v3786_v54 = vmul.f32 %v3785_v25, %v3767_v1  ;;  %v3792_v46 = vmul.f32 %v3788_v12, %v3788_v12 }
0x16aa   :  { %v4479_v63 = vpop.f32.mrf.mxu0 }
0x16ab   :  { %v3790_v32 = vmul.f32 %v3786_v54, %v3786_v54  ;;  %v3789_v50 = vmul.f32 %v4479_v63, %v3785_v25  ;;  %v3800_v19 = vsel %vm114_vm0, %v3792_v46, 0.0 }
0x16ac   :  { %v3770_v34 = vpop.f32.mrf.mxu0 }
0x16ad   :  { %v3787_v13 = vmul.f32 %v3785_v25, %v3770_v34  ;;  %v3794_v47 = vsel %vm114_vm0, %v3790_v32, 0.0  ;;  %v3793_v15 = vmul.f32 %v3789_v50, %v3789_v50  ;;  %v3873_v25 = vadd.f32 1.0, %v69_v5 }
0x16ae   :  { %3795 = vadd.xlane.f32.xlu0 %v3794_v47 }
0x16af   :  { %v3791_v9 = vmul.f32 %v3787_v13, %v3787_v13  ;;  %v3803_v4 = vsel %vm114_vm0, %v3793_v15, 0.0 }
0x16b1   :  { %v3797_v18 = vsel %vm114_vm0, %v3791_v9, 0.0 }
0x16b2   :  { %3801 = vadd.xlane.f32.xlu0 %v3800_v19  ;;  %3798 = vadd.xlane.f32.xlu1 %v3797_v18  ;;  %v3865_v18 = vrot.slane %v5793_v42, %v3344_v60 }
0x16b6   :  { %3804 = vadd.xlane.f32.xlu0 %v3803_v4 }
0x16c3   :  { %3880 = vrot.lane.b32.xlu1 %v3871_v35, %s4868_s14 }
0x16c7   :  { %3882 = vrot.lane.b32.xlu1 %v3872_v6, %s4868_s14 }
0x1737   :  { %v3796_v17 = vpop.xlane.xlu0 %3795 }
0x1738   :  { %v3806_v27 = vmul.f32 0.015625, %v3796_v17 }
0x173a   :  { %v3810_v26 = vadd.f32 1e-06, %v3806_v27 }
0x173b   :  { %v3802_v38 = vpop.xlane.xlu0 %3801  ;;  %v3799_v33 = vpop.xlane.xlu1 %3798 }
0x173c   :  { %4823 = vrsqrt.f32 %v3810_v26  ;;  %v3808_v43 = vmul.f32 0.015625, %v3802_v38  ;;  %v3807_v36 = vmul.f32 0.015625, %v3799_v33 }
0x173e   :  { %v3812_v44 = vadd.f32 1e-06, %v3808_v43  ;;  %v3811_v45 = vadd.f32 1e-06, %v3807_v36 }
0x173f   :  { %v3805_v48 = vpop.xlane.xlu0 %3804  ;;  %v3881_v7 = vpop.permute.xlu1 %3880 }
0x1740   :  { %4825 = vrsqrt.f32 %v3812_v44  ;;  %v3809_v30 = vmul.f32 0.015625, %v3805_v48 }
0x1741   :  { %4827 = vrsqrt.f32 %v3811_v45 }
0x1742   :  { %v3813_v37 = vadd.f32 1e-06, %v3809_v30 }
0x1743   :  { %v3883_v63 = vpop.permute.xlu1 %3882 }
0x1744   :  { %4829 = vrsqrt.f32 %v3813_v37 }
0x1749   :  { %v4824_v62 = vpop.eup %4823 }
0x174a   :  { %v3818_v49 = vmul.f32 %v4824_v62, %v3786_v54 }
0x174c   :  { %v3826_v39 = vmul.f32 %v3825_v31, %v3818_v49 }
0x174d   :  { %v4826_v23 = vpop.eup %4825 }
0x174e   :  { %v4828_v51 = vpop.eup %4827  ;;  %v3830_v21 = vmul.f32 %v3826_v39, %v3826_v39  ;;  %v3820_v52 = vmul.f32 %v4826_v23, %v3788_v12 }
0x174f   :  { %v3819_v29 = vmul.f32 %v4828_v51, %v3787_v13 }
0x1750   :  { %v3834_v16 = vsel %vm114_vm0, %v3830_v21, 0.0  ;;  %v3828_v8 = vmul.f32 %v3825_v31, %v3820_v52 }
0x1751   :  { %v4830_v56 = vpop.eup %4829  ;;  %3835 = vadd.xlane.f32.xlu0 %v3834_v16  ;;  %v3827_v3 = vmul.f32 %v3825_v31, %v3819_v29 }
0x1752   :  { %v3832_v55 = vmul.f32 %v3828_v8, %v3828_v8  ;;  %v3821_v59 = vmul.f32 %v4830_v56, %v3789_v50 }
0x1753   :  { %v3831_v0 = vmul.f32 %v3827_v3, %v3827_v3 }
0x1754   :  { %v3840_v61 = vsel %vm114_vm0, %v3832_v55, 0.0  ;;  %v3829_v53 = vmul.f32 %v3825_v31, %v3821_v59 }
0x1755   :  { %3841 = vadd.xlane.f32.xlu0 %v3840_v61  ;;  %v3837_v2 = vsel %vm114_vm0, %v3831_v0, 0.0 }
0x1756   :  { %v3833_v41 = vmul.f32 %v3829_v53, %v3829_v53 }
0x1758   :  { %v3843_v58 = vsel %vm114_vm0, %v3833_v41, 0.0 }
0x1759   :  { %3844 = vadd.xlane.f32.xlu1 %v3843_v58 }
0x175d   :  { %3838 = vadd.xlane.f32.xlu1 %v3837_v2 }
0x176b   :  { %3878 = vrot.lane.b32.xlu0 %v3870_v57, %s4868_s14 }
0x176e   :  { %3884 = vrot.lane.b32.xlu1 %v3873_v25, %s4868_s14  ;;  %s3911_s14 = sshll.u32 %s4878_s2, 4  ;;  %s3912_s14 = int_to_ptr.vmem [resolvable:$true] %s3911_s14 }
0x176f   :  { %s4846_s17 = scalar_lea.vmem %s3912_s14, 512  ;;  %p4851_p1 = scmp.lt.s32.totalorder %s3912_s14, %s3912_s14 }
0x1770   :  { %p4847_p0 = scmp.ne.s32.totalorder %s3912_s14, %s4846_s17  ;;  %p4852_p2 = scmp.lt.s32.totalorder %s4846_s17, %s4846_s17 }
0x1772   :  { %p4853_p3 = por %p4852_p2, %p4851_p1 }
0x1774   :  { %p4854_p4 = pnand %p4853_p3, %p4847_p0 }
0x17da   :  { %v3836_v1 = vpop.xlane.xlu0 %3835 }
0x17db   :  { %v3846_v12 = vmul.f32 0.015625, %v3836_v1 }
0x17dd   :  { %v3850_v54 = vadd.f32 1e-06, %v3846_v12 }
0x17de   :  { %v3842_v32 = vpop.xlane.xlu0 %3841 }
0x17df   :  { %4831 = vrsqrt.f32 %v3850_v54  ;;  %v3848_v34 = vmul.f32 0.015625, %v3842_v32 }
0x17e1   :  { %v3852_v46 = vadd.f32 1e-06, %v3848_v34 }
0x17e2   :  { %v3845_v50 = vpop.xlane.xlu1 %3844  ;;  %v3879_v6 = vpop.permute.xlu0 %3878 }
0x17e3   :  { %4833 = vrsqrt.f32 %v3852_v46  ;;  %v3849_v13 = vmul.f32 0.015625, %v3845_v50 }
0x17e5   :  { %v3853_v47 = vadd.f32 1e-06, %v3849_v13 }
0x17e6   :  { %v3839_v9 = vpop.xlane.xlu1 %3838 }
0x17e7   :  { %4835 = vrsqrt.f32 %v3853_v47  ;;  %v3847_v15 = vmul.f32 0.015625, %v3839_v9 }
0x17e9   :  { %v3851_v19 = vadd.f32 1e-06, %v3847_v15 }
0x17ea   :  { %v3885_v30 = vpop.permute.xlu1 %3884 }
0x17eb   :  { %4837 = vrsqrt.f32 %v3851_v19 }
0x17ec   :  { %v4832_v4 = vpop.eup %4831 }
0x17ed   :  { %v3858_v35 = vmul.f32 %v4832_v4, %v3826_v39 }
0x17ef   :  { %v3866_v17 = vmul.f32 %v3865_v18, %v3858_v35 }
0x17f0   :  { %v4834_v27 = vpop.eup %4833 }
0x17f1   :  { %v3860_v26 = vmul.f32 %v4834_v27, %v3828_v8  ;;  %v3890_v38 = vmul.f32 %v3879_v6, %v3866_v17 }
0x17f3   :  { %v3868_v33 = vmul.f32 %v3865_v18, %v3860_v26  ;;  %v3894_v43 = vadd.f32 %v3890_v38, %v51_v14 }
0x17f4   :  { %v4836_v36 = vpop.eup %4835 }
0x17f5   :  { %v3892_v44 = vmul.f32 %v3883_v63, %v3868_v33  ;;  %v3898_v45 = vadd.f32 %v3894_v43, %v5835_v10  ;;  %v3861_v48 = vmul.f32 %v4836_v36, %v3829_v53 }
0x17f7   :  { %3902 = vst.msk [vmem:[#allocation2] sm:$0xff] %vm114_vm0, %v3898_v45  ;;  %v3869_v22 = vmul.f32 %v3865_v18, %v3861_v48  ;;  %v3896_v42 = vadd.f32 %v3892_v44, %v5985_v24 }
0x17f8   :  { %v4838_v60 = vpop.eup %4837 }
0x17f9   :  { %v3859_v37 = vmul.f32 %v4838_v60, %v3827_v3  ;;  %v3893_v31 = vmul.f32 %v3885_v30, %v3869_v22  ;;  %v3900_v62 = vadd.f32 %v3896_v42, %v5840_v40 }
0x17fb   :  { %v3867_v49 = vmul.f32 %v3865_v18, %v3859_v37  ;;  %v3897_v39 = vadd.f32 %v3893_v31, %v69_v5  ;;  %3904 = vst.msk [vmem:[#allocation2 + $0x10] sm:$0xff] %vm114_vm0, %v3900_v62 }
0x17fd   :  { %v3891_v23 = vmul.f32 %v3881_v7, %v3867_v49  ;;  %v3901_v51 = vadd.f32 %v3897_v39, %v5846_v11 }
0x17ff   :  { %3905 = vst.msk [vmem:[#allocation2 + $0x18] sm:$0xff] %vm114_vm0, %v3901_v51  ;;  %v3895_v10 = vadd.f32 %v3891_v23, %v5979_v20 }
0x1801   :  { %v3899_v24 = vadd.f32 %v3895_v10, %v5852_v28 }
0x1803   :  { %3903 = vst.msk [vmem:[#allocation2 + $0x8] sm:$0xff] %vm114_vm0, %v3899_v24 }
0x1804   :  { %4857 = shalt.err (!%p4854_p4)
}
0x1805   :  { %s4879_s18 = smov 128   ;;  %s4880_s19 = smov 8  }
0x1806   :  { %3917 = dma.vmem_to_hbm [thread:$0]  %s3912_s14, 512, %s6032_s11, [#allocation3], %s4879_s18, %s4879_s18, %s4880_s19  }
0x1807   :  { %4866 = dma.done.wait [#allocation3], 512  }
0x1808   :  { %4867 = vsyncadd [#allocation3], 4294966784 }
0x1809   :  { %3921 = vsyncpa [#allocation3], 1 }

</bundles_post_ra>
